<compile_context>
chip_gen: v6e
topology: v6e:2x2x1
jax: 0.10.0
libtpu: 0.0.40
codegen_flags: <defaults>
</compile_context>

<pallas_src>
import functools
import math

import jax
import jax.numpy as jnp
from jax.experimental import pallas as pl
from jax.experimental.pallas import tpu as pltpu

# ---- tiny DistilBERT-like config ----
VOCAB = 128
MAX_POS = 16
HIDDEN = 32
HEADS = 4
HEAD_DIM = HIDDEN // HEADS
FFN = 64
LAYERS = 2
N_CLASSES = 4
LN_EPS = 1e-12
ATTN_SCALE = 1.0 / math.sqrt(HEAD_DIM)


# ----------------- in-kernel helpers (operate on VMEM values) -----------------

def _layernorm(x, g, b):
    mu = jnp.mean(x, axis=-1, keepdims=True)
    var = jnp.mean((x - mu) ** 2, axis=-1, keepdims=True)
    return (x - mu) * jax.lax.rsqrt(var + LN_EPS) * g + b


def _gelu(y):
    # TODO(synk): DistilBERT uses exact (erf) GELU; tanh approximation used here.
    c = math.sqrt(2.0 / math.pi)
    return 0.5 * y * (1.0 + jnp.tanh(c * (y + 0.044715 * y * y * y)))


# ----------------- single fused forward kernel -----------------

def _fused_forward_kernel(
    # dynamic inputs
    ids_ref, pos_ids_ref, mask_ref,
    # embedding params
    word_emb_ref, pos_emb_ref, emb_ln_g_ref, emb_ln_b_ref,
    # per-layer params, stacked on a leading LAYERS axis
    wqkv_ref, bqkv_ref, wo_ref, bo_ref, aln_g_ref, aln_b_ref,
    ff1_w_ref, ff1_b_ref, ff2_w_ref, ff2_b_ref, oln_g_ref, oln_b_ref,
    # head params
    pre_w_ref, pre_b_ref, cls_w_ref, cls_b_ref,
    # output
    o_ref,
    # scratch
    ctx_ref,
    *, batch, seq,
):
    bs = batch * seq

    # ---- embeddings: in-kernel gather via iota one-hot matmuls (MXU) ----
    ids = ids_ref[...]                                                # [bs, 1] i32
    vocab_iota = jax.lax.broadcasted_iota(jnp.int32, (bs, VOCAB), 1)
    word_onehot = (vocab_iota == ids).astype(jnp.float32)             # [bs, VOCAB]
    word = jnp.dot(word_onehot, word_emb_ref[...],
                   preferred_element_type=jnp.float32)                # [bs, HIDDEN]

    pos_ids = pos_ids_ref[...]                                        # [bs, 1] i32
    pos_iota = jax.lax.broadcasted_iota(jnp.int32, (bs, MAX_POS), 1)
    pos_onehot = (pos_iota == pos_ids).astype(jnp.float32)            # [bs, MAX_POS]
    pos = jnp.dot(pos_onehot, pos_emb_ref[...],
                  preferred_element_type=jnp.float32)                 # [bs, HIDDEN]

    h = _layernorm(word + pos, emb_ln_g_ref[...], emb_ln_b_ref[...])  # [bs, HIDDEN]

    mask = mask_ref[...]                                              # [batch, seq] f32

    # ---- transformer layers (all weights resident in VMEM) ----
    for l in range(LAYERS):
        # fused QKV projection: one [bs, 3*HIDDEN] matmul instead of three
        qkv = jnp.dot(h, wqkv_ref[l],
                      preferred_element_type=jnp.float32) + bqkv_ref[l]

        # per-(batch, head) scaled dot-product attention, fully in VMEM
        for b in range(batch):
            r0, r1 = b * seq, (b + 1) * seq
            mask_b = mask[b:b + 1, :]                                 # [1, seq] -> bcast over queries
            for hd in range(HEADS):
                c = hd * HEAD_DIM
                q = qkv[r0:r1, c:c + HEAD_DIM]
                k = qkv[r0:r1, HIDDEN + c:HIDDEN + c + HEAD_DIM]
                v = qkv[r0:r1, 2 * HIDDEN + c:2 * HIDDEN + c + HEAD_DIM]
                # s = q @ k^T  (contract head_dim; no explicit transpose)
                s = jax.lax.dot_general(
                    q, k, (((1,), (1,)), ((), ())),
                    preferred_element_type=jnp.float32) * ATTN_SCALE
                s = jnp.where(mask_b > 0.5, s, -1e9)                  # mask keys
                m = jnp.max(s, axis=-1, keepdims=True)
                p = jnp.exp(s - m)
                p = p / jnp.sum(p, axis=-1, keepdims=True)
                ctx_ref[r0:r1, c:c + HEAD_DIM] = jnp.dot(
                    p, v, preferred_element_type=jnp.float32)

        attn_out = jnp.dot(ctx_ref[...], wo_ref[l],
                           preferred_element_type=jnp.float32) + bo_ref[l]
        h = _layernorm(h + attn_out, aln_g_ref[l], aln_b_ref[l])

        ff = jnp.dot(h, ff1_w_ref[l],
                     preferred_element_type=jnp.float32) + ff1_b_ref[l]
        ff = _gelu(ff)
        ff = jnp.dot(ff, ff2_w_ref[l],
                     preferred_element_type=jnp.float32) + ff2_b_ref[l]
        h = _layernorm(h + ff, oln_g_ref[l], oln_b_ref[l])

    # ---- classification head on [CLS] token (row b*seq of each sequence) ----
    # select CLS rows with a tiny selection matmul (avoids strided gathers)
    col_iota = jax.lax.broadcasted_iota(jnp.int32, (batch, bs), 1)
    row_iota = jax.lax.broadcasted_iota(jnp.int32, (batch, bs), 0)
    sel = (col_iota == row_iota * seq).astype(jnp.float32)            # [batch, bs]
    cls = jnp.dot(sel, h, preferred_element_type=jnp.float32)         # [batch, HIDDEN]

    pooled = jnp.dot(cls, pre_w_ref[...],
                     preferred_element_type=jnp.float32) + pre_b_ref[...]
    pooled = jnp.maximum(pooled, 0.0)                                 # ReLU pre-classifier
    logits = jnp.dot(pooled, cls_w_ref[...],
                     preferred_element_type=jnp.float32) + cls_b_ref[...]

    # torch.nn.Softmax(dim=1)
    m = jnp.max(logits, axis=1, keepdims=True)
    e = jnp.exp(logits - m)
    o_ref[...] = e / jnp.sum(e, axis=1, keepdims=True)


# ----------------- parameters (deterministic, synthetic) -----------------

def init_params(key):
    def nrm(k, shape, scale=0.02):
        return scale * jax.random.normal(k, shape, jnp.float32)

    keys = iter(jax.random.split(key, 64))
    params = {
        "word_emb": nrm(next(keys), (VOCAB, HIDDEN)),
        "pos_emb": nrm(next(keys), (MAX_POS, HIDDEN)),
        "emb_ln_g": jnp.ones((HIDDEN,), jnp.float32),
        "emb_ln_b": jnp.zeros((HIDDEN,), jnp.float32),
        "layers": [],
        "pre_w": nrm(next(keys), (HIDDEN, HIDDEN)),
        "pre_b": jnp.zeros((HIDDEN,), jnp.float32),
        "cls_w": nrm(next(keys), (HIDDEN, N_CLASSES)),
        "cls_b": jnp.zeros((N_CLASSES,), jnp.float32),
    }
    for _ in range(LAYERS):
        layer = {
            "q_w": nrm(next(keys), (HIDDEN, HIDDEN)), "q_b": jnp.zeros((HIDDEN,), jnp.float32),
            "k_w": nrm(next(keys), (HIDDEN, HIDDEN)), "k_b": jnp.zeros((HIDDEN,), jnp.float32),
            "v_w": nrm(next(keys), (HIDDEN, HIDDEN)), "v_b": jnp.zeros((HIDDEN,), jnp.float32),
            "o_w": nrm(next(keys), (HIDDEN, HIDDEN)), "o_b": jnp.zeros((HIDDEN,), jnp.float32),
            "attn_ln_g": jnp.ones((HIDDEN,), jnp.float32), "attn_ln_b": jnp.zeros((HIDDEN,), jnp.float32),
            "ff1_w": nrm(next(keys), (HIDDEN, FFN)), "ff1_b": jnp.zeros((FFN,), jnp.float32),
            "ff2_w": nrm(next(keys), (FFN, HIDDEN)), "ff2_b": jnp.zeros((HIDDEN,), jnp.float32),
            "out_ln_g": jnp.ones((HIDDEN,), jnp.float32), "out_ln_b": jnp.zeros((HIDDEN,), jnp.float32),
        }
        params["layers"].append(layer)
    return params


def prepare_fused_params(params):
    """One-time host-side prep: fuse QKV weights, stack per-layer params, reshape biases."""
    ls = params["layers"]
    row = lambda x: x.reshape(1, -1)
    fused = (
        params["word_emb"],
        params["pos_emb"],
        row(params["emb_ln_g"]), row(params["emb_ln_b"]),
        jnp.stack([jnp.concatenate([l["q_w"], l["k_w"], l["v_w"]], axis=1) for l in ls]),   # [L,H,3H]
        jnp.stack([row(jnp.concatenate([l["q_b"], l["k_b"], l["v_b"]])) for l in ls]),      # [L,1,3H]
        jnp.stack([l["o_w"] for l in ls]),
        jnp.stack([row(l["o_b"]) for l in ls]),
        jnp.stack([row(l["attn_ln_g"]) for l in ls]),
        jnp.stack([row(l["attn_ln_b"]) for l in ls]),
        jnp.stack([l["ff1_w"] for l in ls]),
        jnp.stack([row(l["ff1_b"]) for l in ls]),
        jnp.stack([l["ff2_w"] for l in ls]),
        jnp.stack([row(l["ff2_b"]) for l in ls]),
        jnp.stack([row(l["out_ln_g"]) for l in ls]),
        jnp.stack([row(l["out_ln_b"]) for l in ls]),
        params["pre_w"], row(params["pre_b"]),
        params["cls_w"], row(params["cls_b"]),
    )
    return fused


# ----------------- forward pass (single fused pallas_call) -----------------

def ohl_forward(fused_params, input_ids, attention_mask):
    B, S = input_ids.shape
    bs = B * S

    ids = input_ids.reshape(bs, 1).astype(jnp.int32)
    pos_ids = jnp.tile(jnp.arange(S, dtype=jnp.int32), B).reshape(bs, 1)
    mask = attention_mask.astype(jnp.float32)  # [B, S]

    kernel = functools.partial(_fused_forward_kernel, batch=B, seq=S)
    # TODO(synk): for non-toy batch sizes, add a grid over the batch axis with
    # dimension_semantics=("parallel",) to shard work across v7x's two TensorCores.
    return pl.pallas_call(
        kernel,
        out_shape=jax.ShapeDtypeStruct((B, N_CLASSES), jnp.float32),
        scratch_shapes=[pltpu.VMEM((bs, HIDDEN), jnp.float32)],
    )(ids, pos_ids, mask, *fused_params)


if __name__ == "__main__":
    B, S = 2, 8
    key = jax.random.PRNGKey(0)
    k_ids, k_params = jax.random.split(key)

    # synthetic tokenized batch (what preprocess_input would have produced)
    input_ids = jax.random.randint(k_ids, (B, S), 0, VOCAB, dtype=jnp.int32)
    attention_mask = jnp.ones((B, S), jnp.int32)

    params = init_params(k_params)
    fused_params = prepare_fused_params(params)

    fwd = jax.jit(functools.partial(ohl_forward, fused_params))
    probs = fwd(input_ids, attention_mask)
    jax.block_until_ready(probs)

    assert probs.shape == (B, N_CLASSES)
    assert bool(jnp.allclose(jnp.sum(probs, axis=1), 1.0, atol=1e-5))
    print("KERNEL_OK")
</pallas_src>

<mosaic_0001>
module attributes {stable_mosaic.version = 11 : i64} {
  func.func @_fused_forward_kernel(%arg0: memref<16x1xi32, #tpu.memory_space<vmem>>, %arg1: memref<16x1xi32, #tpu.memory_space<vmem>>, %arg2: memref<2x8xf32, #tpu.memory_space<vmem>>, %arg3: memref<128x32xf32, #tpu.memory_space<vmem>>, %arg4: memref<16x32xf32, #tpu.memory_space<vmem>>, %arg5: memref<1x32xf32, #tpu.memory_space<vmem>>, %arg6: memref<1x32xf32, #tpu.memory_space<vmem>>, %arg7: memref<2x32x96xf32, #tpu.memory_space<vmem>>, %arg8: memref<2x1x96xf32, #tpu.memory_space<vmem>>, %arg9: memref<2x32x32xf32, #tpu.memory_space<vmem>>, %arg10: memref<2x1x32xf32, #tpu.memory_space<vmem>>, %arg11: memref<2x1x32xf32, #tpu.memory_space<vmem>>, %arg12: memref<2x1x32xf32, #tpu.memory_space<vmem>>, %arg13: memref<2x32x64xf32, #tpu.memory_space<vmem>>, %arg14: memref<2x1x64xf32, #tpu.memory_space<vmem>>, %arg15: memref<2x64x32xf32, #tpu.memory_space<vmem>>, %arg16: memref<2x1x32xf32, #tpu.memory_space<vmem>>, %arg17: memref<2x1x32xf32, #tpu.memory_space<vmem>>, %arg18: memref<2x1x32xf32, #tpu.memory_space<vmem>>, %arg19: memref<32x32xf32, #tpu.memory_space<vmem>>, %arg20: memref<1x32xf32, #tpu.memory_space<vmem>>, %arg21: memref<32x4xf32, #tpu.memory_space<vmem>>, %arg22: memref<1x4xf32, #tpu.memory_space<vmem>>, %arg23: memref<2x4xf32, #tpu.memory_space<vmem>>, %arg24: memref<16x32xf32, #tpu.memory_space<vmem>>) attributes {dimension_semantics = [], scalar_prefetch = 0 : i64, scratch_operands = 1 : i64, tpu.core_type = #tpu.core_type<tc>} {
    %c0 = arith.constant 0 : index
    %c0_0 = arith.constant 0 : index
    %0 = vector.load %arg0[%c0, %c0_0] : memref<16x1xi32, #tpu.memory_space<vmem>>, vector<16x1xi32>
    %1 = tpu.iota {dimensions = array<i32: 1>} : vector<16x128xi32>
    %2 = vector.broadcast %0 : vector<16x1xi32> to vector<16x128xi32>
    %3 = arith.cmpi eq, %1, %2 : vector<16x128xi32>
    %4 = arith.extui %3 : vector<16x128xi1> to vector<16x128xi32>
    %5 = arith.sitofp %4 : vector<16x128xi32> to vector<16x128xf32>
    %c0_1 = arith.constant 0 : index
    %c0_2 = arith.constant 0 : index
    %6 = vector.load %arg3[%c0_1, %c0_2] : memref<128x32xf32, #tpu.memory_space<vmem>>, vector<128x32xf32>
    %cst = arith.constant dense<0.000000e+00> : vector<16x32xf32>
    %7 = tpu.matmul %5, %6, %cst {dimension_numbers = #tpu.dot_dimension_numbers<[1], [0], [0], [1], [0, 0, 1, 1], [], []>} : vector<16x128xf32>, vector<128x32xf32>, vector<16x32xf32> -> vector<16x32xf32>
    %c0_3 = arith.constant 0 : index
    %c0_4 = arith.constant 0 : index
    %8 = vector.load %arg1[%c0_3, %c0_4] : memref<16x1xi32, #tpu.memory_space<vmem>>, vector<16x1xi32>
    %9 = tpu.iota {dimensions = array<i32: 1>} : vector<16x16xi32>
    %10 = vector.broadcast %8 : vector<16x1xi32> to vector<16x16xi32>
    %11 = arith.cmpi eq, %9, %10 : vector<16x16xi32>
    %12 = arith.extui %11 : vector<16x16xi1> to vector<16x16xi32>
    %13 = arith.sitofp %12 : vector<16x16xi32> to vector<16x16xf32>
    %c0_5 = arith.constant 0 : index
    %c0_6 = arith.constant 0 : index
    %14 = vector.load %arg4[%c0_5, %c0_6] : memref<16x32xf32, #tpu.memory_space<vmem>>, vector<16x32xf32>
    %cst_7 = arith.constant dense<0.000000e+00> : vector<16x32xf32>
    %15 = tpu.matmul %13, %14, %cst_7 {dimension_numbers = #tpu.dot_dimension_numbers<[1], [0], [0], [1], [0, 0, 1, 1], [], []>} : vector<16x16xf32>, vector<16x32xf32>, vector<16x32xf32> -> vector<16x32xf32>
    %16 = arith.addf %7, %15 : vector<16x32xf32>
    %c0_8 = arith.constant 0 : index
    %c0_9 = arith.constant 0 : index
    %17 = vector.load %arg5[%c0_8, %c0_9] : memref<1x32xf32, #tpu.memory_space<vmem>>, vector<1x32xf32>
    %c0_10 = arith.constant 0 : index
    %c0_11 = arith.constant 0 : index
    %18 = vector.load %arg6[%c0_10, %c0_11] : memref<1x32xf32, #tpu.memory_space<vmem>>, vector<1x32xf32>
    %cst_12 = arith.constant dense<0.000000e+00> : vector<16xf32>
    %19 = vector.multi_reduction <add>, %16, %cst_12 [1] : vector<16x32xf32> to vector<16xf32>
    %20 = vector.shape_cast %19 : vector<16xf32> to vector<16x1xf32>
    %cst_13 = arith.constant 3.200000e+01 : f32
    %21 = vector.broadcast %cst_13 : f32 to vector<16x1xf32>
    %22 = arith.divf %20, %21 : vector<16x1xf32>
    %23 = vector.broadcast %22 : vector<16x1xf32> to vector<16x32xf32>
    %24 = arith.subf %16, %23 : vector<16x32xf32>
    %25 = arith.mulf %24, %24 : vector<16x32xf32>
    %cst_14 = arith.constant dense<0.000000e+00> : vector<16xf32>
    %26 = vector.multi_reduction <add>, %25, %cst_14 [1] : vector<16x32xf32> to vector<16xf32>
    %27 = vector.shape_cast %26 : vector<16xf32> to vector<16x1xf32>
    %cst_15 = arith.constant 3.200000e+01 : f32
    %28 = vector.broadcast %cst_15 : f32 to vector<16x1xf32>
    %29 = arith.divf %27, %28 : vector<16x1xf32>
    %30 = vector.broadcast %22 : vector<16x1xf32> to vector<16x32xf32>
    %31 = arith.subf %16, %30 : vector<16x32xf32>
    %cst_16 = arith.constant 9.99999996E-13 : f32
    %32 = vector.broadcast %cst_16 : f32 to vector<16x1xf32>
    %33 = arith.addf %29, %32 : vector<16x1xf32>
    %34 = math.rsqrt %33 : vector<16x1xf32>
    %35 = vector.broadcast %34 : vector<16x1xf32> to vector<16x32xf32>
    %36 = arith.mulf %31, %35 : vector<16x32xf32>
    %37 = vector.broadcast %17 : vector<1x32xf32> to vector<16x32xf32>
    %38 = arith.mulf %36, %37 : vector<16x32xf32>
    %39 = vector.broadcast %18 : vector<1x32xf32> to vector<16x32xf32>
    %40 = arith.addf %38, %39 : vector<16x32xf32>
    %c0_17 = arith.constant 0 : index
    %c0_18 = arith.constant 0 : index
    %41 = vector.load %arg2[%c0_17, %c0_18] : memref<2x8xf32, #tpu.memory_space<vmem>>, vector<2x8xf32>
    %c0_19 = arith.constant 0 : index
    %c0_20 = arith.constant 0 : index
    %c0_21 = arith.constant 0 : index
    %42 = vector.load %arg7[%c0_19, %c0_20, %c0_21] : memref<2x32x96xf32, #tpu.memory_space<vmem>>, vector<1x32x96xf32>
    %43 = vector.shape_cast %42 : vector<1x32x96xf32> to vector<32x96xf32>
    %cst_22 = arith.constant dense<0.000000e+00> : vector<16x96xf32>
    %44 = tpu.matmul %40, %43, %cst_22 {dimension_numbers = #tpu.dot_dimension_numbers<[1], [0], [0], [1], [0, 0, 1, 1], [], []>} : vector<16x32xf32>, vector<32x96xf32>, vector<16x96xf32> -> vector<16x96xf32>
    %c0_23 = arith.constant 0 : index
    %c0_24 = arith.constant 0 : index
    %c0_25 = arith.constant 0 : index
    %45 = vector.load %arg8[%c0_23, %c0_24, %c0_25] : memref<2x1x96xf32, #tpu.memory_space<vmem>>, vector<1x1x96xf32>
    %46 = vector.shape_cast %45 : vector<1x1x96xf32> to vector<1x96xf32>
    %47 = vector.broadcast %46 : vector<1x96xf32> to vector<16x96xf32>
    %48 = arith.addf %44, %47 : vector<16x96xf32>
    %49 = vector.extract_strided_slice %41 {offsets = [0, 0], sizes = [1, 8], strides = [1, 1]} : vector<2x8xf32> to vector<1x8xf32>
    %50 = vector.extract_strided_slice %48 {offsets = [0, 0], sizes = [8, 8], strides = [1, 1]} : vector<16x96xf32> to vector<8x8xf32>
    %51 = vector.extract_strided_slice %48 {offsets = [0, 32], sizes = [8, 8], strides = [1, 1]} : vector<16x96xf32> to vector<8x8xf32>
    %52 = vector.extract_strided_slice %48 {offsets = [0, 64], sizes = [8, 8], strides = [1, 1]} : vector<16x96xf32> to vector<8x8xf32>
    %cst_26 = arith.constant dense<0.000000e+00> : vector<8x8xf32>
    %53 = tpu.matmul %50, %51, %cst_26 {dimension_numbers = #tpu.dot_dimension_numbers<[1], [1], [0], [0], [0, 0, 1, 0], [], []>} : vector<8x8xf32>, vector<8x8xf32>, vector<8x8xf32> -> vector<8x8xf32>
    %cst_27 = arith.constant 0.353553385 : f32
    %54 = vector.broadcast %cst_27 : f32 to vector<8x8xf32>
    %55 = arith.mulf %53, %54 : vector<8x8xf32>
    %cst_28 = arith.constant 5.000000e-01 : f32
    %56 = vector.broadcast %cst_28 : f32 to vector<1x8xf32>
    %57 = arith.cmpf ogt, %49, %56 : vector<1x8xf32>
    %cst_29 = arith.constant -1.000000e+09 : f32
    %58 = vector.shape_cast %57 : vector<1x8xi1> to vector<1x8xi1>
    %59 = vector.broadcast %58 : vector<1x8xi1> to vector<8x8xi1>
    %60 = vector.broadcast %cst_29 : f32 to vector<8x8xf32>
    %61 = arith.select %59, %55, %60 : vector<8x8xi1>, vector<8x8xf32>
    %cst_30 = arith.constant dense<0xFF800000> : vector<8xf32>
    %62 = vector.multi_reduction <maximumf>, %61, %cst_30 [1] : vector<8x8xf32> to vector<8xf32>
    %63 = vector.shape_cast %62 : vector<8xf32> to vector<8x1xf32>
    %64 = vector.broadcast %63 : vector<8x1xf32> to vector<8x8xf32>
    %65 = arith.subf %61, %64 : vector<8x8xf32>
    %66 = math.exp %65 : vector<8x8xf32>
    %cst_31 = arith.constant dense<0.000000e+00> : vector<8xf32>
    %67 = vector.multi_reduction <add>, %66, %cst_31 [1] : vector<8x8xf32> to vector<8xf32>
    %68 = vector.shape_cast %67 : vector<8xf32> to vector<8x1xf32>
    %69 = vector.broadcast %68 : vector<8x1xf32> to vector<8x8xf32>
    %70 = arith.divf %66, %69 : vector<8x8xf32>
    %cst_32 = arith.constant dense<0.000000e+00> : vector<8x8xf32>
    %71 = tpu.matmul %70, %52, %cst_32 {dimension_numbers = #tpu.dot_dimension_numbers<[1], [0], [0], [1], [0, 0, 1, 1], [], []>} : vector<8x8xf32>, vector<8x8xf32>, vector<8x8xf32> -> vector<8x8xf32>
    %c0_33 = arith.constant 0 : index
    %c0_34 = arith.constant 0 : index
    %72 = vector.load %arg24[%c0_33, %c0_34] : memref<16x32xf32, #tpu.memory_space<vmem>>, vector<8x8xf32>
    tpu.vector_store %arg24[%c0_33, %c0_34], %71 {strides = array<i32>} : memref<16x32xf32, #tpu.memory_space<vmem>>, vector<8x8xf32>,
    %73 = vector.extract_strided_slice %48 {offsets = [0, 8], sizes = [8, 8], strides = [1, 1]} : vector<16x96xf32> to vector<8x8xf32>
    %74 = vector.extract_strided_slice %48 {offsets = [0, 40], sizes = [8, 8], strides = [1, 1]} : vector<16x96xf32> to vector<8x8xf32>
    %75 = vector.extract_strided_slice %48 {offsets = [0, 72], sizes = [8, 8], strides = [1, 1]} : vector<16x96xf32> to vector<8x8xf32>
    %cst_35 = arith.constant dense<0.000000e+00> : vector<8x8xf32>
    %76 = tpu.matmul %73, %74, %cst_35 {dimension_numbers = #tpu.dot_dimension_numbers<[1], [1], [0], [0], [0, 0, 1, 0], [], []>} : vector<8x8xf32>, vector<8x8xf32>, vector<8x8xf32> -> vector<8x8xf32>
    %cst_36 = arith.constant 0.353553385 : f32
    %77 = vector.broadcast %cst_36 : f32 to vector<8x8xf32>
    %78 = arith.mulf %76, %77 : vector<8x8xf32>
    %cst_37 = arith.constant 5.000000e-01 : f32
    %79 = vector.broadcast %cst_37 : f32 to vector<1x8xf32>
    %80 = arith.cmpf ogt, %49, %79 : vector<1x8xf32>
    %cst_38 = arith.constant -1.000000e+09 : f32
    %81 = vector.shape_cast %80 : vector<1x8xi1> to vector<1x8xi1>
    %82 = vector.broadcast %81 : vector<1x8xi1> to vector<8x8xi1>
    %83 = vector.broadcast %cst_38 : f32 to vector<8x8xf32>
    %84 = arith.select %82, %78, %83 : vector<8x8xi1>, vector<8x8xf32>
    %cst_39 = arith.constant dense<0xFF800000> : vector<8xf32>
    %85 = vector.multi_reduction <maximumf>, %84, %cst_39 [1] : vector<8x8xf32> to vector<8xf32>
    %86 = vector.shape_cast %85 : vector<8xf32> to vector<8x1xf32>
    %87 = vector.broadcast %86 : vector<8x1xf32> to vector<8x8xf32>
    %88 = arith.subf %84, %87 : vector<8x8xf32>
    %89 = math.exp %88 : vector<8x8xf32>
    %cst_40 = arith.constant dense<0.000000e+00> : vector<8xf32>
    %90 = vector.multi_reduction <add>, %89, %cst_40 [1] : vector<8x8xf32> to vector<8xf32>
    %91 = vector.shape_cast %90 : vector<8xf32> to vector<8x1xf32>
    %92 = vector.broadcast %91 : vector<8x1xf32> to vector<8x8xf32>
    %93 = arith.divf %89, %92 : vector<8x8xf32>
    %cst_41 = arith.constant dense<0.000000e+00> : vector<8x8xf32>
    %94 = tpu.matmul %93, %75, %cst_41 {dimension_numbers = #tpu.dot_dimension_numbers<[1], [0], [0], [1], [0, 0, 1, 1], [], []>} : vector<8x8xf32>, vector<8x8xf32>, vector<8x8xf32> -> vector<8x8xf32>
    %c0_42 = arith.constant 0 : index
    %c8 = arith.constant 8 : index
    %95 = vector.load %arg24[%c0_42, %c8] : memref<16x32xf32, #tpu.memory_space<vmem>>, vector<8x8xf32>
    tpu.vector_store %arg24[%c0_42, %c8], %94 {strides = array<i32>} : memref<16x32xf32, #tpu.memory_space<vmem>>, vector<8x8xf32>,
    %96 = vector.extract_strided_slice %48 {offsets = [0, 16], sizes = [8, 8], strides = [1, 1]} : vector<16x96xf32> to vector<8x8xf32>
    %97 = vector.extract_strided_slice %48 {offsets = [0, 48], sizes = [8, 8], strides = [1, 1]} : vector<16x96xf32> to vector<8x8xf32>
    %98 = vector.extract_strided_slice %48 {offsets = [0, 80], sizes = [8, 8], strides = [1, 1]} : vector<16x96xf32> to vector<8x8xf32>
    %cst_43 = arith.constant dense<0.000000e+00> : vector<8x8xf32>
    %99 = tpu.matmul %96, %97, %cst_43 {dimension_numbers = #tpu.dot_dimension_numbers<[1], [1], [0], [0], [0, 0, 1, 0], [], []>} : vector<8x8xf32>, vector<8x8xf32>, vector<8x8xf32> -> vector<8x8xf32>
    %cst_44 = arith.constant 0.353553385 : f32
    %100 = vector.broadcast %cst_44 : f32 to vector<8x8xf32>
    %101 = arith.mulf %99, %100 : vector<8x8xf32>
    %cst_45 = arith.constant 5.000000e-01 : f32
    %102 = vector.broadcast %cst_45 : f32 to vector<1x8xf32>
    %103 = arith.cmpf ogt, %49, %102 : vector<1x8xf32>
    %cst_46 = arith.constant -1.000000e+09 : f32
    %104 = vector.shape_cast %103 : vector<1x8xi1> to vector<1x8xi1>
    %105 = vector.broadcast %104 : vector<1x8xi1> to vector<8x8xi1>
    %106 = vector.broadcast %cst_46 : f32 to vector<8x8xf32>
    %107 = arith.select %105, %101, %106 : vector<8x8xi1>, vector<8x8xf32>
    %cst_47 = arith.constant dense<0xFF800000> : vector<8xf32>
    %108 = vector.multi_reduction <maximumf>, %107, %cst_47 [1] : vector<8x8xf32> to vector<8xf32>
    %109 = vector.shape_cast %108 : vector<8xf32> to vector<8x1xf32>
    %110 = vector.broadcast %109 : vector<8x1xf32> to vector<8x8xf32>
    %111 = arith.subf %107, %110 : vector<8x8xf32>
    %112 = math.exp %111 : vector<8x8xf32>
    %cst_48 = arith.constant dense<0.000000e+00> : vector<8xf32>
    %113 = vector.multi_reduction <add>, %112, %cst_48 [1] : vector<8x8xf32> to vector<8xf32>
    %114 = vector.shape_cast %113 : vector<8xf32> to vector<8x1xf32>
    %115 = vector.broadcast %114 : vector<8x1xf32> to vector<8x8xf32>
    %116 = arith.divf %112, %115 : vector<8x8xf32>
    %cst_49 = arith.constant dense<0.000000e+00> : vector<8x8xf32>
    %117 = tpu.matmul %116, %98, %cst_49 {dimension_numbers = #tpu.dot_dimension_numbers<[1], [0], [0], [1], [0, 0, 1, 1], [], []>} : vector<8x8xf32>, vector<8x8xf32>, vector<8x8xf32> -> vector<8x8xf32>
    %c0_50 = arith.constant 0 : index
    %c16 = arith.constant 16 : index
    %118 = vector.load %arg24[%c0_50, %c16] : memref<16x32xf32, #tpu.memory_space<vmem>>, vector<8x8xf32>
    tpu.vector_store %arg24[%c0_50, %c16], %117 {strides = array<i32>} : memref<16x32xf32, #tpu.memory_space<vmem>>, vector<8x8xf32>,
    %119 = vector.extract_strided_slice %48 {offsets = [0, 24], sizes = [8, 8], strides = [1, 1]} : vector<16x96xf32> to vector<8x8xf32>
    %120 = vector.extract_strided_slice %48 {offsets = [0, 56], sizes = [8, 8], strides = [1, 1]} : vector<16x96xf32> to vector<8x8xf32>
    %121 = vector.extract_strided_slice %48 {offsets = [0, 88], sizes = [8, 8], strides = [1, 1]} : vector<16x96xf32> to vector<8x8xf32>
    %cst_51 = arith.constant dense<0.000000e+00> : vector<8x8xf32>
    %122 = tpu.matmul %119, %120, %cst_51 {dimension_numbers = #tpu.dot_dimension_numbers<[1], [1], [0], [0], [0, 0, 1, 0], [], []>} : vector<8x8xf32>, vector<8x8xf32>, vector<8x8xf32> -> vector<8x8xf32>
    %cst_52 = arith.constant 0.353553385 : f32
    %123 = vector.broadcast %cst_52 : f32 to vector<8x8xf32>
    %124 = arith.mulf %122, %123 : vector<8x8xf32>
    %cst_53 = arith.constant 5.000000e-01 : f32
    %125 = vector.broadcast %cst_53 : f32 to vector<1x8xf32>
    %126 = arith.cmpf ogt, %49, %125 : vector<1x8xf32>
    %cst_54 = arith.constant -1.000000e+09 : f32
    %127 = vector.shape_cast %126 : vector<1x8xi1> to vector<1x8xi1>
    %128 = vector.broadcast %127 : vector<1x8xi1> to vector<8x8xi1>
    %129 = vector.broadcast %cst_54 : f32 to vector<8x8xf32>
    %130 = arith.select %128, %124, %129 : vector<8x8xi1>, vector<8x8xf32>
    %cst_55 = arith.constant dense<0xFF800000> : vector<8xf32>
    %131 = vector.multi_reduction <maximumf>, %130, %cst_55 [1] : vector<8x8xf32> to vector<8xf32>
    %132 = vector.shape_cast %131 : vector<8xf32> to vector<8x1xf32>
    %133 = vector.broadcast %132 : vector<8x1xf32> to vector<8x8xf32>
    %134 = arith.subf %130, %133 : vector<8x8xf32>
    %135 = math.exp %134 : vector<8x8xf32>
    %cst_56 = arith.constant dense<0.000000e+00> : vector<8xf32>
    %136 = vector.multi_reduction <add>, %135, %cst_56 [1] : vector<8x8xf32> to vector<8xf32>
    %137 = vector.shape_cast %136 : vector<8xf32> to vector<8x1xf32>
    %138 = vector.broadcast %137 : vector<8x1xf32> to vector<8x8xf32>
    %139 = arith.divf %135, %138 : vector<8x8xf32>
    %cst_57 = arith.constant dense<0.000000e+00> : vector<8x8xf32>
    %140 = tpu.matmul %139, %121, %cst_57 {dimension_numbers = #tpu.dot_dimension_numbers<[1], [0], [0], [1], [0, 0, 1, 1], [], []>} : vector<8x8xf32>, vector<8x8xf32>, vector<8x8xf32> -> vector<8x8xf32>
    %c0_58 = arith.constant 0 : index
    %c24 = arith.constant 24 : index
    %141 = vector.load %arg24[%c0_58, %c24] : memref<16x32xf32, #tpu.memory_space<vmem>>, vector<8x8xf32>
    tpu.vector_store %arg24[%c0_58, %c24], %140 {strides = array<i32>} : memref<16x32xf32, #tpu.memory_space<vmem>>, vector<8x8xf32>,
    %142 = vector.extract_strided_slice %41 {offsets = [1, 0], sizes = [1, 8], strides = [1, 1]} : vector<2x8xf32> to vector<1x8xf32>
    %143 = vector.extract_strided_slice %48 {offsets = [8, 0], sizes = [8, 8], strides = [1, 1]} : vector<16x96xf32> to vector<8x8xf32>
    %144 = vector.extract_strided_slice %48 {offsets = [8, 32], sizes = [8, 8], strides = [1, 1]} : vector<16x96xf32> to vector<8x8xf32>
    %145 = vector.extract_strided_slice %48 {offsets = [8, 64], sizes = [8, 8], strides = [1, 1]} : vector<16x96xf32> to vector<8x8xf32>
    %cst_59 = arith.constant dense<0.000000e+00> : vector<8x8xf32>
    %146 = tpu.matmul %143, %144, %cst_59 {dimension_numbers = #tpu.dot_dimension_numbers<[1], [1], [0], [0], [0, 0, 1, 0], [], []>} : vector<8x8xf32>, vector<8x8xf32>, vector<8x8xf32> -> vector<8x8xf32>
    %cst_60 = arith.constant 0.353553385 : f32
    %147 = vector.broadcast %cst_60 : f32 to vector<8x8xf32>
    %148 = arith.mulf %146, %147 : vector<8x8xf32>
    %cst_61 = arith.constant 5.000000e-01 : f32
    %149 = vector.broadcast %cst_61 : f32 to vector<1x8xf32>
    %150 = arith.cmpf ogt, %142, %149 : vector<1x8xf32>
    %cst_62 = arith.constant -1.000000e+09 : f32
    %151 = vector.shape_cast %150 : vector<1x8xi1> to vector<1x8xi1>
    %152 = vector.broadcast %151 : vector<1x8xi1> to vector<8x8xi1>
    %153 = vector.broadcast %cst_62 : f32 to vector<8x8xf32>
    %154 = arith.select %152, %148, %153 : vector<8x8xi1>, vector<8x8xf32>
    %cst_63 = arith.constant dense<0xFF800000> : vector<8xf32>
    %155 = vector.multi_reduction <maximumf>, %154, %cst_63 [1] : vector<8x8xf32> to vector<8xf32>
    %156 = vector.shape_cast %155 : vector<8xf32> to vector<8x1xf32>
    %157 = vector.broadcast %156 : vector<8x1xf32> to vector<8x8xf32>
    %158 = arith.subf %154, %157 : vector<8x8xf32>
    %159 = math.exp %158 : vector<8x8xf32>
    %cst_64 = arith.constant dense<0.000000e+00> : vector<8xf32>
    %160 = vector.multi_reduction <add>, %159, %cst_64 [1] : vector<8x8xf32> to vector<8xf32>
    %161 = vector.shape_cast %160 : vector<8xf32> to vector<8x1xf32>
    %162 = vector.broadcast %161 : vector<8x1xf32> to vector<8x8xf32>
    %163 = arith.divf %159, %162 : vector<8x8xf32>
    %cst_65 = arith.constant dense<0.000000e+00> : vector<8x8xf32>
    %164 = tpu.matmul %163, %145, %cst_65 {dimension_numbers = #tpu.dot_dimension_numbers<[1], [0], [0], [1], [0, 0, 1, 1], [], []>} : vector<8x8xf32>, vector<8x8xf32>, vector<8x8xf32> -> vector<8x8xf32>
    %c8_66 = arith.constant 8 : index
    %c0_67 = arith.constant 0 : index
    %165 = vector.load %arg24[%c8_66, %c0_67] : memref<16x32xf32, #tpu.memory_space<vmem>>, vector<8x8xf32>
    tpu.vector_store %arg24[%c8_66, %c0_67], %164 {strides = array<i32>} : memref<16x32xf32, #tpu.memory_space<vmem>>, vector<8x8xf32>,
    %166 = vector.extract_strided_slice %48 {offsets = [8, 8], sizes = [8, 8], strides = [1, 1]} : vector<16x96xf32> to vector<8x8xf32>
    %167 = vector.extract_strided_slice %48 {offsets = [8, 40], sizes = [8, 8], strides = [1, 1]} : vector<16x96xf32> to vector<8x8xf32>
    %168 = vector.extract_strided_slice %48 {offsets = [8, 72], sizes = [8, 8], strides = [1, 1]} : vector<16x96xf32> to vector<8x8xf32>
    %cst_68 = arith.constant dense<0.000000e+00> : vector<8x8xf32>
    %169 = tpu.matmul %166, %167, %cst_68 {dimension_numbers = #tpu.dot_dimension_numbers<[1], [1], [0], [0], [0, 0, 1, 0], [], []>} : vector<8x8xf32>, vector<8x8xf32>, vector<8x8xf32> -> vector<8x8xf32>
    %cst_69 = arith.constant 0.353553385 : f32
    %170 = vector.broadcast %cst_69 : f32 to vector<8x8xf32>
    %171 = arith.mulf %169, %170 : vector<8x8xf32>
    %cst_70 = arith.constant 5.000000e-01 : f32
    %172 = vector.broadcast %cst_70 : f32 to vector<1x8xf32>
    %173 = arith.cmpf ogt, %142, %172 : vector<1x8xf32>
    %cst_71 = arith.constant -1.000000e+09 : f32
    %174 = vector.shape_cast %173 : vector<1x8xi1> to vector<1x8xi1>
    %175 = vector.broadcast %174 : vector<1x8xi1> to vector<8x8xi1>
    %176 = vector.broadcast %cst_71 : f32 to vector<8x8xf32>
    %177 = arith.select %175, %171, %176 : vector<8x8xi1>, vector<8x8xf32>
    %cst_72 = arith.constant dense<0xFF800000> : vector<8xf32>
    %178 = vector.multi_reduction <maximumf>, %177, %cst_72 [1] : vector<8x8xf32> to vector<8xf32>
    %179 = vector.shape_cast %178 : vector<8xf32> to vector<8x1xf32>
    %180 = vector.broadcast %179 : vector<8x1xf32> to vector<8x8xf32>
    %181 = arith.subf %177, %180 : vector<8x8xf32>
    %182 = math.exp %181 : vector<8x8xf32>
    %cst_73 = arith.constant dense<0.000000e+00> : vector<8xf32>
    %183 = vector.multi_reduction <add>, %182, %cst_73 [1] : vector<8x8xf32> to vector<8xf32>
    %184 = vector.shape_cast %183 : vector<8xf32> to vector<8x1xf32>
    %185 = vector.broadcast %184 : vector<8x1xf32> to vector<8x8xf32>
    %186 = arith.divf %182, %185 : vector<8x8xf32>
    %cst_74 = arith.constant dense<0.000000e+00> : vector<8x8xf32>
    %187 = tpu.matmul %186, %168, %cst_74 {dimension_numbers = #tpu.dot_dimension_numbers<[1], [0], [0], [1], [0, 0, 1, 1], [], []>} : vector<8x8xf32>, vector<8x8xf32>, vector<8x8xf32> -> vector<8x8xf32>
    %c8_75 = arith.constant 8 : index
    %c8_76 = arith.constant 8 : index
    %188 = vector.load %arg24[%c8_75, %c8_76] : memref<16x32xf32, #tpu.memory_space<vmem>>, vector<8x8xf32>
    tpu.vector_store %arg24[%c8_75, %c8_76], %187 {strides = array<i32>} : memref<16x32xf32, #tpu.memory_space<vmem>>, vector<8x8xf32>,
    %189 = vector.extract_strided_slice %48 {offsets = [8, 16], sizes = [8, 8], strides = [1, 1]} : vector<16x96xf32> to vector<8x8xf32>
    %190 = vector.extract_strided_slice %48 {offsets = [8, 48], sizes = [8, 8], strides = [1, 1]} : vector<16x96xf32> to vector<8x8xf32>
    %191 = vector.extract_strided_slice %48 {offsets = [8, 80], sizes = [8, 8], strides = [1, 1]} : vector<16x96xf32> to vector<8x8xf32>
    %cst_77 = arith.constant dense<0.000000e+00> : vector<8x8xf32>
    %192 = tpu.matmul %189, %190, %cst_77 {dimension_numbers = #tpu.dot_dimension_numbers<[1], [1], [0], [0], [0, 0, 1, 0], [], []>} : vector<8x8xf32>, vector<8x8xf32>, vector<8x8xf32> -> vector<8x8xf32>
    %cst_78 = arith.constant 0.353553385 : f32
    %193 = vector.broadcast %cst_78 : f32 to vector<8x8xf32>
    %194 = arith.mulf %192, %193 : vector<8x8xf32>
    %cst_79 = arith.constant 5.000000e-01 : f32
    %195 = vector.broadcast %cst_79 : f32 to vector<1x8xf32>
    %196 = arith.cmpf ogt, %142, %195 : vector<1x8xf32>
    %cst_80 = arith.constant -1.000000e+09 : f32
    %197 = vector.shape_cast %196 : vector<1x8xi1> to vector<1x8xi1>
    %198 = vector.broadcast %197 : vector<1x8xi1> to vector<8x8xi1>
    %199 = vector.broadcast %cst_80 : f32 to vector<8x8xf32>
    %200 = arith.select %198, %194, %199 : vector<8x8xi1>, vector<8x8xf32>
    %cst_81 = arith.constant dense<0xFF800000> : vector<8xf32>
    %201 = vector.multi_reduction <maximumf>, %200, %cst_81 [1] : vector<8x8xf32> to vector<8xf32>
    %202 = vector.shape_cast %201 : vector<8xf32> to vector<8x1xf32>
    %203 = vector.broadcast %202 : vector<8x1xf32> to vector<8x8xf32>
    %204 = arith.subf %200, %203 : vector<8x8xf32>
    %205 = math.exp %204 : vector<8x8xf32>
    %cst_82 = arith.constant dense<0.000000e+00> : vector<8xf32>
    %206 = vector.multi_reduction <add>, %205, %cst_82 [1] : vector<8x8xf32> to vector<8xf32>
    %207 = vector.shape_cast %206 : vector<8xf32> to vector<8x1xf32>
    %208 = vector.broadcast %207 : vector<8x1xf32> to vector<8x8xf32>
    %209 = arith.divf %205, %208 : vector<8x8xf32>
    %cst_83 = arith.constant dense<0.000000e+00> : vector<8x8xf32>
    %210 = tpu.matmul %209, %191, %cst_83 {dimension_numbers = #tpu.dot_dimension_numbers<[1], [0], [0], [1], [0, 0, 1, 1], [], []>} : vector<8x8xf32>, vector<8x8xf32>, vector<8x8xf32> -> vector<8x8xf32>
    %c8_84 = arith.constant 8 : index
    %c16_85 = arith.constant 16 : index
    %211 = vector.load %arg24[%c8_84, %c16_85] : memref<16x32xf32, #tpu.memory_space<vmem>>, vector<8x8xf32>
    tpu.vector_store %arg24[%c8_84, %c16_85], %210 {strides = array<i32>} : memref<16x32xf32, #tpu.memory_space<vmem>>, vector<8x8xf32>,
    %212 = vector.extract_strided_slice %48 {offsets = [8, 24], sizes = [8, 8], strides = [1, 1]} : vector<16x96xf32> to vector<8x8xf32>
    %213 = vector.extract_strided_slice %48 {offsets = [8, 56], sizes = [8, 8], strides = [1, 1]} : vector<16x96xf32> to vector<8x8xf32>
    %214 = vector.extract_strided_slice %48 {offsets = [8, 88], sizes = [8, 8], strides = [1, 1]} : vector<16x96xf32> to vector<8x8xf32>
    %cst_86 = arith.constant dense<0.000000e+00> : vector<8x8xf32>
    %215 = tpu.matmul %212, %213, %cst_86 {dimension_numbers = #tpu.dot_dimension_numbers<[1], [1], [0], [0], [0, 0, 1, 0], [], []>} : vector<8x8xf32>, vector<8x8xf32>, vector<8x8xf32> -> vector<8x8xf32>
    %cst_87 = arith.constant 0.353553385 : f32
    %216 = vector.broadcast %cst_87 : f32 to vector<8x8xf32>
    %217 = arith.mulf %215, %216 : vector<8x8xf32>
    %cst_88 = arith.constant 5.000000e-01 : f32
    %218 = vector.broadcast %cst_88 : f32 to vector<1x8xf32>
    %219 = arith.cmpf ogt, %142, %218 : vector<1x8xf32>
    %cst_89 = arith.constant -1.000000e+09 : f32
    %220 = vector.shape_cast %219 : vector<1x8xi1> to vector<1x8xi1>
    %221 = vector.broadcast %220 : vector<1x8xi1> to vector<8x8xi1>
    %222 = vector.broadcast %cst_89 : f32 to vector<8x8xf32>
    %223 = arith.select %221, %217, %222 : vector<8x8xi1>, vector<8x8xf32>
    %cst_90 = arith.constant dense<0xFF800000> : vector<8xf32>
    %224 = vector.multi_reduction <maximumf>, %223, %cst_90 [1] : vector<8x8xf32> to vector<8xf32>
    %225 = vector.shape_cast %224 : vector<8xf32> to vector<8x1xf32>
    %226 = vector.broadcast %225 : vector<8x1xf32> to vector<8x8xf32>
    %227 = arith.subf %223, %226 : vector<8x8xf32>
    %228 = math.exp %227 : vector<8x8xf32>
    %cst_91 = arith.constant dense<0.000000e+00> : vector<8xf32>
    %229 = vector.multi_reduction <add>, %228, %cst_91 [1] : vector<8x8xf32> to vector<8xf32>
    %230 = vector.shape_cast %229 : vector<8xf32> to vector<8x1xf32>
    %231 = vector.broadcast %230 : vector<8x1xf32> to vector<8x8xf32>
    %232 = arith.divf %228, %231 : vector<8x8xf32>
    %cst_92 = arith.constant dense<0.000000e+00> : vector<8x8xf32>
    %233 = tpu.matmul %232, %214, %cst_92 {dimension_numbers = #tpu.dot_dimension_numbers<[1], [0], [0], [1], [0, 0, 1, 1], [], []>} : vector<8x8xf32>, vector<8x8xf32>, vector<8x8xf32> -> vector<8x8xf32>
    %c8_93 = arith.constant 8 : index
    %c24_94 = arith.constant 24 : index
    %234 = vector.load %arg24[%c8_93, %c24_94] : memref<16x32xf32, #tpu.memory_space<vmem>>, vector<8x8xf32>
    tpu.vector_store %arg24[%c8_93, %c24_94], %233 {strides = array<i32>} : memref<16x32xf32, #tpu.memory_space<vmem>>, vector<8x8xf32>,
    %c0_95 = arith.constant 0 : index
    %c0_96 = arith.constant 0 : index
    %235 = vector.load %arg24[%c0_95, %c0_96] : memref<16x32xf32, #tpu.memory_space<vmem>>, vector<16x32xf32>
    %c0_97 = arith.constant 0 : index
    %c0_98 = arith.constant 0 : index
    %c0_99 = arith.constant 0 : index
    %236 = vector.load %arg9[%c0_97, %c0_98, %c0_99] : memref<2x32x32xf32, #tpu.memory_space<vmem>>, vector<1x32x32xf32>
    %237 = vector.shape_cast %236 : vector<1x32x32xf32> to vector<32x32xf32>
    %cst_100 = arith.constant dense<0.000000e+00> : vector<16x32xf32>
    %238 = tpu.matmul %235, %237, %cst_100 {dimension_numbers = #tpu.dot_dimension_numbers<[1], [0], [0], [1], [0, 0, 1, 1], [], []>} : vector<16x32xf32>, vector<32x32xf32>, vector<16x32xf32> -> vector<16x32xf32>
    %c0_101 = arith.constant 0 : index
    %c0_102 = arith.constant 0 : index
    %c0_103 = arith.constant 0 : index
    %239 = vector.load %arg10[%c0_101, %c0_102, %c0_103] : memref<2x1x32xf32, #tpu.memory_space<vmem>>, vector<1x1x32xf32>
    %240 = vector.shape_cast %239 : vector<1x1x32xf32> to vector<1x32xf32>
    %241 = vector.broadcast %240 : vector<1x32xf32> to vector<16x32xf32>
    %242 = arith.addf %238, %241 : vector<16x32xf32>
    %243 = arith.addf %40, %242 : vector<16x32xf32>
    %c0_104 = arith.constant 0 : index
    %c0_105 = arith.constant 0 : index
    %c0_106 = arith.constant 0 : index
    %244 = vector.load %arg11[%c0_104, %c0_105, %c0_106] : memref<2x1x32xf32, #tpu.memory_space<vmem>>, vector<1x1x32xf32>
    %245 = vector.shape_cast %244 : vector<1x1x32xf32> to vector<1x32xf32>
    %c0_107 = arith.constant 0 : index
    %c0_108 = arith.constant 0 : index
    %c0_109 = arith.constant 0 : index
    %246 = vector.load %arg12[%c0_107, %c0_108, %c0_109] : memref<2x1x32xf32, #tpu.memory_space<vmem>>, vector<1x1x32xf32>
    %247 = vector.shape_cast %246 : vector<1x1x32xf32> to vector<1x32xf32>
    %cst_110 = arith.constant dense<0.000000e+00> : vector<16xf32>
    %248 = vector.multi_reduction <add>, %243, %cst_110 [1] : vector<16x32xf32> to vector<16xf32>
    %249 = vector.shape_cast %248 : vector<16xf32> to vector<16x1xf32>
    %cst_111 = arith.constant 3.200000e+01 : f32
    %250 = vector.broadcast %cst_111 : f32 to vector<16x1xf32>
    %251 = arith.divf %249, %250 : vector<16x1xf32>
    %252 = vector.broadcast %251 : vector<16x1xf32> to vector<16x32xf32>
    %253 = arith.subf %243, %252 : vector<16x32xf32>
    %254 = arith.mulf %253, %253 : vector<16x32xf32>
    %cst_112 = arith.constant dense<0.000000e+00> : vector<16xf32>
    %255 = vector.multi_reduction <add>, %254, %cst_112 [1] : vector<16x32xf32> to vector<16xf32>
    %256 = vector.shape_cast %255 : vector<16xf32> to vector<16x1xf32>
    %cst_113 = arith.constant 3.200000e+01 : f32
    %257 = vector.broadcast %cst_113 : f32 to vector<16x1xf32>
    %258 = arith.divf %256, %257 : vector<16x1xf32>
    %259 = vector.broadcast %251 : vector<16x1xf32> to vector<16x32xf32>
    %260 = arith.subf %243, %259 : vector<16x32xf32>
    %cst_114 = arith.constant 9.99999996E-13 : f32
    %261 = vector.broadcast %cst_114 : f32 to vector<16x1xf32>
    %262 = arith.addf %258, %261 : vector<16x1xf32>
    %263 = math.rsqrt %262 : vector<16x1xf32>
    %264 = vector.broadcast %263 : vector<16x1xf32> to vector<16x32xf32>
    %265 = arith.mulf %260, %264 : vector<16x32xf32>
    %266 = vector.broadcast %245 : vector<1x32xf32> to vector<16x32xf32>
    %267 = arith.mulf %265, %266 : vector<16x32xf32>
    %268 = vector.broadcast %247 : vector<1x32xf32> to vector<16x32xf32>
    %269 = arith.addf %267, %268 : vector<16x32xf32>
    %c0_115 = arith.constant 0 : index
    %c0_116 = arith.constant 0 : index
    %c0_117 = arith.constant 0 : index
    %270 = vector.load %arg13[%c0_115, %c0_116, %c0_117] : memref<2x32x64xf32, #tpu.memory_space<vmem>>, vector<1x32x64xf32>
    %271 = vector.shape_cast %270 : vector<1x32x64xf32> to vector<32x64xf32>
    %cst_118 = arith.constant dense<0.000000e+00> : vector<16x64xf32>
    %272 = tpu.matmul %269, %271, %cst_118 {dimension_numbers = #tpu.dot_dimension_numbers<[1], [0], [0], [1], [0, 0, 1, 1], [], []>} : vector<16x32xf32>, vector<32x64xf32>, vector<16x64xf32> -> vector<16x64xf32>
    %c0_119 = arith.constant 0 : index
    %c0_120 = arith.constant 0 : index
    %c0_121 = arith.constant 0 : index
    %273 = vector.load %arg14[%c0_119, %c0_120, %c0_121] : memref<2x1x64xf32, #tpu.memory_space<vmem>>, vector<1x1x64xf32>
    %274 = vector.shape_cast %273 : vector<1x1x64xf32> to vector<1x64xf32>
    %275 = vector.broadcast %274 : vector<1x64xf32> to vector<16x64xf32>
    %276 = arith.addf %272, %275 : vector<16x64xf32>
    %cst_122 = arith.constant 5.000000e-01 : f32
    %277 = vector.broadcast %cst_122 : f32 to vector<16x64xf32>
    %278 = arith.mulf %277, %276 : vector<16x64xf32>
    %cst_123 = arith.constant 4.471500e-02 : f32
    %279 = vector.broadcast %cst_123 : f32 to vector<16x64xf32>
    %280 = arith.mulf %279, %276 : vector<16x64xf32>
    %281 = arith.mulf %280, %276 : vector<16x64xf32>
    %282 = arith.mulf %281, %276 : vector<16x64xf32>
    %283 = arith.addf %276, %282 : vector<16x64xf32>
    %cst_124 = arith.constant 0.797884583 : f32
    %284 = vector.broadcast %cst_124 : f32 to vector<16x64xf32>
    %285 = arith.mulf %284, %283 : vector<16x64xf32>
    %286 = math.tanh %285 : vector<16x64xf32>
    %cst_125 = arith.constant 1.000000e+00 : f32
    %287 = vector.broadcast %cst_125 : f32 to vector<16x64xf32>
    %288 = arith.addf %287, %286 : vector<16x64xf32>
    %289 = arith.mulf %278, %288 : vector<16x64xf32>
    %c0_126 = arith.constant 0 : index
    %c0_127 = arith.constant 0 : index
    %c0_128 = arith.constant 0 : index
    %290 = vector.load %arg15[%c0_126, %c0_127, %c0_128] : memref<2x64x32xf32, #tpu.memory_space<vmem>>, vector<1x64x32xf32>
    %291 = vector.shape_cast %290 : vector<1x64x32xf32> to vector<64x32xf32>
    %cst_129 = arith.constant dense<0.000000e+00> : vector<16x32xf32>
    %292 = tpu.matmul %289, %291, %cst_129 {dimension_numbers = #tpu.dot_dimension_numbers<[1], [0], [0], [1], [0, 0, 1, 1], [], []>} : vector<16x64xf32>, vector<64x32xf32>, vector<16x32xf32> -> vector<16x32xf32>
    %c0_130 = arith.constant 0 : index
    %c0_131 = arith.constant 0 : index
    %c0_132 = arith.constant 0 : index
    %293 = vector.load %arg16[%c0_130, %c0_131, %c0_132] : memref<2x1x32xf32, #tpu.memory_space<vmem>>, vector<1x1x32xf32>
    %294 = vector.shape_cast %293 : vector<1x1x32xf32> to vector<1x32xf32>
    %295 = vector.broadcast %294 : vector<1x32xf32> to vector<16x32xf32>
    %296 = arith.addf %292, %295 : vector<16x32xf32>
    %297 = arith.addf %269, %296 : vector<16x32xf32>
    %c0_133 = arith.constant 0 : index
    %c0_134 = arith.constant 0 : index
    %c0_135 = arith.constant 0 : index
    %298 = vector.load %arg17[%c0_133, %c0_134, %c0_135] : memref<2x1x32xf32, #tpu.memory_space<vmem>>, vector<1x1x32xf32>
    %299 = vector.shape_cast %298 : vector<1x1x32xf32> to vector<1x32xf32>
    %c0_136 = arith.constant 0 : index
    %c0_137 = arith.constant 0 : index
    %c0_138 = arith.constant 0 : index
    %300 = vector.load %arg18[%c0_136, %c0_137, %c0_138] : memref<2x1x32xf32, #tpu.memory_space<vmem>>, vector<1x1x32xf32>
    %301 = vector.shape_cast %300 : vector<1x1x32xf32> to vector<1x32xf32>
    %cst_139 = arith.constant dense<0.000000e+00> : vector<16xf32>
    %302 = vector.multi_reduction <add>, %297, %cst_139 [1] : vector<16x32xf32> to vector<16xf32>
    %303 = vector.shape_cast %302 : vector<16xf32> to vector<16x1xf32>
    %cst_140 = arith.constant 3.200000e+01 : f32
    %304 = vector.broadcast %cst_140 : f32 to vector<16x1xf32>
    %305 = arith.divf %303, %304 : vector<16x1xf32>
    %306 = vector.broadcast %305 : vector<16x1xf32> to vector<16x32xf32>
    %307 = arith.subf %297, %306 : vector<16x32xf32>
    %308 = arith.mulf %307, %307 : vector<16x32xf32>
    %cst_141 = arith.constant dense<0.000000e+00> : vector<16xf32>
    %309 = vector.multi_reduction <add>, %308, %cst_141 [1] : vector<16x32xf32> to vector<16xf32>
    %310 = vector.shape_cast %309 : vector<16xf32> to vector<16x1xf32>
    %cst_142 = arith.constant 3.200000e+01 : f32
    %311 = vector.broadcast %cst_142 : f32 to vector<16x1xf32>
    %312 = arith.divf %310, %311 : vector<16x1xf32>
    %313 = vector.broadcast %305 : vector<16x1xf32> to vector<16x32xf32>
    %314 = arith.subf %297, %313 : vector<16x32xf32>
    %cst_143 = arith.constant 9.99999996E-13 : f32
    %315 = vector.broadcast %cst_143 : f32 to vector<16x1xf32>
    %316 = arith.addf %312, %315 : vector<16x1xf32>
    %317 = math.rsqrt %316 : vector<16x1xf32>
    %318 = vector.broadcast %317 : vector<16x1xf32> to vector<16x32xf32>
    %319 = arith.mulf %314, %318 : vector<16x32xf32>
    %320 = vector.broadcast %299 : vector<1x32xf32> to vector<16x32xf32>
    %321 = arith.mulf %319, %320 : vector<16x32xf32>
    %322 = vector.broadcast %301 : vector<1x32xf32> to vector<16x32xf32>
    %323 = arith.addf %321, %322 : vector<16x32xf32>
    %c1 = arith.constant 1 : index
    %c0_144 = arith.constant 0 : index
    %c0_145 = arith.constant 0 : index
    %324 = vector.load %arg7[%c1, %c0_144, %c0_145] : memref<2x32x96xf32, #tpu.memory_space<vmem>>, vector<1x32x96xf32>
    %325 = vector.shape_cast %324 : vector<1x32x96xf32> to vector<32x96xf32>
    %cst_146 = arith.constant dense<0.000000e+00> : vector<16x96xf32>
    %326 = tpu.matmul %323, %325, %cst_146 {dimension_numbers = #tpu.dot_dimension_numbers<[1], [0], [0], [1], [0, 0, 1, 1], [], []>} : vector<16x32xf32>, vector<32x96xf32>, vector<16x96xf32> -> vector<16x96xf32>
    %c1_147 = arith.constant 1 : index
    %c0_148 = arith.constant 0 : index
    %c0_149 = arith.constant 0 : index
    %327 = vector.load %arg8[%c1_147, %c0_148, %c0_149] : memref<2x1x96xf32, #tpu.memory_space<vmem>>, vector<1x1x96xf32>
    %328 = vector.shape_cast %327 : vector<1x1x96xf32> to vector<1x96xf32>
    %329 = vector.broadcast %328 : vector<1x96xf32> to vector<16x96xf32>
    %330 = arith.addf %326, %329 : vector<16x96xf32>
    %331 = vector.extract_strided_slice %41 {offsets = [0, 0], sizes = [1, 8], strides = [1, 1]} : vector<2x8xf32> to vector<1x8xf32>
    %332 = vector.extract_strided_slice %330 {offsets = [0, 0], sizes = [8, 8], strides = [1, 1]} : vector<16x96xf32> to vector<8x8xf32>
    %333 = vector.extract_strided_slice %330 {offsets = [0, 32], sizes = [8, 8], strides = [1, 1]} : vector<16x96xf32> to vector<8x8xf32>
    %334 = vector.extract_strided_slice %330 {offsets = [0, 64], sizes = [8, 8], strides = [1, 1]} : vector<16x96xf32> to vector<8x8xf32>
    %cst_150 = arith.constant dense<0.000000e+00> : vector<8x8xf32>
    %335 = tpu.matmul %332, %333, %cst_150 {dimension_numbers = #tpu.dot_dimension_numbers<[1], [1], [0], [0], [0, 0, 1, 0], [], []>} : vector<8x8xf32>, vector<8x8xf32>, vector<8x8xf32> -> vector<8x8xf32>
    %cst_151 = arith.constant 0.353553385 : f32
    %336 = vector.broadcast %cst_151 : f32 to vector<8x8xf32>
    %337 = arith.mulf %335, %336 : vector<8x8xf32>
    %cst_152 = arith.constant 5.000000e-01 : f32
    %338 = vector.broadcast %cst_152 : f32 to vector<1x8xf32>
    %339 = arith.cmpf ogt, %331, %338 : vector<1x8xf32>
    %cst_153 = arith.constant -1.000000e+09 : f32
    %340 = vector.shape_cast %339 : vector<1x8xi1> to vector<1x8xi1>
    %341 = vector.broadcast %340 : vector<1x8xi1> to vector<8x8xi1>
    %342 = vector.broadcast %cst_153 : f32 to vector<8x8xf32>
    %343 = arith.select %341, %337, %342 : vector<8x8xi1>, vector<8x8xf32>
    %cst_154 = arith.constant dense<0xFF800000> : vector<8xf32>
    %344 = vector.multi_reduction <maximumf>, %343, %cst_154 [1] : vector<8x8xf32> to vector<8xf32>
    %345 = vector.shape_cast %344 : vector<8xf32> to vector<8x1xf32>
    %346 = vector.broadcast %345 : vector<8x1xf32> to vector<8x8xf32>
    %347 = arith.subf %343, %346 : vector<8x8xf32>
    %348 = math.exp %347 : vector<8x8xf32>
    %cst_155 = arith.constant dense<0.000000e+00> : vector<8xf32>
    %349 = vector.multi_reduction <add>, %348, %cst_155 [1] : vector<8x8xf32> to vector<8xf32>
    %350 = vector.shape_cast %349 : vector<8xf32> to vector<8x1xf32>
    %351 = vector.broadcast %350 : vector<8x1xf32> to vector<8x8xf32>
    %352 = arith.divf %348, %351 : vector<8x8xf32>
    %cst_156 = arith.constant dense<0.000000e+00> : vector<8x8xf32>
    %353 = tpu.matmul %352, %334, %cst_156 {dimension_numbers = #tpu.dot_dimension_numbers<[1], [0], [0], [1], [0, 0, 1, 1], [], []>} : vector<8x8xf32>, vector<8x8xf32>, vector<8x8xf32> -> vector<8x8xf32>
    %c0_157 = arith.constant 0 : index
    %c0_158 = arith.constant 0 : index
    %354 = vector.load %arg24[%c0_157, %c0_158] : memref<16x32xf32, #tpu.memory_space<vmem>>, vector<8x8xf32>
    tpu.vector_store %arg24[%c0_157, %c0_158], %353 {strides = array<i32>} : memref<16x32xf32, #tpu.memory_space<vmem>>, vector<8x8xf32>,
    %355 = vector.extract_strided_slice %330 {offsets = [0, 8], sizes = [8, 8], strides = [1, 1]} : vector<16x96xf32> to vector<8x8xf32>
    %356 = vector.extract_strided_slice %330 {offsets = [0, 40], sizes = [8, 8], strides = [1, 1]} : vector<16x96xf32> to vector<8x8xf32>
    %357 = vector.extract_strided_slice %330 {offsets = [0, 72], sizes = [8, 8], strides = [1, 1]} : vector<16x96xf32> to vector<8x8xf32>
    %cst_159 = arith.constant dense<0.000000e+00> : vector<8x8xf32>
    %358 = tpu.matmul %355, %356, %cst_159 {dimension_numbers = #tpu.dot_dimension_numbers<[1], [1], [0], [0], [0, 0, 1, 0], [], []>} : vector<8x8xf32>, vector<8x8xf32>, vector<8x8xf32> -> vector<8x8xf32>
    %cst_160 = arith.constant 0.353553385 : f32
    %359 = vector.broadcast %cst_160 : f32 to vector<8x8xf32>
    %360 = arith.mulf %358, %359 : vector<8x8xf32>
    %cst_161 = arith.constant 5.000000e-01 : f32
    %361 = vector.broadcast %cst_161 : f32 to vector<1x8xf32>
    %362 = arith.cmpf ogt, %331, %361 : vector<1x8xf32>
    %cst_162 = arith.constant -1.000000e+09 : f32
    %363 = vector.shape_cast %362 : vector<1x8xi1> to vector<1x8xi1>
    %364 = vector.broadcast %363 : vector<1x8xi1> to vector<8x8xi1>
    %365 = vector.broadcast %cst_162 : f32 to vector<8x8xf32>
    %366 = arith.select %364, %360, %365 : vector<8x8xi1>, vector<8x8xf32>
    %cst_163 = arith.constant dense<0xFF800000> : vector<8xf32>
    %367 = vector.multi_reduction <maximumf>, %366, %cst_163 [1] : vector<8x8xf32> to vector<8xf32>
    %368 = vector.shape_cast %367 : vector<8xf32> to vector<8x1xf32>
    %369 = vector.broadcast %368 : vector<8x1xf32> to vector<8x8xf32>
    %370 = arith.subf %366, %369 : vector<8x8xf32>
    %371 = math.exp %370 : vector<8x8xf32>
    %cst_164 = arith.constant dense<0.000000e+00> : vector<8xf32>
    %372 = vector.multi_reduction <add>, %371, %cst_164 [1] : vector<8x8xf32> to vector<8xf32>
    %373 = vector.shape_cast %372 : vector<8xf32> to vector<8x1xf32>
    %374 = vector.broadcast %373 : vector<8x1xf32> to vector<8x8xf32>
    %375 = arith.divf %371, %374 : vector<8x8xf32>
    %cst_165 = arith.constant dense<0.000000e+00> : vector<8x8xf32>
    %376 = tpu.matmul %375, %357, %cst_165 {dimension_numbers = #tpu.dot_dimension_numbers<[1], [0], [0], [1], [0, 0, 1, 1], [], []>} : vector<8x8xf32>, vector<8x8xf32>, vector<8x8xf32> -> vector<8x8xf32>
    %c0_166 = arith.constant 0 : index
    %c8_167 = arith.constant 8 : index
    %377 = vector.load %arg24[%c0_166, %c8_167] : memref<16x32xf32, #tpu.memory_space<vmem>>, vector<8x8xf32>
    tpu.vector_store %arg24[%c0_166, %c8_167], %376 {strides = array<i32>} : memref<16x32xf32, #tpu.memory_space<vmem>>, vector<8x8xf32>,
    %378 = vector.extract_strided_slice %330 {offsets = [0, 16], sizes = [8, 8], strides = [1, 1]} : vector<16x96xf32> to vector<8x8xf32>
    %379 = vector.extract_strided_slice %330 {offsets = [0, 48], sizes = [8, 8], strides = [1, 1]} : vector<16x96xf32> to vector<8x8xf32>
    %380 = vector.extract_strided_slice %330 {offsets = [0, 80], sizes = [8, 8], strides = [1, 1]} : vector<16x96xf32> to vector<8x8xf32>
    %cst_168 = arith.constant dense<0.000000e+00> : vector<8x8xf32>
    %381 = tpu.matmul %378, %379, %cst_168 {dimension_numbers = #tpu.dot_dimension_numbers<[1], [1], [0], [0], [0, 0, 1, 0], [], []>} : vector<8x8xf32>, vector<8x8xf32>, vector<8x8xf32> -> vector<8x8xf32>
    %cst_169 = arith.constant 0.353553385 : f32
    %382 = vector.broadcast %cst_169 : f32 to vector<8x8xf32>
    %383 = arith.mulf %381, %382 : vector<8x8xf32>
    %cst_170 = arith.constant 5.000000e-01 : f32
    %384 = vector.broadcast %cst_170 : f32 to vector<1x8xf32>
    %385 = arith.cmpf ogt, %331, %384 : vector<1x8xf32>
    %cst_171 = arith.constant -1.000000e+09 : f32
    %386 = vector.shape_cast %385 : vector<1x8xi1> to vector<1x8xi1>
    %387 = vector.broadcast %386 : vector<1x8xi1> to vector<8x8xi1>
    %388 = vector.broadcast %cst_171 : f32 to vector<8x8xf32>
    %389 = arith.select %387, %383, %388 : vector<8x8xi1>, vector<8x8xf32>
    %cst_172 = arith.constant dense<0xFF800000> : vector<8xf32>
    %390 = vector.multi_reduction <maximumf>, %389, %cst_172 [1] : vector<8x8xf32> to vector<8xf32>
    %391 = vector.shape_cast %390 : vector<8xf32> to vector<8x1xf32>
    %392 = vector.broadcast %391 : vector<8x1xf32> to vector<8x8xf32>
    %393 = arith.subf %389, %392 : vector<8x8xf32>
    %394 = math.exp %393 : vector<8x8xf32>
    %cst_173 = arith.constant dense<0.000000e+00> : vector<8xf32>
    %395 = vector.multi_reduction <add>, %394, %cst_173 [1] : vector<8x8xf32> to vector<8xf32>
    %396 = vector.shape_cast %395 : vector<8xf32> to vector<8x1xf32>
    %397 = vector.broadcast %396 : vector<8x1xf32> to vector<8x8xf32>
    %398 = arith.divf %394, %397 : vector<8x8xf32>
    %cst_174 = arith.constant dense<0.000000e+00> : vector<8x8xf32>
    %399 = tpu.matmul %398, %380, %cst_174 {dimension_numbers = #tpu.dot_dimension_numbers<[1], [0], [0], [1], [0, 0, 1, 1], [], []>} : vector<8x8xf32>, vector<8x8xf32>, vector<8x8xf32> -> vector<8x8xf32>
    %c0_175 = arith.constant 0 : index
    %c16_176 = arith.constant 16 : index
    %400 = vector.load %arg24[%c0_175, %c16_176] : memref<16x32xf32, #tpu.memory_space<vmem>>, vector<8x8xf32>
    tpu.vector_store %arg24[%c0_175, %c16_176], %399 {strides = array<i32>} : memref<16x32xf32, #tpu.memory_space<vmem>>, vector<8x8xf32>,
    %401 = vector.extract_strided_slice %330 {offsets = [0, 24], sizes = [8, 8], strides = [1, 1]} : vector<16x96xf32> to vector<8x8xf32>
    %402 = vector.extract_strided_slice %330 {offsets = [0, 56], sizes = [8, 8], strides = [1, 1]} : vector<16x96xf32> to vector<8x8xf32>
    %403 = vector.extract_strided_slice %330 {offsets = [0, 88], sizes = [8, 8], strides = [1, 1]} : vector<16x96xf32> to vector<8x8xf32>
    %cst_177 = arith.constant dense<0.000000e+00> : vector<8x8xf32>
    %404 = tpu.matmul %401, %402, %cst_177 {dimension_numbers = #tpu.dot_dimension_numbers<[1], [1], [0], [0], [0, 0, 1, 0], [], []>} : vector<8x8xf32>, vector<8x8xf32>, vector<8x8xf32> -> vector<8x8xf32>
    %cst_178 = arith.constant 0.353553385 : f32
    %405 = vector.broadcast %cst_178 : f32 to vector<8x8xf32>
    %406 = arith.mulf %404, %405 : vector<8x8xf32>
    %cst_179 = arith.constant 5.000000e-01 : f32
    %407 = vector.broadcast %cst_179 : f32 to vector<1x8xf32>
    %408 = arith.cmpf ogt, %331, %407 : vector<1x8xf32>
    %cst_180 = arith.constant -1.000000e+09 : f32
    %409 = vector.shape_cast %408 : vector<1x8xi1> to vector<1x8xi1>
    %410 = vector.broadcast %409 : vector<1x8xi1> to vector<8x8xi1>
    %411 = vector.broadcast %cst_180 : f32 to vector<8x8xf32>
    %412 = arith.select %410, %406, %411 : vector<8x8xi1>, vector<8x8xf32>
    %cst_181 = arith.constant dense<0xFF800000> : vector<8xf32>
    %413 = vector.multi_reduction <maximumf>, %412, %cst_181 [1] : vector<8x8xf32> to vector<8xf32>
    %414 = vector.shape_cast %413 : vector<8xf32> to vector<8x1xf32>
    %415 = vector.broadcast %414 : vector<8x1xf32> to vector<8x8xf32>
    %416 = arith.subf %412, %415 : vector<8x8xf32>
    %417 = math.exp %416 : vector<8x8xf32>
    %cst_182 = arith.constant dense<0.000000e+00> : vector<8xf32>
    %418 = vector.multi_reduction <add>, %417, %cst_182 [1] : vector<8x8xf32> to vector<8xf32>
    %419 = vector.shape_cast %418 : vector<8xf32> to vector<8x1xf32>
    %420 = vector.broadcast %419 : vector<8x1xf32> to vector<8x8xf32>
    %421 = arith.divf %417, %420 : vector<8x8xf32>
    %cst_183 = arith.constant dense<0.000000e+00> : vector<8x8xf32>
    %422 = tpu.matmul %421, %403, %cst_183 {dimension_numbers = #tpu.dot_dimension_numbers<[1], [0], [0], [1], [0, 0, 1, 1], [], []>} : vector<8x8xf32>, vector<8x8xf32>, vector<8x8xf32> -> vector<8x8xf32>
    %c0_184 = arith.constant 0 : index
    %c24_185 = arith.constant 24 : index
    %423 = vector.load %arg24[%c0_184, %c24_185] : memref<16x32xf32, #tpu.memory_space<vmem>>, vector<8x8xf32>
    tpu.vector_store %arg24[%c0_184, %c24_185], %422 {strides = array<i32>} : memref<16x32xf32, #tpu.memory_space<vmem>>, vector<8x8xf32>,
    %424 = vector.extract_strided_slice %41 {offsets = [1, 0], sizes = [1, 8], strides = [1, 1]} : vector<2x8xf32> to vector<1x8xf32>
    %425 = vector.extract_strided_slice %330 {offsets = [8, 0], sizes = [8, 8], strides = [1, 1]} : vector<16x96xf32> to vector<8x8xf32>
    %426 = vector.extract_strided_slice %330 {offsets = [8, 32], sizes = [8, 8], strides = [1, 1]} : vector<16x96xf32> to vector<8x8xf32>
    %427 = vector.extract_strided_slice %330 {offsets = [8, 64], sizes = [8, 8], strides = [1, 1]} : vector<16x96xf32> to vector<8x8xf32>
    %cst_186 = arith.constant dense<0.000000e+00> : vector<8x8xf32>
    %428 = tpu.matmul %425, %426, %cst_186 {dimension_numbers = #tpu.dot_dimension_numbers<[1], [1], [0], [0], [0, 0, 1, 0], [], []>} : vector<8x8xf32>, vector<8x8xf32>, vector<8x8xf32> -> vector<8x8xf32>
    %cst_187 = arith.constant 0.353553385 : f32
    %429 = vector.broadcast %cst_187 : f32 to vector<8x8xf32>
    %430 = arith.mulf %428, %429 : vector<8x8xf32>
    %cst_188 = arith.constant 5.000000e-01 : f32
    %431 = vector.broadcast %cst_188 : f32 to vector<1x8xf32>
    %432 = arith.cmpf ogt, %424, %431 : vector<1x8xf32>
    %cst_189 = arith.constant -1.000000e+09 : f32
    %433 = vector.shape_cast %432 : vector<1x8xi1> to vector<1x8xi1>
    %434 = vector.broadcast %433 : vector<1x8xi1> to vector<8x8xi1>
    %435 = vector.broadcast %cst_189 : f32 to vector<8x8xf32>
    %436 = arith.select %434, %430, %435 : vector<8x8xi1>, vector<8x8xf32>
    %cst_190 = arith.constant dense<0xFF800000> : vector<8xf32>
    %437 = vector.multi_reduction <maximumf>, %436, %cst_190 [1] : vector<8x8xf32> to vector<8xf32>
    %438 = vector.shape_cast %437 : vector<8xf32> to vector<8x1xf32>
    %439 = vector.broadcast %438 : vector<8x1xf32> to vector<8x8xf32>
    %440 = arith.subf %436, %439 : vector<8x8xf32>
    %441 = math.exp %440 : vector<8x8xf32>
    %cst_191 = arith.constant dense<0.000000e+00> : vector<8xf32>
    %442 = vector.multi_reduction <add>, %441, %cst_191 [1] : vector<8x8xf32> to vector<8xf32>
    %443 = vector.shape_cast %442 : vector<8xf32> to vector<8x1xf32>
    %444 = vector.broadcast %443 : vector<8x1xf32> to vector<8x8xf32>
    %445 = arith.divf %441, %444 : vector<8x8xf32>
    %cst_192 = arith.constant dense<0.000000e+00> : vector<8x8xf32>
    %446 = tpu.matmul %445, %427, %cst_192 {dimension_numbers = #tpu.dot_dimension_numbers<[1], [0], [0], [1], [0, 0, 1, 1], [], []>} : vector<8x8xf32>, vector<8x8xf32>, vector<8x8xf32> -> vector<8x8xf32>
    %c8_193 = arith.constant 8 : index
    %c0_194 = arith.constant 0 : index
    %447 = vector.load %arg24[%c8_193, %c0_194] : memref<16x32xf32, #tpu.memory_space<vmem>>, vector<8x8xf32>
    tpu.vector_store %arg24[%c8_193, %c0_194], %446 {strides = array<i32>} : memref<16x32xf32, #tpu.memory_space<vmem>>, vector<8x8xf32>,
    %448 = vector.extract_strided_slice %330 {offsets = [8, 8], sizes = [8, 8], strides = [1, 1]} : vector<16x96xf32> to vector<8x8xf32>
    %449 = vector.extract_strided_slice %330 {offsets = [8, 40], sizes = [8, 8], strides = [1, 1]} : vector<16x96xf32> to vector<8x8xf32>
    %450 = vector.extract_strided_slice %330 {offsets = [8, 72], sizes = [8, 8], strides = [1, 1]} : vector<16x96xf32> to vector<8x8xf32>
    %cst_195 = arith.constant dense<0.000000e+00> : vector<8x8xf32>
    %451 = tpu.matmul %448, %449, %cst_195 {dimension_numbers = #tpu.dot_dimension_numbers<[1], [1], [0], [0], [0, 0, 1, 0], [], []>} : vector<8x8xf32>, vector<8x8xf32>, vector<8x8xf32> -> vector<8x8xf32>
    %cst_196 = arith.constant 0.353553385 : f32
    %452 = vector.broadcast %cst_196 : f32 to vector<8x8xf32>
    %453 = arith.mulf %451, %452 : vector<8x8xf32>
    %cst_197 = arith.constant 5.000000e-01 : f32
    %454 = vector.broadcast %cst_197 : f32 to vector<1x8xf32>
    %455 = arith.cmpf ogt, %424, %454 : vector<1x8xf32>
    %cst_198 = arith.constant -1.000000e+09 : f32
    %456 = vector.shape_cast %455 : vector<1x8xi1> to vector<1x8xi1>
    %457 = vector.broadcast %456 : vector<1x8xi1> to vector<8x8xi1>
    %458 = vector.broadcast %cst_198 : f32 to vector<8x8xf32>
    %459 = arith.select %457, %453, %458 : vector<8x8xi1>, vector<8x8xf32>
    %cst_199 = arith.constant dense<0xFF800000> : vector<8xf32>
    %460 = vector.multi_reduction <maximumf>, %459, %cst_199 [1] : vector<8x8xf32> to vector<8xf32>
    %461 = vector.shape_cast %460 : vector<8xf32> to vector<8x1xf32>
    %462 = vector.broadcast %461 : vector<8x1xf32> to vector<8x8xf32>
    %463 = arith.subf %459, %462 : vector<8x8xf32>
    %464 = math.exp %463 : vector<8x8xf32>
    %cst_200 = arith.constant dense<0.000000e+00> : vector<8xf32>
    %465 = vector.multi_reduction <add>, %464, %cst_200 [1] : vector<8x8xf32> to vector<8xf32>
    %466 = vector.shape_cast %465 : vector<8xf32> to vector<8x1xf32>
    %467 = vector.broadcast %466 : vector<8x1xf32> to vector<8x8xf32>
    %468 = arith.divf %464, %467 : vector<8x8xf32>
    %cst_201 = arith.constant dense<0.000000e+00> : vector<8x8xf32>
    %469 = tpu.matmul %468, %450, %cst_201 {dimension_numbers = #tpu.dot_dimension_numbers<[1], [0], [0], [1], [0, 0, 1, 1], [], []>} : vector<8x8xf32>, vector<8x8xf32>, vector<8x8xf32> -> vector<8x8xf32>
    %c8_202 = arith.constant 8 : index
    %c8_203 = arith.constant 8 : index
    %470 = vector.load %arg24[%c8_202, %c8_203] : memref<16x32xf32, #tpu.memory_space<vmem>>, vector<8x8xf32>
    tpu.vector_store %arg24[%c8_202, %c8_203], %469 {strides = array<i32>} : memref<16x32xf32, #tpu.memory_space<vmem>>, vector<8x8xf32>,
    %471 = vector.extract_strided_slice %330 {offsets = [8, 16], sizes = [8, 8], strides = [1, 1]} : vector<16x96xf32> to vector<8x8xf32>
    %472 = vector.extract_strided_slice %330 {offsets = [8, 48], sizes = [8, 8], strides = [1, 1]} : vector<16x96xf32> to vector<8x8xf32>
    %473 = vector.extract_strided_slice %330 {offsets = [8, 80], sizes = [8, 8], strides = [1, 1]} : vector<16x96xf32> to vector<8x8xf32>
    %cst_204 = arith.constant dense<0.000000e+00> : vector<8x8xf32>
    %474 = tpu.matmul %471, %472, %cst_204 {dimension_numbers = #tpu.dot_dimension_numbers<[1], [1], [0], [0], [0, 0, 1, 0], [], []>} : vector<8x8xf32>, vector<8x8xf32>, vector<8x8xf32> -> vector<8x8xf32>
    %cst_205 = arith.constant 0.353553385 : f32
    %475 = vector.broadcast %cst_205 : f32 to vector<8x8xf32>
    %476 = arith.mulf %474, %475 : vector<8x8xf32>
    %cst_206 = arith.constant 5.000000e-01 : f32
    %477 = vector.broadcast %cst_206 : f32 to vector<1x8xf32>
    %478 = arith.cmpf ogt, %424, %477 : vector<1x8xf32>
    %cst_207 = arith.constant -1.000000e+09 : f32
    %479 = vector.shape_cast %478 : vector<1x8xi1> to vector<1x8xi1>
    %480 = vector.broadcast %479 : vector<1x8xi1> to vector<8x8xi1>
    %481 = vector.broadcast %cst_207 : f32 to vector<8x8xf32>
    %482 = arith.select %480, %476, %481 : vector<8x8xi1>, vector<8x8xf32>
    %cst_208 = arith.constant dense<0xFF800000> : vector<8xf32>
    %483 = vector.multi_reduction <maximumf>, %482, %cst_208 [1] : vector<8x8xf32> to vector<8xf32>
    %484 = vector.shape_cast %483 : vector<8xf32> to vector<8x1xf32>
    %485 = vector.broadcast %484 : vector<8x1xf32> to vector<8x8xf32>
    %486 = arith.subf %482, %485 : vector<8x8xf32>
    %487 = math.exp %486 : vector<8x8xf32>
    %cst_209 = arith.constant dense<0.000000e+00> : vector<8xf32>
    %488 = vector.multi_reduction <add>, %487, %cst_209 [1] : vector<8x8xf32> to vector<8xf32>
    %489 = vector.shape_cast %488 : vector<8xf32> to vector<8x1xf32>
    %490 = vector.broadcast %489 : vector<8x1xf32> to vector<8x8xf32>
    %491 = arith.divf %487, %490 : vector<8x8xf32>
    %cst_210 = arith.constant dense<0.000000e+00> : vector<8x8xf32>
    %492 = tpu.matmul %491, %473, %cst_210 {dimension_numbers = #tpu.dot_dimension_numbers<[1], [0], [0], [1], [0, 0, 1, 1], [], []>} : vector<8x8xf32>, vector<8x8xf32>, vector<8x8xf32> -> vector<8x8xf32>
    %c8_211 = arith.constant 8 : index
    %c16_212 = arith.constant 16 : index
    %493 = vector.load %arg24[%c8_211, %c16_212] : memref<16x32xf32, #tpu.memory_space<vmem>>, vector<8x8xf32>
    tpu.vector_store %arg24[%c8_211, %c16_212], %492 {strides = array<i32>} : memref<16x32xf32, #tpu.memory_space<vmem>>, vector<8x8xf32>,
    %494 = vector.extract_strided_slice %330 {offsets = [8, 24], sizes = [8, 8], strides = [1, 1]} : vector<16x96xf32> to vector<8x8xf32>
    %495 = vector.extract_strided_slice %330 {offsets = [8, 56], sizes = [8, 8], strides = [1, 1]} : vector<16x96xf32> to vector<8x8xf32>
    %496 = vector.extract_strided_slice %330 {offsets = [8, 88], sizes = [8, 8], strides = [1, 1]} : vector<16x96xf32> to vector<8x8xf32>
    %cst_213 = arith.constant dense<0.000000e+00> : vector<8x8xf32>
    %497 = tpu.matmul %494, %495, %cst_213 {dimension_numbers = #tpu.dot_dimension_numbers<[1], [1], [0], [0], [0, 0, 1, 0], [], []>} : vector<8x8xf32>, vector<8x8xf32>, vector<8x8xf32> -> vector<8x8xf32>
    %cst_214 = arith.constant 0.353553385 : f32
    %498 = vector.broadcast %cst_214 : f32 to vector<8x8xf32>
    %499 = arith.mulf %497, %498 : vector<8x8xf32>
    %cst_215 = arith.constant 5.000000e-01 : f32
    %500 = vector.broadcast %cst_215 : f32 to vector<1x8xf32>
    %501 = arith.cmpf ogt, %424, %500 : vector<1x8xf32>
    %cst_216 = arith.constant -1.000000e+09 : f32
    %502 = vector.shape_cast %501 : vector<1x8xi1> to vector<1x8xi1>
    %503 = vector.broadcast %502 : vector<1x8xi1> to vector<8x8xi1>
    %504 = vector.broadcast %cst_216 : f32 to vector<8x8xf32>
    %505 = arith.select %503, %499, %504 : vector<8x8xi1>, vector<8x8xf32>
    %cst_217 = arith.constant dense<0xFF800000> : vector<8xf32>
    %506 = vector.multi_reduction <maximumf>, %505, %cst_217 [1] : vector<8x8xf32> to vector<8xf32>
    %507 = vector.shape_cast %506 : vector<8xf32> to vector<8x1xf32>
    %508 = vector.broadcast %507 : vector<8x1xf32> to vector<8x8xf32>
    %509 = arith.subf %505, %508 : vector<8x8xf32>
    %510 = math.exp %509 : vector<8x8xf32>
    %cst_218 = arith.constant dense<0.000000e+00> : vector<8xf32>
    %511 = vector.multi_reduction <add>, %510, %cst_218 [1] : vector<8x8xf32> to vector<8xf32>
    %512 = vector.shape_cast %511 : vector<8xf32> to vector<8x1xf32>
    %513 = vector.broadcast %512 : vector<8x1xf32> to vector<8x8xf32>
    %514 = arith.divf %510, %513 : vector<8x8xf32>
    %cst_219 = arith.constant dense<0.000000e+00> : vector<8x8xf32>
    %515 = tpu.matmul %514, %496, %cst_219 {dimension_numbers = #tpu.dot_dimension_numbers<[1], [0], [0], [1], [0, 0, 1, 1], [], []>} : vector<8x8xf32>, vector<8x8xf32>, vector<8x8xf32> -> vector<8x8xf32>
    %c8_220 = arith.constant 8 : index
    %c24_221 = arith.constant 24 : index
    %516 = vector.load %arg24[%c8_220, %c24_221] : memref<16x32xf32, #tpu.memory_space<vmem>>, vector<8x8xf32>
    tpu.vector_store %arg24[%c8_220, %c24_221], %515 {strides = array<i32>} : memref<16x32xf32, #tpu.memory_space<vmem>>, vector<8x8xf32>,
    %c0_222 = arith.constant 0 : index
    %c0_223 = arith.constant 0 : index
    %517 = vector.load %arg24[%c0_222, %c0_223] : memref<16x32xf32, #tpu.memory_space<vmem>>, vector<16x32xf32>
    %c1_224 = arith.constant 1 : index
    %c0_225 = arith.constant 0 : index
    %c0_226 = arith.constant 0 : index
    %518 = vector.load %arg9[%c1_224, %c0_225, %c0_226] : memref<2x32x32xf32, #tpu.memory_space<vmem>>, vector<1x32x32xf32>
    %519 = vector.shape_cast %518 : vector<1x32x32xf32> to vector<32x32xf32>
    %cst_227 = arith.constant dense<0.000000e+00> : vector<16x32xf32>
    %520 = tpu.matmul %517, %519, %cst_227 {dimension_numbers = #tpu.dot_dimension_numbers<[1], [0], [0], [1], [0, 0, 1, 1], [], []>} : vector<16x32xf32>, vector<32x32xf32>, vector<16x32xf32> -> vector<16x32xf32>
    %c1_228 = arith.constant 1 : index
    %c0_229 = arith.constant 0 : index
    %c0_230 = arith.constant 0 : index
    %521 = vector.load %arg10[%c1_228, %c0_229, %c0_230] : memref<2x1x32xf32, #tpu.memory_space<vmem>>, vector<1x1x32xf32>
    %522 = vector.shape_cast %521 : vector<1x1x32xf32> to vector<1x32xf32>
    %523 = vector.broadcast %522 : vector<1x32xf32> to vector<16x32xf32>
    %524 = arith.addf %520, %523 : vector<16x32xf32>
    %525 = arith.addf %323, %524 : vector<16x32xf32>
    %c1_231 = arith.constant 1 : index
    %c0_232 = arith.constant 0 : index
    %c0_233 = arith.constant 0 : index
    %526 = vector.load %arg11[%c1_231, %c0_232, %c0_233] : memref<2x1x32xf32, #tpu.memory_space<vmem>>, vector<1x1x32xf32>
    %527 = vector.shape_cast %526 : vector<1x1x32xf32> to vector<1x32xf32>
    %c1_234 = arith.constant 1 : index
    %c0_235 = arith.constant 0 : index
    %c0_236 = arith.constant 0 : index
    %528 = vector.load %arg12[%c1_234, %c0_235, %c0_236] : memref<2x1x32xf32, #tpu.memory_space<vmem>>, vector<1x1x32xf32>
    %529 = vector.shape_cast %528 : vector<1x1x32xf32> to vector<1x32xf32>
    %cst_237 = arith.constant dense<0.000000e+00> : vector<16xf32>
    %530 = vector.multi_reduction <add>, %525, %cst_237 [1] : vector<16x32xf32> to vector<16xf32>
    %531 = vector.shape_cast %530 : vector<16xf32> to vector<16x1xf32>
    %cst_238 = arith.constant 3.200000e+01 : f32
    %532 = vector.broadcast %cst_238 : f32 to vector<16x1xf32>
    %533 = arith.divf %531, %532 : vector<16x1xf32>
    %534 = vector.broadcast %533 : vector<16x1xf32> to vector<16x32xf32>
    %535 = arith.subf %525, %534 : vector<16x32xf32>
    %536 = arith.mulf %535, %535 : vector<16x32xf32>
    %cst_239 = arith.constant dense<0.000000e+00> : vector<16xf32>
    %537 = vector.multi_reduction <add>, %536, %cst_239 [1] : vector<16x32xf32> to vector<16xf32>
    %538 = vector.shape_cast %537 : vector<16xf32> to vector<16x1xf32>
    %cst_240 = arith.constant 3.200000e+01 : f32
    %539 = vector.broadcast %cst_240 : f32 to vector<16x1xf32>
    %540 = arith.divf %538, %539 : vector<16x1xf32>
    %541 = vector.broadcast %533 : vector<16x1xf32> to vector<16x32xf32>
    %542 = arith.subf %525, %541 : vector<16x32xf32>
    %cst_241 = arith.constant 9.99999996E-13 : f32
    %543 = vector.broadcast %cst_241 : f32 to vector<16x1xf32>
    %544 = arith.addf %540, %543 : vector<16x1xf32>
    %545 = math.rsqrt %544 : vector<16x1xf32>
    %546 = vector.broadcast %545 : vector<16x1xf32> to vector<16x32xf32>
    %547 = arith.mulf %542, %546 : vector<16x32xf32>
    %548 = vector.broadcast %527 : vector<1x32xf32> to vector<16x32xf32>
    %549 = arith.mulf %547, %548 : vector<16x32xf32>
    %550 = vector.broadcast %529 : vector<1x32xf32> to vector<16x32xf32>
    %551 = arith.addf %549, %550 : vector<16x32xf32>
    %c1_242 = arith.constant 1 : index
    %c0_243 = arith.constant 0 : index
    %c0_244 = arith.constant 0 : index
    %552 = vector.load %arg13[%c1_242, %c0_243, %c0_244] : memref<2x32x64xf32, #tpu.memory_space<vmem>>, vector<1x32x64xf32>
    %553 = vector.shape_cast %552 : vector<1x32x64xf32> to vector<32x64xf32>
    %cst_245 = arith.constant dense<0.000000e+00> : vector<16x64xf32>
    %554 = tpu.matmul %551, %553, %cst_245 {dimension_numbers = #tpu.dot_dimension_numbers<[1], [0], [0], [1], [0, 0, 1, 1], [], []>} : vector<16x32xf32>, vector<32x64xf32>, vector<16x64xf32> -> vector<16x64xf32>
    %c1_246 = arith.constant 1 : index
    %c0_247 = arith.constant 0 : index
    %c0_248 = arith.constant 0 : index
    %555 = vector.load %arg14[%c1_246, %c0_247, %c0_248] : memref<2x1x64xf32, #tpu.memory_space<vmem>>, vector<1x1x64xf32>
    %556 = vector.shape_cast %555 : vector<1x1x64xf32> to vector<1x64xf32>
    %557 = vector.broadcast %556 : vector<1x64xf32> to vector<16x64xf32>
    %558 = arith.addf %554, %557 : vector<16x64xf32>
    %cst_249 = arith.constant 5.000000e-01 : f32
    %559 = vector.broadcast %cst_249 : f32 to vector<16x64xf32>
    %560 = arith.mulf %559, %558 : vector<16x64xf32>
    %cst_250 = arith.constant 4.471500e-02 : f32
    %561 = vector.broadcast %cst_250 : f32 to vector<16x64xf32>
    %562 = arith.mulf %561, %558 : vector<16x64xf32>
    %563 = arith.mulf %562, %558 : vector<16x64xf32>
    %564 = arith.mulf %563, %558 : vector<16x64xf32>
    %565 = arith.addf %558, %564 : vector<16x64xf32>
    %cst_251 = arith.constant 0.797884583 : f32
    %566 = vector.broadcast %cst_251 : f32 to vector<16x64xf32>
    %567 = arith.mulf %566, %565 : vector<16x64xf32>
    %568 = math.tanh %567 : vector<16x64xf32>
    %cst_252 = arith.constant 1.000000e+00 : f32
    %569 = vector.broadcast %cst_252 : f32 to vector<16x64xf32>
    %570 = arith.addf %569, %568 : vector<16x64xf32>
    %571 = arith.mulf %560, %570 : vector<16x64xf32>
    %c1_253 = arith.constant 1 : index
    %c0_254 = arith.constant 0 : index
    %c0_255 = arith.constant 0 : index
    %572 = vector.load %arg15[%c1_253, %c0_254, %c0_255] : memref<2x64x32xf32, #tpu.memory_space<vmem>>, vector<1x64x32xf32>
    %573 = vector.shape_cast %572 : vector<1x64x32xf32> to vector<64x32xf32>
    %cst_256 = arith.constant dense<0.000000e+00> : vector<16x32xf32>
    %574 = tpu.matmul %571, %573, %cst_256 {dimension_numbers = #tpu.dot_dimension_numbers<[1], [0], [0], [1], [0, 0, 1, 1], [], []>} : vector<16x64xf32>, vector<64x32xf32>, vector<16x32xf32> -> vector<16x32xf32>
    %c1_257 = arith.constant 1 : index
    %c0_258 = arith.constant 0 : index
    %c0_259 = arith.constant 0 : index
    %575 = vector.load %arg16[%c1_257, %c0_258, %c0_259] : memref<2x1x32xf32, #tpu.memory_space<vmem>>, vector<1x1x32xf32>
    %576 = vector.shape_cast %575 : vector<1x1x32xf32> to vector<1x32xf32>
    %577 = vector.broadcast %576 : vector<1x32xf32> to vector<16x32xf32>
    %578 = arith.addf %574, %577 : vector<16x32xf32>
    %579 = arith.addf %551, %578 : vector<16x32xf32>
    %c1_260 = arith.constant 1 : index
    %c0_261 = arith.constant 0 : index
    %c0_262 = arith.constant 0 : index
    %580 = vector.load %arg17[%c1_260, %c0_261, %c0_262] : memref<2x1x32xf32, #tpu.memory_space<vmem>>, vector<1x1x32xf32>
    %581 = vector.shape_cast %580 : vector<1x1x32xf32> to vector<1x32xf32>
    %c1_263 = arith.constant 1 : index
    %c0_264 = arith.constant 0 : index
    %c0_265 = arith.constant 0 : index
    %582 = vector.load %arg18[%c1_263, %c0_264, %c0_265] : memref<2x1x32xf32, #tpu.memory_space<vmem>>, vector<1x1x32xf32>
    %583 = vector.shape_cast %582 : vector<1x1x32xf32> to vector<1x32xf32>
    %cst_266 = arith.constant dense<0.000000e+00> : vector<16xf32>
    %584 = vector.multi_reduction <add>, %579, %cst_266 [1] : vector<16x32xf32> to vector<16xf32>
    %585 = vector.shape_cast %584 : vector<16xf32> to vector<16x1xf32>
    %cst_267 = arith.constant 3.200000e+01 : f32
    %586 = vector.broadcast %cst_267 : f32 to vector<16x1xf32>
    %587 = arith.divf %585, %586 : vector<16x1xf32>
    %588 = vector.broadcast %587 : vector<16x1xf32> to vector<16x32xf32>
    %589 = arith.subf %579, %588 : vector<16x32xf32>
    %590 = arith.mulf %589, %589 : vector<16x32xf32>
    %cst_268 = arith.constant dense<0.000000e+00> : vector<16xf32>
    %591 = vector.multi_reduction <add>, %590, %cst_268 [1] : vector<16x32xf32> to vector<16xf32>
    %592 = vector.shape_cast %591 : vector<16xf32> to vector<16x1xf32>
    %cst_269 = arith.constant 3.200000e+01 : f32
    %593 = vector.broadcast %cst_269 : f32 to vector<16x1xf32>
    %594 = arith.divf %592, %593 : vector<16x1xf32>
    %595 = vector.broadcast %587 : vector<16x1xf32> to vector<16x32xf32>
    %596 = arith.subf %579, %595 : vector<16x32xf32>
    %cst_270 = arith.constant 9.99999996E-13 : f32
    %597 = vector.broadcast %cst_270 : f32 to vector<16x1xf32>
    %598 = arith.addf %594, %597 : vector<16x1xf32>
    %599 = math.rsqrt %598 : vector<16x1xf32>
    %600 = vector.broadcast %599 : vector<16x1xf32> to vector<16x32xf32>
    %601 = arith.mulf %596, %600 : vector<16x32xf32>
    %602 = vector.broadcast %581 : vector<1x32xf32> to vector<16x32xf32>
    %603 = arith.mulf %601, %602 : vector<16x32xf32>
    %604 = vector.broadcast %583 : vector<1x32xf32> to vector<16x32xf32>
    %605 = arith.addf %603, %604 : vector<16x32xf32>
    %606 = tpu.iota {dimensions = array<i32: 1>} : vector<2x16xi32>
    %607 = tpu.iota {dimensions = array<i32: 0>} : vector<2x16xi32>
    %c8_i32 = arith.constant 8 : i32
    %608 = vector.broadcast %c8_i32 : i32 to vector<2x16xi32>
    %609 = arith.muli %607, %608 : vector<2x16xi32>
    %610 = arith.cmpi eq, %606, %609 : vector<2x16xi32>
    %611 = arith.extui %610 : vector<2x16xi1> to vector<2x16xi32>
    %612 = arith.sitofp %611 : vector<2x16xi32> to vector<2x16xf32>
    %cst_271 = arith.constant dense<0.000000e+00> : vector<2x32xf32>
    %613 = tpu.matmul %612, %605, %cst_271 {dimension_numbers = #tpu.dot_dimension_numbers<[1], [0], [0], [1], [0, 0, 1, 1], [], []>} : vector<2x16xf32>, vector<16x32xf32>, vector<2x32xf32> -> vector<2x32xf32>
    %c0_272 = arith.constant 0 : index
    %c0_273 = arith.constant 0 : index
    %614 = vector.load %arg19[%c0_272, %c0_273] : memref<32x32xf32, #tpu.memory_space<vmem>>, vector<32x32xf32>
    %cst_274 = arith.constant dense<0.000000e+00> : vector<2x32xf32>
    %615 = tpu.matmul %613, %614, %cst_274 {dimension_numbers = #tpu.dot_dimension_numbers<[1], [0], [0], [1], [0, 0, 1, 1], [], []>} : vector<2x32xf32>, vector<32x32xf32>, vector<2x32xf32> -> vector<2x32xf32>
    %c0_275 = arith.constant 0 : index
    %c0_276 = arith.constant 0 : index
    %616 = vector.load %arg20[%c0_275, %c0_276] : memref<1x32xf32, #tpu.memory_space<vmem>>, vector<1x32xf32>
    %617 = vector.broadcast %616 : vector<1x32xf32> to vector<2x32xf32>
    %618 = arith.addf %615, %617 : vector<2x32xf32>
    %cst_277 = arith.constant 0.000000e+00 : f32
    %619 = vector.broadcast %cst_277 : f32 to vector<2x32xf32>
    %620 = arith.maximumf %618, %619 : vector<2x32xf32>
    %c0_278 = arith.constant 0 : index
    %c0_279 = arith.constant 0 : index
    %621 = vector.load %arg21[%c0_278, %c0_279] : memref<32x4xf32, #tpu.memory_space<vmem>>, vector<32x4xf32>
    %cst_280 = arith.constant dense<0.000000e+00> : vector<2x4xf32>
    %622 = tpu.matmul %620, %621, %cst_280 {dimension_numbers = #tpu.dot_dimension_numbers<[1], [0], [0], [1], [0, 0, 1, 1], [], []>} : vector<2x32xf32>, vector<32x4xf32>, vector<2x4xf32> -> vector<2x4xf32>
    %c0_281 = arith.constant 0 : index
    %c0_282 = arith.constant 0 : index
    %623 = vector.load %arg22[%c0_281, %c0_282] : memref<1x4xf32, #tpu.memory_space<vmem>>, vector<1x4xf32>
    %624 = vector.broadcast %623 : vector<1x4xf32> to vector<2x4xf32>
    %625 = arith.addf %622, %624 : vector<2x4xf32>
    %cst_283 = arith.constant dense<0xFF800000> : vector<2xf32>
    %626 = vector.multi_reduction <maximumf>, %625, %cst_283 [1] : vector<2x4xf32> to vector<2xf32>
    %627 = vector.shape_cast %626 : vector<2xf32> to vector<2x1xf32>
    %628 = vector.broadcast %627 : vector<2x1xf32> to vector<2x4xf32>
    %629 = arith.subf %625, %628 : vector<2x4xf32>
    %630 = math.exp %629 : vector<2x4xf32>
    %cst_284 = arith.constant dense<0.000000e+00> : vector<2xf32>
    %631 = vector.multi_reduction <add>, %630, %cst_284 [1] : vector<2x4xf32> to vector<2xf32>
    %632 = vector.shape_cast %631 : vector<2xf32> to vector<2x1xf32>
    %633 = vector.broadcast %632 : vector<2x1xf32> to vector<2x4xf32>
    %634 = arith.divf %630, %633 : vector<2x4xf32>
    %c0_285 = arith.constant 0 : index
    %c0_286 = arith.constant 0 : index
    %635 = vector.load %arg23[%c0_285, %c0_286] : memref<2x4xf32, #tpu.memory_space<vmem>>, vector<2x4xf32>
    tpu.vector_store %arg23[%c0_285, %c0_286], %634 {strides = array<i32>} : memref<2x4xf32, #tpu.memory_space<vmem>>, vector<2x4xf32>,
    return
  }
}

</mosaic_0001>

<bundles_post_ra>
// kernel: tile.0
= control target key start
LH: loop header
LB: loop body
LE: loop exit
PB: predicated region body
PF: predicated region fallthrough
CT: control target
= control target key end

     0   :  { %s67_s8 = smov 125   ;;  %vm8_vm0 = vcmask 7168   ;;  %s68_s11 = smov 126   ;;  %s118_s0 = inlined_call_operand.vmem [shape: s32[2,8], index: 0, kind: input, shape index: {}]   ;;  %s119_s1 = inlined_call_operand.vmem [shape: s32[16,1], index: 1, kind: output, shape index: {}]  }
   0x1   :  { %v5_v0 = vld [vmem:[%s118_s0] sm:$0x3]  ;;  %s66_s0 = smov 127   ;;  %s69_s12 = smov 124  }
   0x2   :  { %6 = vst [vmem:[#allocation0] sm:$0x3] %v5_v0  ;;  %s70_s13 = smov 123   ;;  %s71_s14 = smov 122  }
   0x3   :  { %s72_s15 = smov 121  }
   0x9   :  { %v10_v1 = vld [vmem:[#allocation0] sm:$0x3]  }
   0xa   :  { %v22_v2 = vld [vmem:[#allocation0] sm:$0x3]   ;;  %11 = vrot.lane.b32.xlu0 %v10_v1, %s66_s0 }
   0xb   :  { %23 = vrot.lane.b32.xlu1 %v22_v2, %s67_s8  ;;  %v16_v3 = vld [vmem:[#allocation0] sm:$0x3]  }
   0xc   :  { %v28_v4 = vld [vmem:[#allocation0] sm:$0x3]  }
   0xd   :  { %v7_v5 = vld [vmem:[#allocation0] sm:$0x3]  }
   0xe   :  { %9 = vst.msk [vmem:[%s119_s1] ss:$8 sm:$0x3] %vm8_vm0, %v7_v5   ;;  %17 = vrot.lane.b32.xlu0 %v16_v3, %s68_s11  ;;  %v34_v6 = vld [vmem:[#allocation0] sm:$0x3]  }
   0xf   :  { %29 = vrot.lane.b32.xlu1 %v28_v4, %s69_s12  ;;  %v40_v7 = vld [vmem:[#allocation0] sm:$0x3]  }
  0x10   :  { %v46_v8 = vld [vmem:[#allocation0] sm:$0x3]  }
  0x12   :  { %35 = vrot.lane.b32.xlu0 %v34_v6, %s70_s13 }
  0x13   :  { %41 = vrot.lane.b32.xlu1 %v40_v7, %s71_s14 }
  0x16   :  { %47 = vrot.lane.b32.xlu0 %v46_v8, %s72_s15 }
  0x7c   :  { %v12_v9 = vpop.permute.xlu0 %11  }
  0x7d   :  { %v24_v10 = vpop.permute.xlu1 %23   ;;  %52 = vst.msk [vmem:[%s119_s1 + $0x1] ss:$8 sm:$0x3] %vm8_vm0, %v12_v9  }
  0x7e   :  { %54 = vst.msk [vmem:[%s119_s1 + $0x3] ss:$8 sm:$0x3] %vm8_vm0, %v24_v10  }
  0x80   :  { %v18_v11 = vpop.permute.xlu0 %17  }
  0x81   :  { %v30_v12 = vpop.permute.xlu1 %29   ;;  %53 = vst.msk [vmem:[%s119_s1 + $0x2] ss:$8 sm:$0x3] %vm8_vm0, %v18_v11  }
  0x82   :  { %55 = vst.msk [vmem:[%s119_s1 + $0x4] ss:$8 sm:$0x3] %vm8_vm0, %v30_v12  }
  0x84   :  { %v36_v13 = vpop.permute.xlu0 %35  }
  0x85   :  { %v42_v14 = vpop.permute.xlu1 %41   ;;  %56 = vst.msk [vmem:[%s119_s1 + $0x5] ss:$8 sm:$0x3] %vm8_vm0, %v36_v13  }
  0x86   :  { %57 = vst.msk [vmem:[%s119_s1 + $0x6] ss:$8 sm:$0x3] %vm8_vm0, %v42_v14  }
  0x88   :  { %v48_v15 = vpop.permute.xlu0 %47  }
  0x89   :  { %58 = vst.msk [vmem:[%s119_s1 + $0x7] ss:$8 sm:$0x3] %vm8_vm0, %v48_v15  }

// kernel: ohl_forward.1
= control target key start
LH: loop header
LB: loop body
LE: loop exit
PB: predicated region body
PF: predicated region fallthrough
CT: control target
= control target key end

     0   :  { %s6102_s0 = inlined_call_operand.vmem [shape: s32[16,1], index: 0, kind: input, shape index: {}]   ;;  %s6103_s1 = inlined_call_operand.vmem [shape: s32[16,1], index: 1, kind: input, shape index: {}]   ;;  %s6104_s2 = inlined_call_operand.vmem [shape: f32[2,8], index: 2, kind: input, shape index: {}]   ;;  %s6105_s3 = inlined_call_operand.hbm [shape: f32[128,32], index: 3, kind: input, shape index: {}]   ;;  %s6106_s4 = inlined_call_operand.hbm [shape: f32[16,32], index: 4, kind: input, shape index: {}]   ;;  %s6107_s5 = inlined_call_operand.vmem [shape: f32[1,32], index: 5, kind: input, shape index: {}]   ;;  %s6108_s6 = inlined_call_operand.vmem [shape: f32[1,32], index: 6, kind: input, shape index: {}, may-alias: {6,20}]   ;;  %s6109_s7 = inlined_call_operand.hbm [shape: f32[2,32,96], index: 7, kind: input, shape index: {}]   ;;  %s6110_s8 = inlined_call_operand.vmem [shape: f32[2,1,96], index: 8, kind: input, shape index: {}]   ;;  %s6111_s9 = inlined_call_operand.hbm [shape: f32[2,32,32], index: 9, kind: input, shape index: {}]   ;;  %s6112_s10 = inlined_call_operand.vmem [shape: f32[2,1,32], index: 10, kind: input, shape index: {}, may-alias: {10,12,16,18}]   ;;  %s6113_s11 = inlined_call_operand.vmem [shape: f32[2,1,32], index: 11, kind: input, shape index: {}, may-alias: {11,17}]   ;;  %s6114_s12 = inlined_call_operand.vmem [shape: f32[2,1,32], index: 12, kind: input, shape index: {}, may-alias: {10,12,16,18}]   ;;  %s6115_s13 = inlined_call_operand.vmem [shape: f32[2,32,64], index: 13, kind: input, shape index: {}]   ;;  %s6116_s14 = inlined_call_operand.vmem [shape: f32[2,1,64], index: 14, kind: input, shape index: {}]   ;;  %s6117_s15 = inlined_call_operand.hbm [shape: f32[2,64,32], index: 15, kind: input, shape index: {}]   ;;  %s6118_s16 = inlined_call_operand.vmem [shape: f32[2,1,32], index: 16, kind: input, shape index: {}, may-alias: {10,12,16,18}]   ;;  %s6119_s17 = inlined_call_operand.vmem [shape: f32[2,1,32], index: 17, kind: input, shape index: {}, may-alias: {11,17}]   ;;  %s6120_s18 = inlined_call_operand.vmem [shape: f32[2,1,32], index: 18, kind: input, shape index: {}, may-alias: {10,12,16,18}]   ;;  %s6121_s19 = inlined_call_operand.hbm [shape: f32[32,32], index: 19, kind: input, shape index: {}]   ;;  %s6122_s20 = inlined_call_operand.vmem [shape: f32[1,32], index: 20, kind: input, shape index: {}, may-alias: {6,20}]   ;;  %s6123_s21 = inlined_call_operand.hbm [shape: f32[32,4], index: 21, kind: input, shape index: {}]   ;;  %s6124_s22 = inlined_call_operand.vmem [shape: f32[1,4], index: 22, kind: input, shape index: {}]   ;;  %s6125_s23 = inlined_call_operand.hbm [shape: f32[2,4], index: 23, kind: output, shape index: {}]  }
   0x1   :  { %6134 = sst [smem:[#allocation21_spill]] %s6102_s0 }
   0x2   :  { %6135 = sst [smem:[#allocation22_spill]] %s6103_s1 }
   0x3   :  { %6136 = sst [smem:[#allocation23_spill]] %s6104_s2 }
   0x4   :  { %6137 = sst [smem:[#allocation24_spill]] %s6105_s3 }
   0x5   :  { %6138 = sst [smem:[#allocation25_spill]] %s6106_s4 }
   0x6   :  { %6139 = sst [smem:[#allocation26_spill]] %s6107_s5 }
   0x7   :  { %6140 = sst [smem:[#allocation27_spill]] %s6108_s6 }
   0x8   :  { %6141 = sst [smem:[#allocation28_spill]] %s6109_s7 }
   0x9   :  { %28 = vsyncpa [#allocation4], 0 }
   0xa   :  { %29 = vsyncpa [#allocation7], 0 }
   0xb   :  { %30 = vsyncpa [#allocation10], 0 }
   0xc   :  { %31 = vsyncpa [#allocation13], 0 }
   0xd   :  { %32 = vsyncpa [#allocation5], 0  ;;  %s5323_s4 = smov [#allocation6]   ;;  %s5324_s24 = smov [#allocation9]  }
   0xe   :  { %s56_s30 = sshll.u32 %s5323_s4, 4  ;;  %s86_s25 = sshll.u32 %s5324_s24, 4  ;;  %s57_s30 = int_to_ptr.vmem [resolvable:$true] %s56_s30  ;;  %s87_s25 = int_to_ptr.vmem [resolvable:$true] %s86_s25 }
   0xf   :  { %s5161_s5 = scalar_lea.vmem %s57_s30, 256  ;;  %p5166_p1 = scmp.lt.s32.totalorder %s57_s30, %s57_s30 }
  0x10   :  { %p5162_p0 = scmp.ne.s32.totalorder %s57_s30, %s5161_s5  ;;  %p5167_p2 = scmp.lt.s32.totalorder %s5161_s5, %s5161_s5 }
  0x12   :  { %p5168_p3 = por %p5167_p2, %p5166_p1 }
  0x14   :  { %p5169_p4 = pnand %p5168_p3, %p5162_p0 }
  0x16   :  { %5172 = shalt.err (!%p5169_p4)
}
  0x17   :  { %s5325_s1 = smov 128   ;;  %s6132_s26 = smov 8  }
  0x18   :  { %s6142_s27 = sld [smem:[#allocation25_spill]]  ;;  %s5181_s7 = scalar_lea.vmem %s87_s25, 1024 }
  0x19   :  { %p5182_p5 = scmp.ne.s32.totalorder %s87_s25, %s5181_s7  ;;  %p5186_p6 = scmp.lt.s32.totalorder %s87_s25, %s87_s25 }
  0x1a   :  { %p5187_p7 = scmp.lt.s32.totalorder %s5181_s7, %s5181_s7 }
  0x1c   :  { %p5188_p8 = por %p5187_p7, %p5186_p6 }
  0x1e   :  { %62 = dma.hbm_to_vmem [thread:$0]  %s6142_s27, 256, %s57_s30, [#allocation7], %s5325_s1, %s5325_s1, %s6132_s26  }
  0x1f   :  { %p5189_p9 = pnand %p5188_p8, %p5182_p5 }
  0x21   :  { %5192 = shalt.err (!%p5189_p9)
}
  0x22   :  { %92 = dma.hbm_to_vmem [thread:$0]  %s6111_s9, 1024, %s87_s25, [#allocation10], %s5325_s1, %s5325_s1, %s6132_s26  }
  0x23   :  { %s5327_s3 = smov [#allocation12]   ;;  %s5328_s4 = smov [#allocation3]  }
  0x24   :  { %s126_s0 = sshll.u32 %s5327_s3, 4  ;;  %s44_s24 = sshll.u32 %s5328_s4, 4  ;;  %s127_s0 = int_to_ptr.vmem [resolvable:$true] %s126_s0  ;;  %s45_s24 = int_to_ptr.vmem [resolvable:$true] %s44_s24 }
  0x25   :  { %s5201_s30 = scalar_lea.vmem %s127_s0, 512  ;;  %p5206_p11 = scmp.lt.s32.totalorder %s127_s0, %s127_s0 }
  0x26   :  { %p5202_p10 = scmp.ne.s32.totalorder %s127_s0, %s5201_s30  ;;  %p5207_p12 = scmp.lt.s32.totalorder %s5201_s30, %s5201_s30 }
  0x28   :  { %p5208_p13 = por %p5207_p12, %p5206_p11 }
  0x2a   :  { %p5209_p0 = pnand %p5208_p13, %p5202_p10 }
  0x2c   :  { %5212 = shalt.err (!%p5209_p0)
}
  0x2d   :  { %132 = dma.hbm_to_vmem [thread:$0]  %s6121_s19, 512, %s127_s0, [#allocation13], %s5325_s1, %s5325_s1, %s6132_s26  }
  0x2e   :  { %s5221_s9 = scalar_lea.vmem %s45_s24, 2048  ;;  %p5226_p2 = scmp.lt.s32.totalorder %s45_s24, %s45_s24 }
  0x2f   :  { %p5222_p1 = scmp.ne.s32.totalorder %s45_s24, %s5221_s9  ;;  %p5227_p3 = scmp.lt.s32.totalorder %s5221_s9, %s5221_s9 }
  0x31   :  { %p5228_p4 = por %p5227_p3, %p5226_p2 }
  0x33   :  { %p5229_p5 = pnand %p5228_p4, %p5222_p1 }
  0x35   :  { %5232 = shalt.err (!%p5229_p5)
}
  0x36   :  { %s6143_s27 = sld [smem:[#allocation24_spill]]  ;;  %s5329_s7 = smov [#allocation8]  }
  0x37   :  { %s72_s28 = sshll.u32 %s5329_s7, 4  ;;  %s5330_s29 = smov [#allocation11]   ;;  %s73_s28 = int_to_ptr.vmem [resolvable:$true] %s72_s28 }
  0x38   :  { %s108_s3 = sshll.u32 %s5330_s29, 4  ;;  %s5241_s19 = scalar_lea.vmem %s73_s28, 1024  ;;  %s109_s3 = int_to_ptr.vmem [resolvable:$true] %s108_s3 }
  0x39   :  { %p5242_p6 = scmp.ne.s32.totalorder %s73_s28, %s5241_s19  ;;  %p5246_p7 = scmp.lt.s32.totalorder %s73_s28, %s73_s28 }
  0x3a   :  { %p5247_p8 = scmp.lt.s32.totalorder %s5241_s19, %s5241_s19 }
  0x3c   :  { %50 = dma.hbm_to_vmem [thread:$0]  %s6143_s27, 2048, %s45_s24, [#allocation4], %s5325_s1, %s5325_s1, %s6132_s26  }
  0x3d   :  { %p5248_p9 = por %p5247_p8, %p5246_p7 }
  0x3f   :  { %p5249_p10 = pnand %p5248_p9, %p5242_p6 }
  0x41   :  { %5252 = shalt.err (!%p5249_p10)
}
  0x42   :  { %s6144_s30 = sld [smem:[#allocation28_spill]]  ;;  %s5261_s24 = scalar_lea.vmem %s109_s3, 2048 }
  0x43   :  { %p5262_p11 = scmp.ne.s32.totalorder %s109_s3, %s5261_s24  ;;  %p5266_p12 = scmp.lt.s32.totalorder %s109_s3, %s109_s3 }
  0x44   :  { %p5267_p13 = scmp.lt.s32.totalorder %s5261_s24, %s5261_s24 }
  0x46   :  { %p5268_p0 = por %p5267_p13, %p5266_p12 }
  0x48   :  { %78 = dma.hbm_to_vmem [thread:$0]  %s6144_s30, 1024, %s73_s28, [#allocation7], %s5325_s1, %s5325_s1, %s6132_s26  }
  0x49   :  { %p5269_p1 = pnand %p5268_p0, %p5262_p11 }
  0x4b   :  { %5272 = shalt.err (!%p5269_p1)
}
  0x4c   :  { %114 = dma.hbm_to_vmem [thread:$0]  %s6117_s15, 2048, %s109_s3, [#allocation10], %s5325_s1, %s5325_s1, %s6132_s26  }
  0x4d   :  { %s5331_s9 = smov [#allocation14]  }
  0x4e   :  { %s140_s25 = sshll.u32 %s5331_s9, 4  ;;  %s141_s25 = int_to_ptr.vmem [resolvable:$true] %s140_s25 }
  0x4f   :  { %s5281_s6 = scalar_lea.vmem %s141_s25, 512  ;;  %p5286_p3 = scmp.lt.s32.totalorder %s141_s25, %s141_s25 }
  0x50   :  { %p5282_p2 = scmp.ne.s32.totalorder %s141_s25, %s5281_s6  ;;  %p5287_p4 = scmp.lt.s32.totalorder %s5281_s6, %s5281_s6 }
  0x52   :  { %p5288_p5 = por %p5287_p4, %p5286_p3 }
  0x54   :  { %p5289_p6 = pnand %p5288_p5, %p5282_p2 }
  0x56   :  { %5292 = shalt.err (!%p5289_p6)
}
  0x57   :  { %146 = dma.hbm_to_vmem [thread:$0]  %s6123_s21, 512, %s141_s25, [#allocation13], %s5325_s1, %s5325_s1, %s6132_s26  }
  0x58   :  { %5313 = dma.done.wait [#allocation4], 2048  }
  0x59   :  { %5314 = vsyncadd [#allocation4], 4294965248 }
  0x5a   :  { %5315 = dma.done.wait [#allocation7], 1280  }
  0x5b   :  { %5316 = vsyncadd [#allocation7], 4294966016 }
  0x5c   :  { %5317 = dma.done.wait [#allocation10], 3072  }
  0x5d   :  { %5318 = vsyncadd [#allocation10], 4294964224 }
  0x5e   :  { %5319 = dma.done.wait [#allocation13], 1024  }
  0x5f   :  { %5320 = vsyncadd [#allocation13], 4294966272  ;;  %v5332_v0 = vmov 0   ;;  %s6145_s29 = sld [smem:[#allocation22_spill]]  ;;  %v217_v3 = vld [vmem:[#allocation6 + $0x8] sm:$0xff]  ;;  %v216_v5 = vld [vmem:[#allocation6] sm:$0xff]  ;;  %v172_v8 = vlaneseq }
  0x60   :  { %5055 = vset.pattern.permute.xlu0 %v5332_v0  ;;  %5056 = vset.pattern.permute.xlu1 %v5332_v0  ;;  %s6146_s1 = sld [smem:[#allocation21_spill]]  ;;  %v201_v7 = vld [vmem:[#allocation3 + $0x78] sm:$0xff]  ;;  %vm218_vm0 = vcmask 130048   ;;  %v5333_v11 = vmov 0.0   ;;  %v200_v16 = vld [vmem:[#allocation3 + $0x70] sm:$0xff]  ;;  %v199_v17 = vld [vmem:[#allocation3 + $0x68] sm:$0xff] }
  0x61   :  { %4693 = vmatprep.subr.mxu1 %v217_v3  ;;  %v5527_v9 = vand.u32 127, %v172_v8  ;;  %v5334_v18 = vmov 1.0   ;;  %v198_v19 = vld [vmem:[#allocation3 + $0x60] sm:$0xff]  ;;  %v197_v20 = vld [vmem:[#allocation3 + $0x58] sm:$0xff]  ;;  %v196_v21 = vld [vmem:[#allocation3 + $0x50] sm:$0xff]  ;;  %vm377_vm5 = vcmask 261120  }
  0x62   :  { %4694 = vmatpush3.msra.mxu1 %v217_v3  ;;  %v195_v22 = vld [vmem:[#allocation3 + $0x48] sm:$0xff]  ;;  %v194_v23 = vld [vmem:[#allocation3 + $0x40] sm:$0xff]  ;;  %v193_v24 = vld [vmem:[#allocation3 + $0x38] sm:$0xff]  ;;  %s6147_s2 = sld [smem:[#allocation26_spill]]  ;;  %vm5335_vm6 = vmmov 0   ;;  %s5336_s15 = smov 96  }
  0x63   :  { %4695 = vmatprep.subr.mxu1 %v216_v5  ;;  %v192_v25 = vld [vmem:[#allocation3 + $0x30] sm:$0xff]  ;;  %v191_v26 = vld [vmem:[#allocation3 + $0x28] sm:$0xff]  ;;  %v190_v27 = vld [vmem:[#allocation3 + $0x20] sm:$0xff]  ;;  %s6148_s6 = sld [smem:[#allocation27_spill]]  ;;  %s5337_s28 = smov 88   ;;  %vm517_vm7 = vcmask 64512  }
  0x64   :  { %4696 = vmatpush3.msra.mxu1 %v216_v5  ;;  %v189_v28 = vld [vmem:[#allocation3 + $0x18] sm:$0xff]  ;;  %v188_v29 = vld [vmem:[#allocation3 + $0x10] sm:$0xff]  ;;  %v187_v30 = vld [vmem:[#allocation3 + $0x8] sm:$0xff]  ;;  %s5339_s19 = smov 64   ;;  %s5340_s0 = smov 56   ;;  %vm860_vm11 = vcmask 130112  }
  0x65   :  { %v202_v1 = vld [vmem:[%s6145_s29] sm:$0xff]  ;;  %v203_v4 = vld [vmem:[%s6145_s29 + $0x8] sm:$0xff]  ;;  %4700 = vmatprep.subr.mxu1 %v201_v7  ;;  %v186_v31 = vld [vmem:[#allocation3] sm:$0xff]  ;;  %s5338_s29 = smov 120   ;;  %s5341_s4 = smov 112   ;;  %vm1033_vm12 = vcmask 195712  }
  0x66   :  { %205 = vperm.xlu0 %5055, %v202_v1   ;;  %v170_v2 = vld [vmem:[%s6146_s1] sm:$0xff]  ;;  %v171_v6 = vld [vmem:[%s6146_s1 + $0x8] sm:$0xff]  ;;  %v425_v51 = vld [vmem:[#allocation8 + $0x18] sm:$0xff]  ;;  %s6149_s1 = sld [smem:[#allocation23_spill]]  ;;  %s5342_s30 = smov 72   ;;  %vm1206_vm13 = vcmask 261312  }
  0x67   :  { %175 = vperm.xlu1 %5056, %v170_v2   ;;  %v424_v52 = vld [vmem:[#allocation8 + $0x10] sm:$0xff]  ;;  %4735 = vmatprep.subr.mxu0 %v425_v51  ;;  %v423_v53 = vld [vmem:[#allocation8 + $0x8] sm:$0xff]  ;;  %v422_v54 = vld [vmem:[#allocation8] sm:$0xff]  ;;  %s5343_s24 = smov 104   ;;  %s5344_s5 = smov 80   ;;  %vm2161_vm14 = vcmask 523264  }
  0x68   :  { %4736 = vmatpush3.msra.mxu0 %v425_v51  ;;  %v4438_v62 = vld [vmem:[%s6147_s2] ss:$0 sm:$0xff]  ;;  %s5345_s2 = smov 48   ;;  %s5346_s9 = smov 40  }
  0x69   :  { %4737 = vmatprep.subr.mxu0 %v424_v52  ;;  %v4439_v1 = vld [vmem:[%s6148_s6] ss:$0 sm:$0xff]  ;;  %s6130_s25 = smov 16   ;;  %s6128_s6 = smov 24  }
  0x6a   :  { %208 = vperm.xlu0 %5055, %v203_v4   ;;  %4738 = vmatpush3.msra.mxu0 %v424_v52 }
  0x6b   :  { %178 = vperm.xlu1 %5056, %v171_v6   ;;  %4739 = vmatprep.subr.mxu0 %v423_v53 }
  0x6c   :  { %4740 = vmatpush3.msra.mxu0 %v423_v53 }
  0x6d   :  { %4741 = vmatprep.subr.mxu0 %v422_v54 }
  0x6e   :  { %4742 = vmatpush3.msra.mxu0 %v422_v54 }
  0x6f   :  { %4746 = vmatprep.subr.mxu0 %v5333_v11 }
  0xe1   :  { %v206_v10 = vpop.permute.xlu0 %205 }
  0xe2   :  { %vm210_vm1 = vcmp.eq.s32.totalorder %v5527_v9, %v206_v10  ;;  %v176_v14 = vpop.permute.xlu1 %175  ;;  %v4440_v10 = vld [vmem:[%s6110_s8] ss:$0 sm:$0xff] }
  0xe3   :  { %v4432_v12 = vsel %vm210_vm1, 1.0, %v5333_v11  ;;  %vm180_vm3 = vcmp.eq.s32.totalorder %v5527_v9, %v176_v14 }
  0xe4   :  { %4697 = vmatprep.mubr.msk.f32.mxu1 %vm218_vm0, %v4432_v12 }
  0xe5   :  { %v209_v13 = vpop.permute.xlu0 %208 }
  0xe6   :  { %vm211_vm2 = vcmp.eq.s32.totalorder %v5527_v9, %v209_v13  ;;  %v179_v32 = vpop.permute.xlu1 %178 }
  0xe7   :  { %v4433_v15 = vsel %vm211_vm2, 1.0, %v5333_v11  ;;  %vm181_vm4 = vcmp.eq.s32.totalorder %v5527_v9, %v179_v32 }
  0xe8   :  { %4698 = vmatmul.mubr.msk.f32.vlgmr.msra.gmra.mxu1 %vm218_vm0, %v4433_v15 }
  0xe9   :  { %4701 = vmatpush3.msra.mxu1 %v201_v7  ;;  %4732 = vmatprep.mubr.msk.f32.mxu1 %vm180_vm3, %v5334_v18 }
  0xea   :  { %4702 = vmatprep.subr.mxu1 %v200_v16 }
  0xeb   :  { %4703 = vmatpush3.msra.mxu1 %v200_v16 }
  0xec   :  { %4704 = vmatprep.subr.mxu1 %v199_v17 }
  0xed   :  { %4705 = vmatpush3.msra.mxu1 %v199_v17  ;;  %v421_v17 = vld [vmem:[%s6149_s1] sm:$0x3] }
  0xee   :  { %4706 = vmatprep.subr.mxu1 %v198_v19  ;;  %vm593_vm8 = vcmp.gt.f32.partialorder %v421_v17, 0.5 }
  0xef   :  { %4707 = vmatpush3.msra.mxu1 %v198_v19 }
  0xf0   :  { %4708 = vmatprep.subr.mxu1 %v197_v20 }
  0xf1   :  { %4709 = vmatpush3.msra.mxu1 %v197_v20  ;;  %v5588_v20 = vsel %vm593_vm8, 1, %v5332_v0 }
  0xf2   :  { %4710 = vmatprep.subr.mxu1 %v196_v21 }
  0xf3   :  { %4711 = vmatpush3.msra.mxu1 %v196_v21 }
  0xf4   :  { %4712 = vmatprep.subr.mxu1 %v195_v22 }
  0xf5   :  { %4713 = vmatpush3.msra.mxu1 %v195_v22 }
  0xf6   :  { %4714 = vmatprep.subr.mxu1 %v194_v23 }
  0xf7   :  { %4715 = vmatpush3.msra.mxu1 %v194_v23 }
  0xf8   :  { %4716 = vmatprep.subr.mxu1 %v193_v24 }
  0xf9   :  { %4717 = vmatpush3.msra.mxu1 %v193_v24 }
  0xfa   :  { %4718 = vmatprep.subr.mxu1 %v192_v25 }
  0xfb   :  { %4719 = vmatpush3.msra.mxu1 %v192_v25 }
  0xfc   :  { %4720 = vmatprep.subr.mxu1 %v191_v26 }
  0xfd   :  { %4721 = vmatpush3.msra.mxu1 %v191_v26 }
  0xfe   :  { %4722 = vmatprep.subr.mxu1 %v190_v27 }
  0xff   :  { %4723 = vmatpush3.msra.mxu1 %v190_v27 }
 0x100   :  { %4724 = vmatprep.subr.mxu1 %v189_v28 }
 0x101   :  { %4725 = vmatpush3.msra.mxu1 %v189_v28 }
 0x102   :  { %4726 = vmatprep.subr.mxu1 %v188_v29 }
 0x103   :  { %4727 = vmatpush3.msra.mxu1 %v188_v29 }
 0x104   :  { %4728 = vmatprep.subr.mxu1 %v187_v30 }
 0x105   :  { %4729 = vmatpush3.msra.mxu1 %v187_v30 }
 0x106   :  { %4730 = vmatprep.subr.mxu1 %v186_v31 }
 0x107   :  { %4731 = vmatpush3.msra.mxu1 %v186_v31 }
 0x108   :  { %4733 = vmatmul.mubr.msk.f32.vlgmr.msra.gmra.mxu1 %vm181_vm4, %v5334_v18  ;;  %4776 = vmatprep.subr.mxu1 %v5333_v11  ;;  %v5584_v18 = vshrl.u32 %v172_v8, 7 }
 0x109   :  { %4778 = vmatprep.mubr.msk.f32.mxu1 %vm5335_vm6, %v5333_v11 }
 0x10a   :  { %v597_v19 = vsub.s32 0, %v5584_v18 }
 0x10c   :  { %v5591_v21 = vrot.slane %v5588_v20, %v597_v19 }
 0x10e   :  { %vm599_vm9 = vcmp.eq.s32.totalorder %v5591_v21, 1 }
 0x1a8   :  { %v4699_v33 = vpop.f32.mrf.mxu1 }
 0x1aa   :  { %v291_v34 = vpop.f32.mrf.mxu1 }
 0x1c8   :  { %v4734_v35 = vpop.f32.mrf.mxu1 }
 0x1c9   :  { %v372_v36 = vadd.f32 %v4734_v35, %v4699_v33 }
 0x1ca   :  { %v366_v37 = vpop.f32.mrf.mxu1 }
 0x1cb   :  { %v367_v38 = vadd.f32 %v366_v37, %v291_v34  ;;  %v381_v39 = vsel %vm377_vm5, %v372_v36, 0.0 }
 0x1cc   :  { %382 = vadd.xlane.f32.xlu1 %v381_v39 }
 0x1cd   :  { %v378_v40 = vsel %vm377_vm5, %v367_v38, 0.0 }
 0x1ce   :  { %379 = vadd.xlane.f32.xlu0 %v378_v40 }
 0x255   :  { %v383_v41 = vpop.xlane.xlu1 %382 }
 0x256   :  { %v386_v42 = vmul.f32 0.03125, %v383_v41 }
 0x257   :  { %v380_v43 = vpop.xlane.xlu0 %379 }
 0x258   :  { %v385_v44 = vmul.f32 0.03125, %v380_v43  ;;  %v388_v45 = vsub.f32 %v372_v36, %v386_v42 }
 0x25a   :  { %v387_v46 = vsub.f32 %v367_v38, %v385_v44  ;;  %v390_v49 = vmul.f32 %v388_v45, %v388_v45 }
 0x25c   :  { %v389_v47 = vmul.f32 %v387_v46, %v387_v46  ;;  %v394_v50 = vsel %vm377_vm5, %v390_v49, 0.0 }
 0x25e   :  { %v391_v48 = vsel %vm377_vm5, %v389_v47, 0.0 }
 0x25f   :  { %392 = vadd.xlane.f32.xlu0 %v391_v48 }
 0x263   :  { %395 = vadd.xlane.f32.xlu0 %v394_v50 }
 0x2e8   :  { %v393_v55 = vpop.xlane.xlu0 %392 }
 0x2e9   :  { %v397_v56 = vmul.f32 0.03125, %v393_v55 }
 0x2eb   :  { %v399_v57 = vadd.f32 1e-12, %v397_v56 }
 0x2ec   :  { %v396_v58 = vpop.xlane.xlu0 %395 }
 0x2ed   :  { %5057 = vrsqrt.f32 %v399_v57  ;;  %v398_v59 = vmul.f32 0.03125, %v396_v58 }
 0x2ef   :  { %v400_v60 = vadd.f32 1e-12, %v398_v59 }
 0x2f1   :  { %5059 = vrsqrt.f32 %v400_v60 }
 0x2fa   :  { %v5058_v61 = vpop.eup %5057 }
 0x2fb   :  { %v403_v63 = vmul.f32 %v5058_v61, %v387_v46 }
 0x2fd   :  { %v411_v2 = vmul.f32 %v4438_v62, %v403_v63 }
 0x2fe   :  { %v5060_v3 = vpop.eup %5059 }
 0x2ff   :  { %v404_v4 = vmul.f32 %v5060_v3, %v388_v45  ;;  %v5549_v5 = vadd.f32 %v4439_v1, %v411_v2 }
 0x301   :  { %v412_v6 = vmul.f32 %v4438_v62, %v404_v4  ;;  %4743 = vmatprep.mubr.msk.f32.mxu0 %vm377_vm5, %v5549_v5 }
 0x303   :  { %v5553_v7 = vadd.f32 %v4439_v1, %v412_v6 }
 0x305   :  { %4744 = vmatmul.mubr.msk.f32.vlgmr.msra.gmra.mxu0 %vm377_vm5, %v5553_v7 }
 0x306   :  { %4748 = vmatprep.mubr.msk.f32.mxu0 %vm5335_vm6, %v5333_v11 }
 0x3c5   :  { %v4745_v12 = vpop.f32.mrf.mxu0 }
 0x3c6   :  { %v5564_v13 = vadd.f32 %v4745_v12, %v4440_v10 }
 0x3c7   :  { %v505_v14 = vpop.f32.mrf.mxu0 }
 0x3c8   :  { %v5566_v15 = vadd.f32 %v4440_v10, %v505_v14  ;;  %v1288_v10 = vsub.s32 1, %v5584_v18 }
 0x3ca   :  { %515 = vrot.lane.b32.xlu1 %v5566_v15, %s5336_s15  ;;  %v5677_v17 = vrot.slane %v5588_v20, %v1288_v10 }
 0x3cc   :  { %vm1290_vm10 = vcmp.eq.s32.totalorder %v5677_v17, 1 }
 0x3ce   :  { %691 = vrot.lane.b32.xlu1 %v5566_v15, %s5337_s28 }
 0x3d2   :  { %689 = vrot.lane.b32.xlu1 %v5566_v15, %s5338_s29 }
 0x43c   :  { %v516_v16 = vpop.permute.xlu1 %515 }
 0x43d   :  { %4747 = vmatpush3.xpose.msk.msra.mxu0 %vm517_vm7, %v516_v16 }
 0x43e   :  { %4751 = vmatprep.subr.mxu0 %v5333_v11 }
 0x440   :  { %4749 = vmatmul.mubr.msk.f32.vlgmr.msra.gmra.mxu0 %vm517_vm7, %v5566_v15  ;;  %v692_v33 = vpop.permute.xlu1 %691 }
 0x441   :  { %4753 = vmatprep.mubr.msk.f32.mxu0 %vm5335_vm6, %v5333_v11 }
 0x444   :  { %v690_v35 = vpop.permute.xlu1 %689 }
 0x500   :  { %v588_v22 = vpop.f32.mrf.mxu0 }
 0x501   :  { %v592_v23 = vmul.f32 0.35355338, %v588_v22 }
 0x502   :  { %v4750_v24 = vpop.f32.mrf.mxu0 }
 0x503   :  { %v600_v25 = vsel %vm599_vm9, %v592_v23, -1e+09 }
 0x504   :  { %v601_v8 = vsel %vm517_vm7, %v600_v25, -inf }
 0x505   :  { %602 = vmax.xlane.f32.xlu0 %v601_v8 }
 0x58e   :  { %v603_v26 = vpop.xlane.xlu0 %602 }
 0x58f   :  { %v604_v27 = vsub.f32 %v600_v25, %v603_v26 }
 0x591   :  { %v605_v28 = vmul.f32 1.442695, %v604_v27 }
 0x593   :  { %5061 = vpow2.f32 %v605_v28 }
 0x5a0   :  { %v5062_v0 = vpop.eup %5061 }
 0x5a1   :  { %v607_v29 = vsel %vm517_vm7, %v5062_v0, 0.0 }
 0x5a2   :  { %608 = vadd.xlane.f32.xlu0 %v607_v29 }
 0x5b8   :  { %612 = vrot.lane.b32.xlu0 %v5566_v15, %s5339_s19 }
 0x62b   :  { %v609_v30 = vpop.xlane.xlu0 %608 }
 0x62c   :  { %5063 = vrcp.f32 %v609_v30 }
 0x62f   :  { %v613_v31 = vpop.permute.xlu0 %612 }
 0x630   :  { %4752 = vmatpush3.msra.mxu0 %v613_v31 }
 0x631   :  { %4756 = vmatprep.subr.mxu0 %v5333_v11 }
 0x639   :  { %v5064_v32 = vpop.eup %5063 }
 0x63a   :  { %v611_v34 = vmul.f32 %v5064_v32, %v5062_v0 }
 0x63c   :  { %4754 = vmatmul.mubr.msk.f32.vlgmr.msra.gmra.mxu0 %vm517_vm7, %v611_v34 }
 0x63d   :  { %4757 = vmatpush3.xpose.msk.msra.mxu0 %vm517_vm7, %v692_v33  ;;  %4758 = vmatprep.mubr.msk.f32.mxu0 %vm5335_vm6, %v5333_v11 }
 0x63e   :  { %4761 = vmatprep.subr.mxu0 %v5333_v11 }
 0x640   :  { %4759 = vmatmul.mubr.msk.f32.vlgmr.msra.gmra.mxu0 %vm517_vm7, %v690_v35 }
 0x641   :  { %4763 = vmatprep.mubr.msk.f32.mxu0 %vm5335_vm6, %v5333_v11 }
 0x6fc   :  { %v684_v36 = vpop.f32.mrf.mxu0 }
 0x6fd   :  { %688 = vst.msk [vmem:[#allocation2] sm:$0xff] %vm517_vm7, %v684_v36 }
 0x6fe   :  { %v4755_v37 = vpop.f32.mrf.mxu0 }
 0x700   :  { %v763_v38 = vpop.f32.mrf.mxu0 }
 0x701   :  { %v767_v39 = vmul.f32 0.35355338, %v763_v38 }
 0x702   :  { %v4760_v40 = vpop.f32.mrf.mxu0 }
 0x703   :  { %v768_v41 = vsel %vm599_vm9, %v767_v39, -1e+09 }
 0x704   :  { %v769_v42 = vsel %vm517_vm7, %v768_v41, -inf }
 0x705   :  { %770 = vmax.xlane.f32.xlu1 %v769_v42 }
 0x716   :  { %780 = vrot.lane.b32.xlu1 %v5566_v15, %s5340_s0 }
 0x71a   :  { %862 = vrot.lane.b32.xlu1 %v5566_v15, %s5341_s4 }
 0x71e   :  { %1037 = vrot.lane.b32.xlu1 %v5566_v15, %s5342_s30 }
 0x722   :  { %1209 = vrot.lane.b32.xlu1 %v5564_v13, %s5336_s15 }
 0x726   :  { %1380 = vrot.lane.b32.xlu1 %v5564_v13, %s5338_s29 }
 0x72a   :  { %1552 = vrot.lane.b32.xlu1 %v5564_v13, %s5341_s4 }
 0x72e   :  { %1724 = vrot.lane.b32.xlu1 %v5564_v13, %s5343_s24 }
 0x78e   :  { %v771_v43 = vpop.xlane.xlu1 %770 }
 0x78f   :  { %v772_v44 = vsub.f32 %v768_v41, %v771_v43 }
 0x791   :  { %v773_v45 = vmul.f32 1.442695, %v772_v44 }
 0x792   :  { %v781_v46 = vpop.permute.xlu1 %780 }
 0x793   :  { %5065 = vpow2.f32 %v773_v45  ;;  %4762 = vmatpush3.msra.mxu0 %v781_v46 }
 0x794   :  { %4766 = vmatprep.subr.mxu0 %v5333_v11 }
 0x796   :  { %v863_v47 = vpop.permute.xlu1 %862 }
 0x79a   :  { %v1038_v48 = vpop.permute.xlu1 %1037 }
 0x79b   :  { %4777 = vmatpush3.xpose.msk.msra.mxu1 %vm517_vm7, %v1038_v48 }
 0x79c   :  { %4786 = vmatprep.subr.mxu1 %v5333_v11 }
 0x79e   :  { %v1210_v53 = vpop.permute.xlu1 %1209 }
 0x7a0   :  { %v5066_v49 = vpop.eup %5065 }
 0x7a1   :  { %v775_v50 = vsel %vm517_vm7, %v5066_v49, 0.0 }
 0x7a2   :  { %776 = vadd.xlane.f32.xlu0 %v775_v50  ;;  %v1381_v55 = vpop.permute.xlu1 %1380 }
 0x7a6   :  { %v1553_v60 = vpop.permute.xlu1 %1552 }
 0x7aa   :  { %v1725_v62 = vpop.permute.xlu1 %1724 }
 0x7b8   :  { %864 = vrot.lane.b32.xlu0 %v5566_v15, %s5344_s5 }
 0x7bc   :  { %1035 = vrot.lane.b32.xlu0 %v5566_v15, %s5343_s24 }
 0x7c0   :  { %1382 = vrot.lane.b32.xlu0 %v5564_v13, %s5337_s28 }
 0x7c4   :  { %1554 = vrot.lane.b32.xlu0 %v5564_v13, %s5344_s5 }
 0x7c8   :  { %1726 = vrot.lane.b32.xlu0 %v5564_v13, %s5342_s30 }
 0x82b   :  { %v777_v51 = vpop.xlane.xlu0 %776 }
 0x82c   :  { %5067 = vrcp.f32 %v777_v51 }
 0x82f   :  { %v865_v52 = vpop.permute.xlu0 %864 }
 0x833   :  { %v1036_v54 = vpop.permute.xlu0 %1035 }
 0x834   :  { %4779 = vmatmul.mubr.msk.f32.vlgmr.msra.gmra.mxu1 %vm517_vm7, %v1036_v54 }
 0x835   :  { %4787 = vmatpush3.xpose.msk.msra.mxu1 %vm517_vm7, %v1210_v53  ;;  %4788 = vmatprep.mubr.msk.f32.mxu1 %vm5335_vm6, %v5333_v11 }
 0x836   :  { %4796 = vmatprep.subr.mxu1 %v5333_v11 }
 0x837   :  { %v1383_v56 = vpop.permute.xlu0 %1382 }
 0x838   :  { %4789 = vmatmul.mubr.msk.f32.vlgmr.msra.gmra.mxu1 %vm517_vm7, %v5564_v13 }
 0x839   :  { %v5068_v57 = vpop.eup %5067  ;;  %4797 = vmatpush3.xpose.msk.msra.mxu1 %vm517_vm7, %v1383_v56  ;;  %4798 = vmatprep.mubr.msk.f32.mxu1 %vm5335_vm6, %v5333_v11 }
 0x83a   :  { %4806 = vmatprep.subr.mxu1 %v5333_v11  ;;  %v779_v58 = vmul.f32 %v5068_v57, %v5066_v49 }
 0x83b   :  { %v1555_v59 = vpop.permute.xlu0 %1554 }
 0x83c   :  { %4764 = vmatmul.mubr.msk.f32.vlgmr.msra.gmra.mxu0 %vm517_vm7, %v779_v58  ;;  %4799 = vmatmul.mubr.msk.f32.vlgmr.msra.gmra.mxu1 %vm517_vm7, %v1381_v55 }
 0x83d   :  { %4767 = vmatpush3.xpose.msk.msra.mxu0 %vm517_vm7, %v865_v52  ;;  %4807 = vmatpush3.xpose.msk.msra.mxu1 %vm517_vm7, %v1555_v59 }
 0x83e   :  { %4768 = vmatprep.mubr.msk.f32.mxu0 %vm5335_vm6, %v5333_v11  ;;  %4808 = vmatprep.mubr.msk.f32.mxu1 %vm5335_vm6, %v5333_v11 }
 0x83f   :  { %v1727_v61 = vpop.permute.xlu0 %1726  ;;  %4816 = vmatprep.subr.mxu1 %v5333_v11  ;;  %4771 = vmatprep.subr.mxu0 %v5333_v11 }
 0x840   :  { %4769 = vmatmul.mubr.msk.f32.vlgmr.msra.gmra.mxu0 %vm517_vm7, %v863_v47  ;;  %4809 = vmatmul.mubr.msk.f32.vlgmr.msra.gmra.mxu1 %vm517_vm7, %v1553_v60 }
 0x841   :  { %4817 = vmatpush3.xpose.msk.msra.mxu1 %vm517_vm7, %v1727_v61  ;;  %4818 = vmatprep.mubr.msk.f32.mxu1 %vm5335_vm6, %v5333_v11 }
 0x842   :  { %4773 = vmatprep.mubr.msk.f32.mxu0 %vm5335_vm6, %v5333_v11 }
 0x844   :  { %4819 = vmatmul.mubr.msk.f32.vlgmr.msra.gmra.mxu1 %vm517_vm7, %v1725_v62 }
 0x8f4   :  { %v1109_v63 = vpop.f32.mrf.mxu1 }
 0x8f5   :  { %v1113_v1 = vmul.f32 0.35355338, %v1109_v63 }
 0x8f6   :  { %v4780_v2 = vpop.f32.mrf.mxu1 }
 0x8f7   :  { %v1114_v3 = vsel %vm599_vm9, %v1113_v1, -1e+09 }
 0x8f8   :  { %v1281_v4 = vpop.f32.mrf.mxu1  ;;  %v1115_v6 = vsel %vm517_vm7, %v1114_v3, -inf }
 0x8f9   :  { %1116 = vmax.xlane.f32.xlu1 %v1115_v6  ;;  %v1285_v25 = vmul.f32 0.35355338, %v1281_v4 }
 0x8fa   :  { %v4790_v12 = vpop.f32.mrf.mxu1 }
 0x8fb   :  { %v1291_v33 = vsel %vm1290_vm10, %v1285_v25, -1e+09 }
 0x8fc   :  { %v5674_v14 = vpop.f32.mrf.mxu0  ;;  %v1454_v16 = vpop.f32.mrf.mxu1  ;;  %v1292_v35 = vsel %vm517_vm7, %v1291_v33, -inf }
 0x8fd   :  { %v1458_v32 = vmul.f32 0.35355338, %v1454_v16 }
 0x8fe   :  { %v4765_v19 = vpop.f32.mrf.mxu0  ;;  %v4800_v22 = vpop.f32.mrf.mxu1 }
 0x8ff   :  { %v1459_v37 = vsel %vm1290_vm10, %v1458_v32, -1e+09 }
 0x900   :  { %v936_v23 = vpop.f32.mrf.mxu0  ;;  %v1626_v24 = vpop.f32.mrf.mxu1  ;;  %v1460_v38 = vsel %vm517_vm7, %v1459_v37, -inf }
 0x901   :  { %v940_v8 = vmul.f32 0.35355338, %v936_v23  ;;  %v1630_v26 = vmul.f32 0.35355338, %v1626_v24 }
 0x902   :  { %v4770_v27 = vpop.f32.mrf.mxu0  ;;  %v4810_v28 = vpop.f32.mrf.mxu1 }
 0x903   :  { %v1631_v0 = vsel %vm1290_vm10, %v1630_v26, -1e+09  ;;  %v941_v29 = vsel %vm599_vm9, %v940_v8, -1e+09 }
 0x904   :  { %v1798_v30 = vpop.f32.mrf.mxu1  ;;  %v1632_v20 = vsel %vm517_vm7, %v1631_v0, -inf  ;;  %v942_v31 = vsel %vm517_vm7, %v941_v29, -inf }
 0x905   :  { %1633 = vmax.xlane.f32.xlu1 %v1632_v20  ;;  %943 = vmax.xlane.f32.xlu0 %v942_v31  ;;  %v1802_v36 = vmul.f32 0.35355338, %v1798_v30 }
 0x906   :  { %v4820_v34 = vpop.f32.mrf.mxu1 }
 0x907   :  { %v1803_v39 = vsel %vm1290_vm10, %v1802_v36, -1e+09 }
 0x908   :  { %v1804_v40 = vsel %vm517_vm7, %v1803_v39, -inf }
 0x909   :  { %1293 = vmax.xlane.f32.xlu0 %v1292_v35 }
 0x90d   :  { %1461 = vmax.xlane.f32.xlu0 %v1460_v38 }
 0x911   :  { %1805 = vmax.xlane.f32.xlu0 %v1804_v40 }
 0x982   :  { %v1117_v41 = vpop.xlane.xlu1 %1116 }
 0x983   :  { %v1118_v42 = vsub.f32 %v1114_v3, %v1117_v41 }
 0x985   :  { %v1119_v43 = vmul.f32 1.442695, %v1118_v42 }
 0x987   :  { %5069 = vpow2.f32 %v1119_v43 }
 0x98e   :  { %v1634_v44 = vpop.xlane.xlu1 %1633  ;;  %v944_v45 = vpop.xlane.xlu0 %943 }
 0x98f   :  { %v1635_v46 = vsub.f32 %v1631_v0, %v1634_v44  ;;  %v945_v4 = vsub.f32 %v941_v29, %v944_v45  ;;  %v1901_v44 = vld [vmem:[#allocation9 + $0x18] sm:$0xff]  ;;  %v1900_v45 = vld [vmem:[#allocation9 + $0x10] sm:$0xff] }
 0x990   :  { %4826 = vmatprep.subr.mxu1 %v1901_v44 }
 0x991   :  { %v1636_v50 = vmul.f32 1.442695, %v1635_v46  ;;  %v946_v6 = vmul.f32 1.442695, %v945_v4  ;;  %4827 = vmatpush3.msra.mxu1 %v1901_v44  ;;  %v2151_v44 = vld [vmem:[#allocation11 + $0x28] sm:$0xff] }
 0x992   :  { %v1294_v47 = vpop.xlane.xlu0 %1293  ;;  %4828 = vmatprep.subr.mxu1 %v1900_v45 }
 0x993   :  { %v1295_v48 = vsub.f32 %v1291_v33, %v1294_v47  ;;  %v1899_v47 = vld [vmem:[#allocation9 + $0x8] sm:$0xff]  ;;  %4829 = vmatpush3.msra.mxu1 %v1900_v45  ;;  %v2150_v45 = vld [vmem:[#allocation11 + $0x20] sm:$0xff] }
 0x994   :  { %v5695_v49 = vpop.eup %5069  ;;  %4830 = vmatprep.subr.mxu1 %v1899_v47 }
 0x995   :  { %v1296_v51 = vmul.f32 1.442695, %v1295_v48  ;;  %v1121_v52 = vsel %vm517_vm7, %v5695_v49, 0.0  ;;  %4831 = vmatpush3.msra.mxu1 %v1899_v47  ;;  %v2148_v47 = vld [vmem:[#allocation11 + $0x10] sm:$0xff] }
 0x996   :  { %1122 = vadd.xlane.f32.xlu0 %v1121_v52  ;;  %v1462_v53 = vpop.xlane.xlu0 %1461 }
 0x997   :  { %5071 = vpow2.f32 %v1296_v51  ;;  %v1463_v54 = vsub.f32 %v1459_v37, %v1462_v53 }
 0x998   :  { %5073 = vpow2.f32 %v1636_v50 }
 0x999   :  { %v1464_v55 = vmul.f32 1.442695, %v1463_v54 }
 0x99a   :  { %v1806_v56 = vpop.xlane.xlu0 %1805 }
 0x99b   :  { %5075 = vpow2.f32 %v1464_v55  ;;  %v1807_v57 = vsub.f32 %v1803_v39, %v1806_v56 }
 0x99d   :  { %v1808_v58 = vmul.f32 1.442695, %v1807_v57 }
 0x99f   :  { %5077 = vpow2.f32 %v1808_v58 }
 0x9a0   :  { %5079 = vpow2.f32 %v946_v6 }
 0x9a4   :  { %v5072_v59 = vpop.eup %5071 }
 0x9a5   :  { %v1298_v60 = vsel %vm517_vm7, %v5072_v59, 0.0  ;;  %v5700_v61 = vpop.eup %5073 }
 0x9a6   :  { %1299 = vadd.xlane.f32.xlu1 %v1298_v60  ;;  %v1638_v63 = vsel %vm517_vm7, %v5700_v61, 0.0 }
 0x9a8   :  { %v5702_v62 = vpop.eup %5075 }
 0x9a9   :  { %v1466_v1 = vsel %vm517_vm7, %v5702_v62, 0.0 }
 0x9aa   :  { %1639 = vadd.xlane.f32.xlu1 %v1638_v63  ;;  %1467 = vadd.xlane.f32.xlu0 %v1466_v1 }
 0x9ac   :  { %v5708_v2 = vpop.eup %5077 }
 0x9ad   :  { %v1810_v3 = vsel %vm517_vm7, %v5708_v2, 0.0  ;;  %v5080_v10 = vpop.eup %5079 }
 0x9ae   :  { %1811 = vadd.xlane.f32.xlu0 %v1810_v3  ;;  %v948_v12 = vsel %vm517_vm7, %v5080_v10, 0.0 }
 0x9bb   :  { %953 = vrot.lane.b32.xlu1 %v5566_v15, %s5345_s2 }
 0x9c4   :  { %1126 = vrot.lane.b32.xlu0 %v5566_v15, %s5346_s9 }
 0x9c8   :  { %1643 = vrot.lane.b32.xlu0 %v5564_v13, %s5345_s2 }
 0x9cc   :  { %857 = vrot.lane.b32.xlu0 %v5674_v14, %s6132_s26 }
 0x9df   :  { %949 = vadd.xlane.f32.xlu1 %v948_v12 }
 0x9f0   :  { %1303 = vrot.lane.b32.xlu1 %v5564_v13, %s5339_s19 }
 0x9f4   :  { %1471 = vrot.lane.b32.xlu1 %v5564_v13, %s5340_s0 }
 0x9f8   :  { %1815 = vrot.lane.b32.xlu1 %v5564_v13, %s5346_s9 }
 0xa1f   :  { %v1123_v15 = vpop.xlane.xlu0 %1122 }
 0xa2f   :  { %v1300_v16 = vpop.xlane.xlu1 %1299 }
 0xa33   :  { %v1640_v19 = vpop.xlane.xlu1 %1639  ;;  %v1468_v22 = vpop.xlane.xlu0 %1467 }
 0xa37   :  { %v954_v23 = vpop.permute.xlu1 %953  ;;  %v1812_v14 = vpop.xlane.xlu0 %1811 }
 0xa38   :  { %4772 = vmatpush3.msra.mxu0 %v954_v23 }
 0xa39   :  { %4781 = vmatprep.subr.mxu0 %v5333_v11 }
 0xa3b   :  { %v1127_v24 = vpop.permute.xlu0 %1126 }
 0xa3f   :  { %v1644_v25 = vpop.permute.xlu0 %1643 }
 0xa43   :  { %v858_v8 = vpop.permute.xlu0 %857 }
 0xa44   :  { %861 = vst.msk [vmem:[#allocation2] sm:$0xff] %vm860_vm11, %v858_v8 }
 0xa68   :  { %v950_v26 = vpop.xlane.xlu1 %949 }
 0xa69   :  { %5081 = vrcp.f32 %v950_v26  ;;  %v2038_v26 = vld [vmem:[%s6115_s13 + $0x10] sm:$0xff] }
 0xa6a   :  { %5083 = vrcp.f32 %v1123_v15 }
 0xa6b   :  { %5085 = vrcp.f32 %v1300_v16 }
 0xa6c   :  { %5087 = vrcp.f32 %v1468_v22  ;;  %v1304_v0 = vpop.permute.xlu1 %1303 }
 0xa6d   :  { %5089 = vrcp.f32 %v1640_v19 }
 0xa6e   :  { %5091 = vrcp.f32 %v1812_v14 }
 0xa70   :  { %v1472_v32 = vpop.permute.xlu1 %1471 }
 0xa74   :  { %v1816_v37 = vpop.permute.xlu1 %1815 }
 0xa76   :  { %v5082_v13 = vpop.eup %5081 }
 0xa77   :  { %v952_v27 = vmul.f32 %v5082_v13, %v5080_v10  ;;  %v5084_v28 = vpop.eup %5083  ;;  %v2037_v13 = vld [vmem:[%s6115_s13 + $0x8] sm:$0xff] }
 0xa78   :  { %v1125_v29 = vmul.f32 %v5084_v28, %v5695_v49  ;;  %v5086_v30 = vpop.eup %5085  ;;  %v1898_v49 = vld [vmem:[#allocation9] sm:$0xff] }
 0xa79   :  { %4774 = vmatmul.mubr.msk.f32.vlgmr.msra.gmra.mxu0 %vm517_vm7, %v952_v27  ;;  %v1302_v20 = vmul.f32 %v5086_v30, %v5072_v59  ;;  %v5088_v31 = vpop.eup %5087  ;;  %4832 = vmatprep.subr.mxu1 %v1898_v49  ;;  %v2036_v27 = vld [vmem:[%s6115_s13] sm:$0xff] }
 0xa7a   :  { %4782 = vmatpush3.msra.mxu0 %v1127_v24  ;;  %4783 = vmatprep.mubr.msk.f32.mxu0 %vm5335_vm6, %v5333_v11  ;;  %v1470_v33 = vmul.f32 %v5088_v31, %v5702_v62  ;;  %v5090_v34 = vpop.eup %5089  ;;  %v4467_v62 = vld [vmem:[%s6112_s10] ss:$0 sm:$0xff] }
 0xa7b   :  { %4791 = vmatprep.subr.mxu0 %v5333_v11  ;;  %v1642_v35 = vmul.f32 %v5090_v34, %v5700_v61  ;;  %v5092_v36 = vpop.eup %5091  ;;  %4833 = vmatpush3.msra.mxu1 %v1898_v49  ;;  %v2146_v49 = vld [vmem:[#allocation11] sm:$0xff] }
 0xa7c   :  { %v1814_v38 = vmul.f32 %v5092_v36, %v5708_v2 }
 0xa7d   :  { %4784 = vmatmul.mubr.msk.f32.vlgmr.msra.gmra.mxu0 %vm517_vm7, %v1125_v29 }
 0xa7e   :  { %4792 = vmatpush3.msra.mxu0 %v1304_v0  ;;  %4793 = vmatprep.mubr.msk.f32.mxu0 %vm5335_vm6, %v5333_v11 }
 0xa7f   :  { %4801 = vmatprep.subr.mxu0 %v5333_v11 }
 0xa81   :  { %4794 = vmatmul.mubr.msk.f32.vlgmr.msra.gmra.mxu0 %vm517_vm7, %v1302_v20 }
 0xa82   :  { %4802 = vmatpush3.msra.mxu0 %v1472_v32  ;;  %4803 = vmatprep.mubr.msk.f32.mxu0 %vm5335_vm6, %v5333_v11 }
 0xa83   :  { %4811 = vmatprep.subr.mxu0 %v5333_v11 }
 0xa85   :  { %4804 = vmatmul.mubr.msk.f32.vlgmr.msra.gmra.mxu0 %vm517_vm7, %v1470_v33  ;;  %v4470_v33 = vld [vmem:[%s6113_s11] ss:$0 sm:$0xff] }
 0xa86   :  { %4812 = vmatpush3.msra.mxu0 %v1644_v25  ;;  %4813 = vmatprep.mubr.msk.f32.mxu0 %vm5335_vm6, %v5333_v11 }
 0xa87   :  { %4821 = vmatprep.subr.mxu0 %v5333_v11 }
 0xa89   :  { %4814 = vmatmul.mubr.msk.f32.vlgmr.msra.gmra.mxu0 %vm517_vm7, %v1642_v35  ;;  %v4471_v35 = vld [vmem:[%s6114_s12] ss:$0 sm:$0xff] }
 0xa8a   :  { %4822 = vmatpush3.msra.mxu0 %v1816_v37  ;;  %4823 = vmatprep.mubr.msk.f32.mxu0 %vm5335_vm6, %v5333_v11 }
 0xa8d   :  { %4824 = vmatmul.mubr.msk.f32.vlgmr.msra.gmra.mxu0 %vm517_vm7, %v1814_v38 }
 0xb39   :  { %v1025_v39 = vpop.f32.mrf.mxu0 }
 0xb3a   :  { %1030 = vrot.lane.b32.xlu1 %v1025_v39, %s6130_s25 }
 0xb3b   :  { %v4775_v40 = vpop.f32.mrf.mxu0 }
 0xb3d   :  { %v1198_v41 = vpop.f32.mrf.mxu0 }
 0xb3e   :  { %1203 = vrot.lane.b32.xlu1 %v1198_v41, %s6128_s6 }
 0xb3f   :  { %v4785_v42 = vpop.f32.mrf.mxu0 }
 0xb40   :  { %v2153_v42 = vld [vmem:[#allocation11 + $0x38] sm:$0xff] }
 0xb41   :  { %v1375_v43 = vpop.f32.mrf.mxu0  ;;  %4848 = vmatprep.subr.mxu1 %v2153_v42 }
 0xb42   :  { %1379 = vst.msk [vmem:[#allocation2 + $0x8] sm:$0xff] %vm517_vm7, %v1375_v43  ;;  %v2152_v43 = vld [vmem:[#allocation11 + $0x30] sm:$0xff] }
 0xb43   :  { %v4795_v46 = vpop.f32.mrf.mxu0 }
 0xb44   :  { %v2149_v46 = vld [vmem:[#allocation11 + $0x18] sm:$0xff] }
 0xb45   :  { %v1543_v48 = vpop.f32.mrf.mxu0 }
 0xb46   :  { %1548 = vrot.lane.b32.xlu0 %v1543_v48, %s6132_s26  ;;  %v2147_v48 = vld [vmem:[#allocation11 + $0x8] sm:$0xff] }
 0xb47   :  { %v4805_v50 = vpop.f32.mrf.mxu0 }
 0xb48   :  { %v4472_v50 = vld [vmem:[%s6116_s14] ss:$0 sm:$0xff] }
 0xb49   :  { %v1715_v51 = vpop.f32.mrf.mxu0 }
 0xb4a   :  { %1720 = vrot.lane.b32.xlu0 %v1715_v51, %s6130_s25 }
 0xb4b   :  { %v4815_v52 = vpop.f32.mrf.mxu0 }
 0xb4d   :  { %v1887_v53 = vpop.f32.mrf.mxu0 }
 0xb4e   :  { %1892 = vrot.lane.b32.xlu1 %v1887_v53, %s6128_s6 }
 0xb4f   :  { %v4825_v54 = vpop.f32.mrf.mxu0 }
 0xbac   :  { %v1031_v55 = vpop.permute.xlu1 %1030 }
 0xbad   :  { %1034 = vst.msk [vmem:[#allocation2] sm:$0xff] %vm1033_vm12, %v1031_v55 }
 0xbb0   :  { %v1204_v56 = vpop.permute.xlu1 %1203 }
 0xbb1   :  { %1207 = vst.msk [vmem:[#allocation2] sm:$0xff] %vm1206_vm13, %v1204_v56 }
 0xbb8   :  { %v1549_v57 = vpop.permute.xlu0 %1548  ;;  %v1896_v58 = vld [vmem:[#allocation2] sm:$0xff] }
 0xbb9   :  { %1551 = vst.msk [vmem:[#allocation2 + $0x8] sm:$0xff] %vm860_vm11, %v1549_v57  ;;  %4834 = vmatprep.mubr.msk.f32.mxu1 %vm377_vm5, %v1896_v58 }
 0xbbc   :  { %v1721_v59 = vpop.permute.xlu0 %1720 }
 0xbbd   :  { %1723 = vst.msk [vmem:[#allocation2 + $0x8] sm:$0xff] %vm1033_vm12, %v1721_v59 }
 0xbc0   :  { %v1893_v60 = vpop.permute.xlu1 %1892 }
 0xbc1   :  { %1895 = vst.msk [vmem:[#allocation2 + $0x8] sm:$0xff] %vm1206_vm13, %v1893_v60 }
 0xbc8   :  { %v1897_v61 = vld [vmem:[#allocation2 + $0x8] sm:$0xff] }
 0xbc9   :  { %4835 = vmatmul.mubr.msk.f32.vlgmr.msra.gmra.mxu1 %vm377_vm5, %v1897_v61 }
 0xbca   :  { %4849 = vmatpush3.msra.mxu1 %v2153_v42 }
 0xbcb   :  { %4850 = vmatprep.subr.mxu1 %v2152_v43 }
 0xbcc   :  { %4851 = vmatpush3.msra.mxu1 %v2152_v43 }
 0xbcd   :  { %4852 = vmatprep.subr.mxu1 %v2151_v44 }
 0xbce   :  { %4853 = vmatpush3.msra.mxu1 %v2151_v44  ;;  %v4478_v44 = vld [vmem:[%s6119_s17] ss:$0 sm:$0xff] }
 0xbcf   :  { %4854 = vmatprep.subr.mxu1 %v2150_v45 }
 0xbd0   :  { %4855 = vmatpush3.msra.mxu1 %v2150_v45 }
 0xbd1   :  { %4856 = vmatprep.subr.mxu1 %v2149_v46 }
 0xbd2   :  { %4857 = vmatpush3.msra.mxu1 %v2149_v46 }
 0xbd3   :  { %4858 = vmatprep.subr.mxu1 %v2148_v47 }
 0xbd4   :  { %4859 = vmatpush3.msra.mxu1 %v2148_v47 }
 0xbd5   :  { %4860 = vmatprep.subr.mxu1 %v2147_v48 }
 0xbd6   :  { %4861 = vmatpush3.msra.mxu1 %v2147_v48 }
 0xbd7   :  { %4862 = vmatprep.subr.mxu1 %v2146_v49 }
 0xbd8   :  { %4863 = vmatpush3.msra.mxu1 %v2146_v49  ;;  %v4479_v49 = vld [vmem:[%s6120_s18] ss:$0 sm:$0xff] }
 0xbd9   :  { %4888 = vmatprep.subr.mxu1 %v5333_v11 }
 0xc89   :  { %v4836_v63 = vpop.f32.mrf.mxu1 }
 0xc8a   :  { %v1987_v1 = vadd.f32 %v4836_v63, %v4467_v62 }
 0xc8b   :  { %v1981_v2 = vpop.f32.mrf.mxu1 }
 0xc8c   :  { %v1982_v3 = vadd.f32 %v4467_v62, %v1981_v2  ;;  %v1991_v4 = vadd.f32 %v1987_v1, %v5553_v7 }
 0xc8e   :  { %v1997_v6 = vsel %vm377_vm5, %v1991_v4, 0.0  ;;  %v1990_v10 = vadd.f32 %v1982_v3, %v5549_v5  ;;  %v2039_v5 = vld [vmem:[%s6115_s13 + $0x18] sm:$0xff] }
 0xc8f   :  { %1998 = vadd.xlane.f32.xlu1 %v1997_v6  ;;  %4837 = vmatprep.subr.mxu0 %v2039_v5 }
 0xc90   :  { %v1994_v12 = vsel %vm377_vm5, %v1990_v10, 0.0  ;;  %4838 = vmatpush3.msra.mxu0 %v2039_v5 }
 0xc91   :  { %1995 = vadd.xlane.f32.xlu0 %v1994_v12  ;;  %4839 = vmatprep.subr.mxu0 %v2038_v26 }
 0xc92   :  { %4840 = vmatpush3.msra.mxu0 %v2038_v26 }
 0xc93   :  { %4841 = vmatprep.subr.mxu0 %v2037_v13 }
 0xc94   :  { %4842 = vmatpush3.msra.mxu0 %v2037_v13 }
 0xc95   :  { %4843 = vmatprep.subr.mxu0 %v2036_v27 }
 0xc96   :  { %4844 = vmatpush3.msra.mxu0 %v2036_v27 }
 0xd18   :  { %v1999_v15 = vpop.xlane.xlu1 %1998 }
 0xd19   :  { %v2001_v16 = vmul.f32 0.03125, %v1999_v15 }
 0xd1a   :  { %v1996_v19 = vpop.xlane.xlu0 %1995 }
 0xd1b   :  { %v2000_v22 = vmul.f32 0.03125, %v1996_v19  ;;  %v2003_v23 = vsub.f32 %v1991_v4, %v2001_v16  ;;  %v4475_v19 = vld [vmem:[%s6118_s16] ss:$0 sm:$0xff] }
 0xd1d   :  { %v2002_v14 = vsub.f32 %v1990_v10, %v2000_v22  ;;  %v2005_v8 = vmul.f32 %v2003_v23, %v2003_v23 }
 0xd1f   :  { %v2004_v24 = vmul.f32 %v2002_v14, %v2002_v14  ;;  %v2009_v7 = vsel %vm377_vm5, %v2005_v8, 0.0 }
 0xd21   :  { %v2006_v25 = vsel %vm377_vm5, %v2004_v24, 0.0 }
 0xd22   :  { %2007 = vadd.xlane.f32.xlu0 %v2006_v25 }
 0xd26   :  { %2010 = vadd.xlane.f32.xlu0 %v2009_v7 }
 0xdab   :  { %v2008_v28 = vpop.xlane.xlu0 %2007 }
 0xdac   :  { %v2012_v0 = vmul.f32 0.03125, %v2008_v28 }
 0xdae   :  { %v2014_v29 = vadd.f32 1e-12, %v2012_v0 }
 0xdaf   :  { %v2011_v30 = vpop.xlane.xlu0 %2010 }
 0xdb0   :  { %5093 = vrsqrt.f32 %v2014_v29  ;;  %v2013_v20 = vmul.f32 0.03125, %v2011_v30 }
 0xdb2   :  { %v2015_v31 = vadd.f32 1e-12, %v2013_v20 }
 0xdb4   :  { %5095 = vrsqrt.f32 %v2015_v31 }
 0xdbd   :  { %v5094_v32 = vpop.eup %5093 }
 0xdbe   :  { %v2018_v34 = vmul.f32 %v5094_v32, %v2002_v14 }
 0xdc0   :  { %v2026_v36 = vmul.f32 %v4470_v33, %v2018_v34  ;;  %v2292_v34 = vld [vmem:[#allocation8 + $0x30] sm:$0xff] }
 0xdc1   :  { %v5096_v37 = vpop.eup %5095 }
 0xdc2   :  { %v2019_v38 = vmul.f32 %v5096_v37, %v2003_v23  ;;  %v5793_v39 = vadd.f32 %v4471_v35, %v2026_v36  ;;  %v2290_v36 = vld [vmem:[#allocation8 + $0x20] sm:$0xff] }
 0xdc4   :  { %v2027_v40 = vmul.f32 %v4470_v33, %v2019_v38  ;;  %4845 = vmatprep.mubr.msk.f32.mxu0 %vm377_vm5, %v5793_v39  ;;  %v2293_v33 = vld [vmem:[#allocation8 + $0x38] sm:$0xff] }
 0xdc5   :  { %4867 = vmatprep.subr.mxu0 %v2293_v33 }
 0xdc6   :  { %v2035_v41 = vadd.f32 %v4471_v35, %v2027_v40  ;;  %v2291_v35 = vld [vmem:[#allocation8 + $0x28] sm:$0xff] }
 0xdc8   :  { %4846 = vmatmul.mubr.msk.f32.vlgmr.msra.gmra.mxu0 %vm377_vm5, %v2035_v41 }
 0xdc9   :  { %4868 = vmatpush3.msra.mxu0 %v2293_v33 }
 0xdca   :  { %4869 = vmatprep.subr.mxu0 %v2292_v34 }
 0xdcb   :  { %4870 = vmatpush3.msra.mxu0 %v2292_v34 }
 0xdcc   :  { %4871 = vmatprep.subr.mxu0 %v2291_v35 }
 0xdcd   :  { %4872 = vmatpush3.msra.mxu0 %v2291_v35 }
 0xdce   :  { %4873 = vmatprep.subr.mxu0 %v2290_v36 }
 0xdcf   :  { %4874 = vmatpush3.msra.mxu0 %v2290_v36 }
 0xdd0   :  { %4878 = vmatprep.subr.mxu0 %v5333_v11 }
 0xe88   :  { %v4847_v51 = vpop.f32.mrf.mxu0 }
 0xe89   :  { %v2125_v52 = vadd.f32 %v4847_v51, %v4472_v50 }
 0xe8a   :  { %v2119_v53 = vpop.f32.mrf.mxu0 }
 0xe8b   :  { %v2131_v54 = vmul.f32 0.044715, %v2125_v52  ;;  %v2120_v55 = vadd.f32 %v4472_v50, %v2119_v53  ;;  %v2129_v12 = vmul.f32 0.5, %v2125_v52 }
 0xe8d   :  { %v2133_v56 = vmul.f32 %v2131_v54, %v2125_v52  ;;  %v2130_v57 = vmul.f32 0.044715, %v2120_v55  ;;  %v2128_v6 = vmul.f32 0.5, %v2120_v55  ;;  %v4481_v54 = vld [vmem:[%s6110_s8 + $0x1] ss:$0 sm:$0xff]  ;;  %s6150_s8 = smov 8  }
 0xe8f   :  { %v2135_v58 = vmul.f32 %v2133_v56, %v2125_v52  ;;  %v2132_v59 = vmul.f32 %v2130_v57, %v2120_v55 }
 0xe91   :  { %v2137_v60 = vadd.f32 %v2135_v58, %v2125_v52  ;;  %v2134_v61 = vmul.f32 %v2132_v59, %v2120_v55 }
 0xe93   :  { %v2139_v62 = vmul.f32 0.7978846, %v2137_v60  ;;  %v2136_v63 = vadd.f32 %v2134_v61, %v2120_v55 }
 0xe95   :  { %5097 = vtanh.f32 %v2139_v62  ;;  %v2138_v1 = vmul.f32 0.7978846, %v2136_v63 }
 0xe97   :  { %5099 = vtanh.f32 %v2138_v1 }
 0xea2   :  { %v5098_v2 = vpop.eup %5097 }
 0xea3   :  { %v2143_v4 = vadd.f32 1.0, %v5098_v2 }
 0xea4   :  { %v5100_v3 = vpop.eup %5099 }
 0xea5   :  { %v2142_v10 = vadd.f32 1.0, %v5100_v3  ;;  %v2145_v16 = vmul.f32 %v2143_v4, %v2129_v12 }
 0xea7   :  { %v2144_v15 = vmul.f32 %v2142_v10, %v2128_v6 }
 0xea9   :  { %4864 = vmatprep.mubr.msk.f32.mxu1 %vm2161_vm14, %v2144_v15 }
 0xeaa   :  { %4865 = vmatmul.mubr.msk.f32.vlgmr.msra.gmra.mxu1 %vm2161_vm14, %v2145_v16 }
 0xeab   :  { %4890 = vmatprep.mubr.msk.f32.mxu1 %vm5335_vm6, %v5333_v11 }
 0xf6a   :  { %v4866_v22 = vpop.f32.mrf.mxu1 }
 0xf6b   :  { %v2240_v23 = vadd.f32 %v4866_v22, %v4475_v19 }
 0xf6c   :  { %v2234_v14 = vpop.f32.mrf.mxu1 }
 0xf6d   :  { %v2235_v24 = vadd.f32 %v4475_v19, %v2234_v14  ;;  %v2244_v25 = vadd.f32 %v2240_v23, %v2035_v41 }
 0xf6f   :  { %v2250_v8 = vsel %vm377_vm5, %v2244_v25, 0.0  ;;  %v2243_v7 = vadd.f32 %v2235_v24, %v5793_v39 }
 0xf70   :  { %2251 = vadd.xlane.f32.xlu0 %v2250_v8 }
 0xf71   :  { %v2247_v5 = vsel %vm377_vm5, %v2243_v7, 0.0 }
 0xf72   :  { %2248 = vadd.xlane.f32.xlu1 %v2247_v5 }
 0xff9   :  { %v2252_v26 = vpop.xlane.xlu0 %2251 }
 0xffa   :  { %v2254_v13 = vmul.f32 0.03125, %v2252_v26 }
 0xffb   :  { %v2249_v27 = vpop.xlane.xlu1 %2248 }
 0xffc   :  { %v2256_v28 = vsub.f32 %v2244_v25, %v2254_v13  ;;  %v2253_v0 = vmul.f32 0.03125, %v2249_v27 }
 0xffe   :  { %v2255_v29 = vsub.f32 %v2243_v7, %v2253_v0  ;;  %v2258_v30 = vmul.f32 %v2256_v28, %v2256_v28 }
0x1000   :  { %v2262_v20 = vsel %vm377_vm5, %v2258_v30, 0.0  ;;  %v2257_v31 = vmul.f32 %v2255_v29, %v2255_v29 }
0x1001   :  { %2263 = vadd.xlane.f32.xlu0 %v2262_v20 }
0x1002   :  { %v2259_v32 = vsel %vm377_vm5, %v2257_v31, 0.0 }
0x1003   :  { %2260 = vadd.xlane.f32.xlu1 %v2259_v32 }
0x108a   :  { %v2264_v37 = vpop.xlane.xlu0 %2263 }
0x108b   :  { %v2266_v38 = vmul.f32 0.03125, %v2264_v37 }
0x108c   :  { %v2261_v39 = vpop.xlane.xlu1 %2260 }
0x108d   :  { %v2268_v40 = vadd.f32 1e-12, %v2266_v38  ;;  %v2265_v41 = vmul.f32 0.03125, %v2261_v39 }
0x108f   :  { %5101 = vrsqrt.f32 %v2268_v40  ;;  %v2267_v42 = vadd.f32 1e-12, %v2265_v41 }
0x1091   :  { %5103 = vrsqrt.f32 %v2267_v42 }
0x109c   :  { %v5102_v43 = vpop.eup %5101 }
0x109d   :  { %v2272_v45 = vmul.f32 %v5102_v43, %v2256_v28 }
0x109e   :  { %v5104_v46 = vpop.eup %5103 }
0x109f   :  { %v2271_v47 = vmul.f32 %v5104_v46, %v2255_v29  ;;  %v2280_v48 = vmul.f32 %v4478_v44, %v2272_v45 }
0x10a1   :  { %v2279_v50 = vmul.f32 %v4478_v44, %v2271_v47  ;;  %v5823_v52 = vadd.f32 %v4479_v49, %v2280_v48 }
0x10a3   :  { %v5821_v51 = vadd.f32 %v4479_v49, %v2279_v50 }
0x10a5   :  { %4875 = vmatprep.mubr.msk.f32.mxu0 %vm377_vm5, %v5821_v51 }
0x10a6   :  { %4876 = vmatmul.mubr.msk.f32.vlgmr.msra.gmra.mxu0 %vm377_vm5, %v5823_v52 }
0x10a7   :  { %4880 = vmatprep.mubr.msk.f32.mxu0 %vm5335_vm6, %v5333_v11 }
0x1166   :  { %v4877_v53 = vpop.f32.mrf.mxu0 }
0x1167   :  { %v5848_v57 = vadd.f32 %v4877_v53, %v4481_v54 }
0x1168   :  { %v2374_v55 = vpop.f32.mrf.mxu0 }
0x1169   :  { %v5834_v56 = vadd.f32 %v4481_v54, %v2374_v55 }
0x116b   :  { %2552 = vrot.lane.b32.xlu0 %v5834_v56, %s5337_s28  ;;  %2384 = vrot.lane.b32.xlu1 %v5834_v56, %s5336_s15 }
0x116f   :  { %2722 = vrot.lane.b32.xlu0 %v5834_v56, %s5341_s4  ;;  %2550 = vrot.lane.b32.xlu1 %v5834_v56, %s5338_s29 }
0x1173   :  { %2894 = vrot.lane.b32.xlu0 %v5834_v56, %s5343_s24  ;;  %2724 = vrot.lane.b32.xlu1 %v5834_v56, %s5344_s5 }
0x1177   :  { %3235 = vrot.lane.b32.xlu0 %v5848_v57, %s5337_s28  ;;  %2896 = vrot.lane.b32.xlu1 %v5834_v56, %s5342_s30  ;;  %s6152_s28 = smov 24  }
0x117b   :  { %3407 = vrot.lane.b32.xlu0 %v5848_v57, %s5344_s5  ;;  %3067 = vrot.lane.b32.xlu1 %v5848_v57, %s5336_s15  ;;  %s6151_s15 = smov 16  }
0x117f   :  { %3579 = vrot.lane.b32.xlu0 %v5848_v57, %s5342_s30  ;;  %3233 = vrot.lane.b32.xlu1 %v5848_v57, %s5338_s29 }
0x1183   :  { %2473 = vrot.lane.b32.xlu0 %v5834_v56, %s5339_s19  ;;  %3405 = vrot.lane.b32.xlu1 %v5848_v57, %s5341_s4 }
0x1187   :  { %3577 = vrot.lane.b32.xlu1 %v5848_v57, %s5343_s24 }
0x118b   :  { %2641 = vrot.lane.b32.xlu1 %v5834_v56, %s5340_s0 }
0x11dd   :  { %v2553_v58 = vpop.permute.xlu0 %2552  ;;  %v2385_v59 = vpop.permute.xlu1 %2384 }
0x11de   :  { %4879 = vmatpush3.xpose.msk.msra.mxu0 %vm517_vm7, %v2385_v59  ;;  %4889 = vmatpush3.xpose.msk.msra.mxu1 %vm517_vm7, %v2553_v58 }
0x11df   :  { %4898 = vmatprep.subr.mxu1 %v5333_v11  ;;  %4883 = vmatprep.subr.mxu0 %v5333_v11 }
0x11e1   :  { %v2723_v60 = vpop.permute.xlu0 %2722  ;;  %4881 = vmatmul.mubr.msk.f32.vlgmr.msra.gmra.mxu0 %vm517_vm7, %v5834_v56  ;;  %v2551_v61 = vpop.permute.xlu1 %2550 }
0x11e2   :  { %4891 = vmatmul.mubr.msk.f32.vlgmr.msra.gmra.mxu1 %vm517_vm7, %v2551_v61  ;;  %4885 = vmatprep.mubr.msk.f32.mxu0 %vm5335_vm6, %v5333_v11 }
0x11e3   :  { %4900 = vmatprep.mubr.msk.f32.mxu1 %vm5335_vm6, %v5333_v11 }
0x11e5   :  { %v2895_v62 = vpop.permute.xlu0 %2894  ;;  %v2725_v63 = vpop.permute.xlu1 %2724 }
0x11e6   :  { %4899 = vmatpush3.xpose.msk.msra.mxu1 %vm517_vm7, %v2725_v63 }
0x11e7   :  { %4908 = vmatprep.subr.mxu1 %v5333_v11 }
0x11e9   :  { %v3236_v1 = vpop.permute.xlu0 %3235  ;;  %4901 = vmatmul.mubr.msk.f32.vlgmr.msra.gmra.mxu1 %vm517_vm7, %v2723_v60  ;;  %v2897_v2 = vpop.permute.xlu1 %2896 }
0x11ea   :  { %4909 = vmatpush3.xpose.msk.msra.mxu1 %vm517_vm7, %v2897_v2  ;;  %4910 = vmatprep.mubr.msk.f32.mxu1 %vm5335_vm6, %v5333_v11 }
0x11eb   :  { %4918 = vmatprep.subr.mxu1 %v5333_v11 }
0x11ed   :  { %v3408_v3 = vpop.permute.xlu0 %3407  ;;  %4911 = vmatmul.mubr.msk.f32.vlgmr.msra.gmra.mxu1 %vm517_vm7, %v2895_v62  ;;  %v3068_v4 = vpop.permute.xlu1 %3067 }
0x11ee   :  { %4919 = vmatpush3.xpose.msk.msra.mxu1 %vm517_vm7, %v3068_v4  ;;  %4920 = vmatprep.mubr.msk.f32.mxu1 %vm5335_vm6, %v5333_v11 }
0x11ef   :  { %4928 = vmatprep.subr.mxu1 %v5333_v11 }
0x11f1   :  { %v3580_v6 = vpop.permute.xlu0 %3579  ;;  %4921 = vmatmul.mubr.msk.f32.vlgmr.msra.gmra.mxu1 %vm517_vm7, %v5848_v57  ;;  %v3234_v10 = vpop.permute.xlu1 %3233 }
0x11f2   :  { %4929 = vmatpush3.xpose.msk.msra.mxu1 %vm517_vm7, %v3236_v1  ;;  %4930 = vmatprep.mubr.msk.f32.mxu1 %vm5335_vm6, %v5333_v11 }
0x11f3   :  { %4938 = vmatprep.subr.mxu1 %v5333_v11 }
0x11f5   :  { %v2474_v12 = vpop.permute.xlu0 %2473  ;;  %4931 = vmatmul.mubr.msk.f32.vlgmr.msra.gmra.mxu1 %vm517_vm7, %v3234_v10  ;;  %v3406_v15 = vpop.permute.xlu1 %3405 }
0x11f6   :  { %4884 = vmatpush3.msra.mxu0 %v2474_v12  ;;  %4939 = vmatpush3.xpose.msk.msra.mxu1 %vm517_vm7, %v3408_v3 }
0x11f7   :  { %4940 = vmatprep.mubr.msk.f32.mxu1 %vm5335_vm6, %v5333_v11  ;;  %4948 = vmatprep.subr.mxu1 %v5333_v11 }
0x11f8   :  { %4893 = vmatprep.subr.mxu0 %v5333_v11 }
0x11f9   :  { %4941 = vmatmul.mubr.msk.f32.vlgmr.msra.gmra.mxu1 %vm517_vm7, %v3406_v15  ;;  %v3578_v16 = vpop.permute.xlu1 %3577 }
0x11fa   :  { %4949 = vmatpush3.xpose.msk.msra.mxu1 %vm517_vm7, %v3580_v6  ;;  %4950 = vmatprep.mubr.msk.f32.mxu1 %vm5335_vm6, %v5333_v11 }
0x11fd   :  { %4951 = vmatmul.mubr.msk.f32.vlgmr.msra.gmra.mxu1 %vm517_vm7, %v3578_v16  ;;  %v5938_v55 = vpop.permute.xlu1 %2641 }
0x12a1   :  { %v2456_v19 = vpop.f32.mrf.mxu0 }
0x12a2   :  { %v2460_v22 = vmul.f32 0.35355338, %v2456_v19  ;;  %v2624_v23 = vpop.f32.mrf.mxu1 }
0x12a3   :  { %v2628_v14 = vmul.f32 0.35355338, %v2624_v23  ;;  %v4882_v24 = vpop.f32.mrf.mxu0 }
0x12a4   :  { %v4892_v25 = vpop.f32.mrf.mxu1  ;;  %v2461_v8 = vsel %vm599_vm9, %v2460_v22, -1e+09 }
0x12a5   :  { %v2462_v7 = vsel %vm517_vm7, %v2461_v8, -inf  ;;  %v2629_v5 = vsel %vm599_vm9, %v2628_v14, -1e+09 }
0x12a6   :  { %2463 = vmax.xlane.f32.xlu0 %v2462_v7  ;;  %v2630_v26 = vsel %vm517_vm7, %v2629_v5, -inf }
0x12a7   :  { %2631 = vmax.xlane.f32.xlu1 %v2630_v26 }
0x12a9   :  { %v2796_v13 = vpop.f32.mrf.mxu1 }
0x12aa   :  { %v2800_v27 = vmul.f32 0.35355338, %v2796_v13 }
0x12ab   :  { %v4902_v28 = vpop.f32.mrf.mxu1 }
0x12ac   :  { %v2801_v0 = vsel %vm599_vm9, %v2800_v27, -1e+09 }
0x12ad   :  { %v2968_v29 = vpop.f32.mrf.mxu1  ;;  %v2802_v30 = vsel %vm517_vm7, %v2801_v0, -inf }
0x12ae   :  { %v2972_v20 = vmul.f32 0.35355338, %v2968_v29  ;;  %2803 = vmax.xlane.f32.xlu0 %v2802_v30 }
0x12af   :  { %v4912_v31 = vpop.f32.mrf.mxu1 }
0x12b0   :  { %v2973_v32 = vsel %vm599_vm9, %v2972_v20, -1e+09 }
0x12b1   :  { %v3139_v33 = vpop.f32.mrf.mxu1  ;;  %v2974_v34 = vsel %vm517_vm7, %v2973_v32, -inf }
0x12b2   :  { %v3143_v35 = vmul.f32 0.35355338, %v3139_v33  ;;  %2975 = vmax.xlane.f32.xlu0 %v2974_v34 }
0x12b3   :  { %v4922_v36 = vpop.f32.mrf.mxu1 }
0x12b4   :  { %v3144_v37 = vsel %vm1290_vm10, %v3143_v35, -1e+09 }
0x12b5   :  { %v3307_v38 = vpop.f32.mrf.mxu1  ;;  %v3145_v39 = vsel %vm517_vm7, %v3144_v37, -inf }
0x12b6   :  { %v3311_v40 = vmul.f32 0.35355338, %v3307_v38  ;;  %3146 = vmax.xlane.f32.xlu1 %v3145_v39 }
0x12b7   :  { %v4932_v41 = vpop.f32.mrf.mxu1 }
0x12b8   :  { %v3312_v42 = vsel %vm1290_vm10, %v3311_v40, -1e+09 }
0x12b9   :  { %v3479_v21 = vpop.f32.mrf.mxu1  ;;  %v3313_v43 = vsel %vm517_vm7, %v3312_v42, -inf }
0x12ba   :  { %v3483_v44 = vmul.f32 0.35355338, %v3479_v21  ;;  %3314 = vmax.xlane.f32.xlu0 %v3313_v43 }
0x12bb   :  { %v4942_v45 = vpop.f32.mrf.mxu1 }
0x12bc   :  { %v3484_v46 = vsel %vm1290_vm10, %v3483_v44, -1e+09 }
0x12bd   :  { %v3651_v47 = vpop.f32.mrf.mxu1  ;;  %v3485_v48 = vsel %vm517_vm7, %v3484_v46, -inf }
0x12be   :  { %v3655_v49 = vmul.f32 0.35355338, %v3651_v47  ;;  %3486 = vmax.xlane.f32.xlu1 %v3485_v48 }
0x12bf   :  { %v4952_v50 = vpop.f32.mrf.mxu1 }
0x12c0   :  { %v3656_v53 = vsel %vm1290_vm10, %v3655_v49, -1e+09 }
0x12c1   :  { %v3657_v54 = vsel %vm517_vm7, %v3656_v53, -inf }
0x12c2   :  { %3658 = vmax.xlane.f32.xlu0 %v3657_v54 }
0x12cf   :  { %2985 = vrot.lane.b32.xlu1 %v5834_v56, %s5346_s9 }
0x12d8   :  { %2813 = vrot.lane.b32.xlu0 %v5834_v56, %s5345_s2 }
0x132f   :  { %v2464_v58 = vpop.xlane.xlu0 %2463 }
0x1330   :  { %v2465_v59 = vsub.f32 %v2461_v8, %v2464_v58  ;;  %v2632_v60 = vpop.xlane.xlu1 %2631 }
0x1331   :  { %v2633_v61 = vsub.f32 %v2629_v5, %v2632_v60 }
0x1332   :  { %v2466_v62 = vmul.f32 1.442695, %v2465_v59 }
0x1333   :  { %v2634_v63 = vmul.f32 1.442695, %v2633_v61 }
0x1334   :  { %5105 = vpow2.f32 %v2466_v62 }
0x1335   :  { %5107 = vpow2.f32 %v2634_v63 }
0x1337   :  { %v2804_v17 = vpop.xlane.xlu0 %2803 }
0x1338   :  { %v2805_v1 = vsub.f32 %v2801_v0, %v2804_v17 }
0x133a   :  { %v2806_v2 = vmul.f32 1.442695, %v2805_v1 }
0x133b   :  { %v2976_v3 = vpop.xlane.xlu0 %2975 }
0x133c   :  { %5109 = vpow2.f32 %v2806_v2  ;;  %v2977_v4 = vsub.f32 %v2973_v32, %v2976_v3 }
0x133e   :  { %v2978_v6 = vmul.f32 1.442695, %v2977_v4 }
0x133f   :  { %v3147_v14 = vpop.xlane.xlu1 %3146 }
0x1340   :  { %5111 = vpow2.f32 %v2978_v6  ;;  %v3148_v24 = vsub.f32 %v3144_v37, %v3147_v14  ;;  %v3755_v14 = vld [vmem:[#allocation9 + $0x38] sm:$0xff] }
0x1341   :  { %v5106_v10 = vpop.eup %5105  ;;  %4958 = vmatprep.subr.mxu1 %v3755_v14 }
0x1342   :  { %v5108_v56 = vpop.eup %5107  ;;  %v2468_v12 = vsel %vm517_vm7, %v5106_v10, 0.0  ;;  %v3149_v5 = vmul.f32 1.442695, %v3148_v24  ;;  %v3754_v24 = vld [vmem:[#allocation9 + $0x30] sm:$0xff]  ;;  %4959 = vmatpush3.msra.mxu1 %v3755_v14  ;;  %v4010_v14 = vld [vmem:[#allocation11 + $0x60] sm:$0xff] }
0x1343   :  { %2469 = vadd.xlane.f32.xlu1 %v2468_v12  ;;  %v2636_v15 = vsel %vm517_vm7, %v5108_v56, 0.0  ;;  %v3315_v25 = vpop.xlane.xlu0 %3314  ;;  %4960 = vmatprep.subr.mxu1 %v3754_v24 }
0x1344   :  { %2637 = vadd.xlane.f32.xlu0 %v2636_v15  ;;  %v3316_v7 = vsub.f32 %v3312_v42, %v3315_v25  ;;  %5113 = vpow2.f32 %v3149_v5  ;;  %4961 = vmatpush3.msra.mxu1 %v3754_v24  ;;  %v3752_v5 = vld [vmem:[#allocation9 + $0x20] sm:$0xff]  ;;  %v4009_v24 = vld [vmem:[#allocation11 + $0x58] sm:$0xff] }
0x1346   :  { %v3317_v27 = vmul.f32 1.442695, %v3316_v7 }
0x1347   :  { %v3487_v8 = vpop.xlane.xlu1 %3486 }
0x1348   :  { %v3488_v26 = vsub.f32 %v3484_v46, %v3487_v8  ;;  %5115 = vpow2.f32 %v3317_v27  ;;  %v3753_v8 = vld [vmem:[#allocation9 + $0x28] sm:$0xff] }
0x1349   :  { %v5110_v16 = vpop.eup %5109  ;;  %4962 = vmatprep.subr.mxu1 %v3753_v8 }
0x134a   :  { %v2808_v19 = vsel %vm517_vm7, %v5110_v16, 0.0  ;;  %v3489_v28 = vmul.f32 1.442695, %v3488_v26  ;;  %4963 = vmatpush3.msra.mxu1 %v3753_v8  ;;  %v4007_v8 = vld [vmem:[#allocation11 + $0x48] sm:$0xff] }
0x134b   :  { %2809 = vadd.xlane.f32.xlu1 %v2808_v19  ;;  %v3659_v13 = vpop.xlane.xlu0 %3658  ;;  %v2986_v37 = vpop.permute.xlu1 %2985  ;;  %4964 = vmatprep.subr.mxu1 %v3752_v5 }
0x134c   :  { %v3660_v0 = vsub.f32 %v3656_v53, %v3659_v13  ;;  %5117 = vpow2.f32 %v3489_v28  ;;  %4965 = vmatpush3.msra.mxu1 %v3752_v5  ;;  %v4521_v5 = vld [vmem:[%s6116_s14 + $0x1] ss:$0 sm:$0xff] }
0x134d   :  { %v5943_v22 = vpop.eup %5111 }
0x134e   :  { %v2980_v23 = vsel %vm517_vm7, %v5943_v22, 0.0  ;;  %v3661_v29 = vmul.f32 1.442695, %v3660_v0 }
0x134f   :  { %2981 = vadd.xlane.f32.xlu0 %v2980_v23  ;;  %v2814_v38 = vpop.permute.xlu0 %2813 }
0x1350   :  { %5119 = vpow2.f32 %v3661_v29 }
0x1351   :  { %v5114_v30 = vpop.eup %5113 }
0x1352   :  { %v3151_v31 = vsel %vm517_vm7, %v5114_v30, 0.0 }
0x1355   :  { %v5951_v20 = vpop.eup %5115 }
0x1356   :  { %v3319_v33 = vsel %vm517_vm7, %v5951_v20, 0.0 }
0x1359   :  { %v5954_v32 = vpop.eup %5117 }
0x135a   :  { %v3491_v34 = vsel %vm517_vm7, %v5954_v32, 0.0 }
0x135c   :  { %3324 = vrot.lane.b32.xlu1 %v5848_v57, %s5340_s0 }
0x135d   :  { %v5960_v35 = vpop.eup %5119 }
0x135e   :  { %v3663_v36 = vsel %vm517_vm7, %v5960_v35, 0.0 }
0x1365   :  { %3156 = vrot.lane.b32.xlu0 %v5848_v57, %s5339_s19 }
0x1380   :  { %3152 = vadd.xlane.f32.xlu1 %v3151_v31 }
0x1384   :  { %3320 = vadd.xlane.f32.xlu0 %v3319_v33  ;;  %3492 = vadd.xlane.f32.xlu1 %v3491_v34 }
0x1388   :  { %3664 = vadd.xlane.f32.xlu1 %v3663_v36  ;;  %v4509_v36 = vld [vmem:[%s6112_s10 + $0x1] ss:$0 sm:$0xff] }
0x1399   :  { %3668 = vrot.lane.b32.xlu1 %v5848_v57, %s5346_s9 }
0x139a   :  { %3496 = vrot.lane.b32.xlu0 %v5848_v57, %s5345_s2 }
0x13cc   :  { %v2470_v39 = vpop.xlane.xlu1 %2469 }
0x13cd   :  { %5121 = vrcp.f32 %v2470_v39  ;;  %v2638_v40 = vpop.xlane.xlu0 %2637 }
0x13ce   :  { %5123 = vrcp.f32 %v2638_v40 }
0x13d4   :  { %v2810_v41 = vpop.xlane.xlu1 %2809 }
0x13d5   :  { %5125 = vrcp.f32 %v2810_v41 }
0x13d8   :  { %v2982_v42 = vpop.xlane.xlu0 %2981  ;;  %v3325_v50 = vpop.permute.xlu1 %3324 }
0x13d9   :  { %5127 = vrcp.f32 %v2982_v42 }
0x13da   :  { %v5122_v21 = vpop.eup %5121 }
0x13db   :  { %v2472_v43 = vmul.f32 %v5122_v21, %v5106_v10  ;;  %v5124_v44 = vpop.eup %5123 }
0x13dc   :  { %v2640_v57 = vmul.f32 %v5124_v44, %v5108_v56  ;;  %v3157_v49 = vpop.permute.xlu0 %3156 }
0x13dd   :  { %4886 = vmatmul.mubr.msk.f32.vlgmr.msra.gmra.mxu0 %vm517_vm7, %v2472_v43 }
0x13de   :  { %4894 = vmatpush3.msra.mxu0 %v5938_v55  ;;  %4895 = vmatprep.mubr.msk.f32.mxu0 %vm5335_vm6, %v5333_v11 }
0x13df   :  { %4903 = vmatprep.subr.mxu0 %v5333_v11 }
0x13e1   :  { %4896 = vmatmul.mubr.msk.f32.vlgmr.msra.gmra.mxu0 %vm517_vm7, %v2640_v57 }
0x13e2   :  { %v5126_v45 = vpop.eup %5125  ;;  %4904 = vmatpush3.msra.mxu0 %v2814_v38  ;;  %4905 = vmatprep.mubr.msk.f32.mxu0 %vm5335_vm6, %v5333_v11 }
0x13e3   :  { %4913 = vmatprep.subr.mxu0 %v5333_v11  ;;  %v2812_v46 = vmul.f32 %v5126_v45, %v5110_v16 }
0x13e5   :  { %4906 = vmatmul.mubr.msk.f32.vlgmr.msra.gmra.mxu0 %vm517_vm7, %v2812_v46 }
0x13e6   :  { %v5128_v47 = vpop.eup %5127  ;;  %4914 = vmatpush3.msra.mxu0 %v2986_v37  ;;  %4915 = vmatprep.mubr.msk.f32.mxu0 %vm5335_vm6, %v5333_v11 }
0x13e7   :  { %4923 = vmatprep.subr.mxu0 %v5333_v11  ;;  %v2984_v48 = vmul.f32 %v5128_v47, %v5943_v22 }
0x13e9   :  { %4916 = vmatmul.mubr.msk.f32.vlgmr.msra.gmra.mxu0 %vm517_vm7, %v2984_v48 }
0x13ea   :  { %4924 = vmatpush3.msra.mxu0 %v3157_v49  ;;  %4925 = vmatprep.mubr.msk.f32.mxu0 %vm5335_vm6, %v5333_v11 }
0x13eb   :  { %4933 = vmatprep.subr.mxu0 %v5333_v11 }
0x1409   :  { %v3153_v53 = vpop.xlane.xlu1 %3152 }
0x140a   :  { %5129 = vrcp.f32 %v3153_v53 }
0x140d   :  { %v3321_v54 = vpop.xlane.xlu0 %3320  ;;  %v3493_v55 = vpop.xlane.xlu1 %3492 }
0x140e   :  { %5131 = vrcp.f32 %v3321_v54  ;;  %v4518_v54 = vld [vmem:[%s6115_s13 + $0x30] sm:$0xff] }
0x140f   :  { %5133 = vrcp.f32 %v3493_v55  ;;  %v4517_v55 = vld [vmem:[%s6115_s13 + $0x28] sm:$0xff] }
0x1411   :  { %v3665_v58 = vpop.xlane.xlu1 %3664  ;;  %v3497_v17 = vpop.permute.xlu0 %3496 }
0x1412   :  { %5135 = vrcp.f32 %v3665_v58  ;;  %v4516_v58 = vld [vmem:[%s6115_s13 + $0x20] sm:$0xff] }
0x1415   :  { %v3669_v3 = vpop.permute.xlu1 %3668 }
0x1417   :  { %v5130_v59 = vpop.eup %5129 }
0x1418   :  { %v3155_v60 = vmul.f32 %v5130_v59, %v5114_v30 }
0x141a   :  { %4926 = vmatmul.mubr.msk.f32.vlgmr.msra.gmra.mxu0 %vm517_vm7, %v3155_v60 }
0x141b   :  { %v5132_v61 = vpop.eup %5131  ;;  %4934 = vmatpush3.msra.mxu0 %v3325_v50  ;;  %4935 = vmatprep.mubr.msk.f32.mxu0 %vm5335_vm6, %v5333_v11 }
0x141c   :  { %4943 = vmatprep.subr.mxu0 %v5333_v11  ;;  %v3323_v62 = vmul.f32 %v5132_v61, %v5951_v20  ;;  %v5134_v63 = vpop.eup %5133 }
0x141d   :  { %v3495_v1 = vmul.f32 %v5134_v63, %v5954_v32 }
0x141e   :  { %4936 = vmatmul.mubr.msk.f32.vlgmr.msra.gmra.mxu0 %vm517_vm7, %v3323_v62 }
0x141f   :  { %4944 = vmatpush3.msra.mxu0 %v3497_v17  ;;  %4945 = vmatprep.mubr.msk.f32.mxu0 %vm5335_vm6, %v5333_v11  ;;  %v5136_v2 = vpop.eup %5135 }
0x1420   :  { %4953 = vmatprep.subr.mxu0 %v5333_v11  ;;  %v3667_v4 = vmul.f32 %v5136_v2, %v5960_v35  ;;  %v4514_v2 = vld [vmem:[%s6113_s11 + $0x1] ss:$0 sm:$0xff] }
0x1422   :  { %4946 = vmatmul.mubr.msk.f32.vlgmr.msra.gmra.mxu0 %vm517_vm7, %v3495_v1 }
0x1423   :  { %4954 = vmatpush3.msra.mxu0 %v3669_v3  ;;  %4955 = vmatprep.mubr.msk.f32.mxu0 %vm5335_vm6, %v5333_v11 }
0x1426   :  { %4956 = vmatmul.mubr.msk.f32.vlgmr.msra.gmra.mxu0 %vm517_vm7, %v3667_v4  ;;  %v4515_v4 = vld [vmem:[%s6114_s12 + $0x1] ss:$0 sm:$0xff] }
0x149d   :  { %v2545_v6 = vpop.f32.mrf.mxu0 }
0x149e   :  { %2549 = vst.msk [vmem:[#allocation2] sm:$0xff] %vm517_vm7, %v2545_v6 }
0x149f   :  { %v4887_v10 = vpop.f32.mrf.mxu0 }
0x14a1   :  { %v2713_v56 = vpop.f32.mrf.mxu0 }
0x14a2   :  { %2718 = vrot.lane.b32.xlu0 %v2713_v56, %s6150_s8 }
0x14a3   :  { %v4897_v12 = vpop.f32.mrf.mxu0 }
0x14a5   :  { %v2885_v15 = vpop.f32.mrf.mxu0 }
0x14a6   :  { %2890 = vrot.lane.b32.xlu1 %v2885_v15, %s6151_s15 }
0x14a7   :  { %v4907_v16 = vpop.f32.mrf.mxu0 }
0x14a9   :  { %v3057_v19 = vpop.f32.mrf.mxu0 }
0x14aa   :  { %3062 = vrot.lane.b32.xlu1 %v3057_v19, %s6152_s28  ;;  %v4013_v19 = vld [vmem:[#allocation11 + $0x78] sm:$0xff] }
0x14ab   :  { %v4917_v22 = vpop.f32.mrf.mxu0  ;;  %4980 = vmatprep.subr.mxu1 %v4013_v19 }
0x14ac   :  { %v4012_v22 = vld [vmem:[#allocation11 + $0x70] sm:$0xff] }
0x14da   :  { %v3228_v23 = vpop.f32.mrf.mxu0 }
0x14db   :  { %3232 = vst.msk [vmem:[#allocation2 + $0x8] sm:$0xff] %vm517_vm7, %v3228_v23  ;;  %v4011_v23 = vld [vmem:[#allocation11 + $0x68] sm:$0xff] }
0x14dc   :  { %v4927_v25 = vpop.f32.mrf.mxu0 }
0x14dd   :  { %v4008_v25 = vld [vmem:[#allocation11 + $0x50] sm:$0xff] }
0x14de   :  { %v3396_v7 = vpop.f32.mrf.mxu0 }
0x14df   :  { %3401 = vrot.lane.b32.xlu0 %v3396_v7, %s6150_s8  ;;  %v4006_v7 = vld [vmem:[#allocation11 + $0x40] sm:$0xff] }
0x14e0   :  { %v4937_v26 = vpop.f32.mrf.mxu0 }
0x14e2   :  { %v3568_v13 = vpop.f32.mrf.mxu0 }
0x14e3   :  { %3573 = vrot.lane.b32.xlu0 %v3568_v13, %s6151_s15 }
0x14e4   :  { %v4947_v27 = vpop.f32.mrf.mxu0 }
0x14e6   :  { %v3740_v28 = vpop.f32.mrf.mxu0 }
0x14e7   :  { %3745 = vrot.lane.b32.xlu1 %v3740_v28, %s6152_s28 }
0x14e8   :  { %v4957_v0 = vpop.f32.mrf.mxu0 }
0x1514   :  { %v2719_v29 = vpop.permute.xlu0 %2718 }
0x1515   :  { %2721 = vst.msk [vmem:[#allocation2] sm:$0xff] %vm860_vm11, %v2719_v29 }
0x1518   :  { %v2891_v30 = vpop.permute.xlu1 %2890 }
0x1519   :  { %2893 = vst.msk [vmem:[#allocation2] sm:$0xff] %vm1033_vm12, %v2891_v30 }
0x151c   :  { %v3063_v20 = vpop.permute.xlu1 %3062 }
0x151d   :  { %3065 = vst.msk [vmem:[#allocation2] sm:$0xff] %vm1206_vm13, %v3063_v20 }
0x1524   :  { %v3749_v31 = vld [vmem:[#allocation2] sm:$0xff] }
0x1525   :  { %4966 = vmatprep.mubr.msk.f32.mxu1 %vm377_vm5, %v3749_v31 }
0x1551   :  { %v3402_v32 = vpop.permute.xlu0 %3401 }
0x1552   :  { %3404 = vst.msk [vmem:[#allocation2 + $0x8] sm:$0xff] %vm860_vm11, %v3402_v32 }
0x1555   :  { %v3574_v33 = vpop.permute.xlu0 %3573 }
0x1556   :  { %3576 = vst.msk [vmem:[#allocation2 + $0x8] sm:$0xff] %vm1033_vm12, %v3574_v33 }
0x1559   :  { %v3746_v34 = vpop.permute.xlu1 %3745 }
0x155a   :  { %3748 = vst.msk [vmem:[#allocation2 + $0x8] sm:$0xff] %vm1206_vm13, %v3746_v34 }
0x1561   :  { %v3750_v35 = vld [vmem:[#allocation2 + $0x8] sm:$0xff] }
0x1562   :  { %4967 = vmatmul.mubr.msk.f32.vlgmr.msra.gmra.mxu1 %vm377_vm5, %v3750_v35 }
0x1563   :  { %4981 = vmatpush3.msra.mxu1 %v4013_v19  ;;  %v4531_v19 = vld [vmem:[%s6120_s18 + $0x1] ss:$0 sm:$0xff] }
0x1564   :  { %4982 = vmatprep.subr.mxu1 %v4012_v22 }
0x1565   :  { %4983 = vmatpush3.msra.mxu1 %v4012_v22 }
0x1566   :  { %4984 = vmatprep.subr.mxu1 %v4011_v23 }
0x1567   :  { %4985 = vmatpush3.msra.mxu1 %v4011_v23 }
0x1568   :  { %4986 = vmatprep.subr.mxu1 %v4010_v14 }
0x1569   :  { %4987 = vmatpush3.msra.mxu1 %v4010_v14 }
0x156a   :  { %4988 = vmatprep.subr.mxu1 %v4009_v24 }
0x156b   :  { %4989 = vmatpush3.msra.mxu1 %v4009_v24 }
0x156c   :  { %4990 = vmatprep.subr.mxu1 %v4008_v25 }
0x156d   :  { %4991 = vmatpush3.msra.mxu1 %v4008_v25 }
0x156e   :  { %4992 = vmatprep.subr.mxu1 %v4007_v8 }
0x156f   :  { %4993 = vmatpush3.msra.mxu1 %v4007_v8 }
0x1570   :  { %4994 = vmatprep.subr.mxu1 %v4006_v7 }
0x1571   :  { %4995 = vmatpush3.msra.mxu1 %v4006_v7  ;;  %v4233_v7 = vld [vmem:[#allocation12 + $0x18] sm:$0xff] }
0x1622   :  { %v4968_v37 = vpop.f32.mrf.mxu1 }
0x1623   :  { %v3842_v38 = vadd.f32 %v4968_v37, %v4509_v36 }
0x1624   :  { %v3836_v39 = vpop.f32.mrf.mxu1 }
0x1625   :  { %v3846_v40 = vadd.f32 %v3842_v38, %v5823_v52  ;;  %v3837_v41 = vadd.f32 %v4509_v36, %v3836_v39 }
0x1627   :  { %v3845_v42 = vadd.f32 %v3837_v41, %v5821_v51  ;;  %v3854_v21 = vsel %vm377_vm5, %v3846_v40, 0.0  ;;  %v4519_v51 = vld [vmem:[%s6115_s13 + $0x38] sm:$0xff] }
0x1628   :  { %3855 = vadd.xlane.f32.xlu1 %v3854_v21  ;;  %4969 = vmatprep.subr.mxu0 %v4519_v51 }
0x1629   :  { %v3851_v43 = vsel %vm377_vm5, %v3845_v42, 0.0  ;;  %4970 = vmatpush3.msra.mxu0 %v4519_v51 }
0x162a   :  { %3852 = vadd.xlane.f32.xlu0 %v3851_v43  ;;  %4971 = vmatprep.subr.mxu0 %v4518_v54 }
0x162b   :  { %4972 = vmatpush3.msra.mxu0 %v4518_v54 }
0x162c   :  { %4973 = vmatprep.subr.mxu0 %v4517_v55 }
0x162d   :  { %4974 = vmatpush3.msra.mxu0 %v4517_v55 }
0x162e   :  { %4975 = vmatprep.subr.mxu0 %v4516_v58 }
0x162f   :  { %4976 = vmatpush3.msra.mxu0 %v4516_v58 }
0x1630   :  { %4999 = vmatprep.subr.mxu0 %v5333_v11 }
0x16b1   :  { %v3856_v44 = vpop.xlane.xlu1 %3855 }
0x16b2   :  { %v3858_v57 = vmul.f32 0.03125, %v3856_v44  ;;  %v4525_v44 = vld [vmem:[%s6118_s16 + $0x1] ss:$0 sm:$0xff] }
0x16b3   :  { %v3853_v45 = vpop.xlane.xlu0 %3852 }
0x16b4   :  { %v3857_v46 = vmul.f32 0.03125, %v3853_v45  ;;  %v3860_v47 = vsub.f32 %v3846_v40, %v3858_v57 }
0x16b6   :  { %v3859_v48 = vsub.f32 %v3845_v42, %v3857_v46  ;;  %v3862_v53 = vmul.f32 %v3860_v47, %v3860_v47 }
0x16b8   :  { %v3861_v49 = vmul.f32 %v3859_v48, %v3859_v48  ;;  %v3866_v52 = vsel %vm377_vm5, %v3862_v53, 0.0 }
0x16ba   :  { %v3863_v50 = vsel %vm377_vm5, %v3861_v49, 0.0 }
0x16bb   :  { %3864 = vadd.xlane.f32.xlu0 %v3863_v50 }
0x16bf   :  { %3867 = vadd.xlane.f32.xlu0 %v3866_v52 }
0x1744   :  { %v3865_v59 = vpop.xlane.xlu0 %3864 }
0x1745   :  { %v3869_v60 = vmul.f32 0.03125, %v3865_v59 }
0x1747   :  { %v3871_v61 = vadd.f32 1e-12, %v3869_v60 }
0x1748   :  { %v3868_v62 = vpop.xlane.xlu0 %3867 }
0x1749   :  { %5137 = vrsqrt.f32 %v3871_v61  ;;  %v3870_v63 = vmul.f32 0.03125, %v3868_v62 }
0x174b   :  { %v3872_v17 = vadd.f32 1e-12, %v3870_v63 }
0x174d   :  { %5139 = vrsqrt.f32 %v3872_v17 }
0x1756   :  { %v5138_v1 = vpop.eup %5137 }
0x1757   :  { %v3875_v3 = vmul.f32 %v5138_v1, %v3859_v48 }
0x1759   :  { %v3883_v6 = vmul.f32 %v4514_v2, %v3875_v3 }
0x175a   :  { %v5140_v10 = vpop.eup %5139 }
0x175b   :  { %v3876_v56 = vmul.f32 %v5140_v10, %v3860_v47  ;;  %v6045_v12 = vadd.f32 %v4515_v4, %v3883_v6 }
0x175d   :  { %v3884_v15 = vmul.f32 %v4514_v2, %v3876_v56  ;;  %4977 = vmatprep.mubr.msk.f32.mxu0 %vm377_vm5, %v6045_v12  ;;  %v4530_v56 = vld [vmem:[%s6119_s17 + $0x1] ss:$0 sm:$0xff] }
0x175f   :  { %v3892_v16 = vadd.f32 %v4515_v4, %v3884_v15 }
0x1761   :  { %4978 = vmatmul.mubr.msk.f32.vlgmr.msra.gmra.mxu0 %vm377_vm5, %v3892_v16 }
0x1762   :  { %5003 = vmatprep.mubr.msk.f32.mxu0 %vm5335_vm6, %v5333_v11 }
0x1821   :  { %v4979_v26 = vpop.f32.mrf.mxu0 }
0x1822   :  { %v3984_v13 = vadd.f32 %v4979_v26, %v4521_v5  ;;  %v4318_v26 = vld [vmem:[#allocation14 + $0x18] sm:$0xff] }
0x1823   :  { %v3978_v27 = vpop.f32.mrf.mxu0 }
0x1824   :  { %v3990_v28 = vmul.f32 0.044715, %v3984_v13  ;;  %v3979_v0 = vadd.f32 %v4521_v5, %v3978_v27  ;;  %v3988_v42 = vmul.f32 0.5, %v3984_v13  ;;  %v4230_v5 = vld [vmem:[#allocation12] sm:$0xff] }
0x1826   :  { %v3992_v29 = vmul.f32 %v3990_v28, %v3984_v13  ;;  %v3989_v30 = vmul.f32 0.044715, %v3979_v0  ;;  %v3987_v40 = vmul.f32 0.5, %v3979_v0  ;;  %v4317_v28 = vld [vmem:[#allocation14 + $0x10] sm:$0xff] }
0x1828   :  { %v3994_v20 = vmul.f32 %v3992_v29, %v3984_v13  ;;  %v3991_v31 = vmul.f32 %v3989_v30, %v3979_v0  ;;  %v4315_v29 = vld [vmem:[#allocation14] sm:$0xff] }
0x1829   :  { %v4534_v30 = vld [vmem:[%s6122_s20] ss:$0 sm:$0xff]  ;;  %s5349_s20 = smov [#allocation15]  }
0x182a   :  { %v3996_v32 = vadd.f32 %v3994_v20, %v3984_v13  ;;  %v3993_v33 = vmul.f32 %v3991_v31, %v3979_v0  ;;  %s4418_s15 = sshll.u32 %s5349_s20, 4  ;;  %s4419_s15 = int_to_ptr.vmem [resolvable:$true] %s4418_s15 }
0x182b   :  { %p5298_p8 = scmp.lt.s32.totalorder %s4419_s15, %s4419_s15 }
0x182c   :  { %v3998_v34 = vmul.f32 0.7978846, %v3996_v32  ;;  %v3995_v35 = vadd.f32 %v3993_v33, %v3979_v0  ;;  %v4316_v0 = vld [vmem:[#allocation14 + $0x8] sm:$0xff] }
0x182e   :  { %5141 = vtanh.f32 %v3998_v34  ;;  %v3997_v36 = vmul.f32 0.7978846, %v3995_v35  ;;  %v4536_v34 = vld [vmem:[%s6124_s22] ss:$0 sm:$0xff]  ;;  %s5293_s22 = scalar_lea.vmem %s4419_s15, 32 }
0x182f   :  { %p5294_p7 = scmp.ne.s32.totalorder %s4419_s15, %s5293_s22  ;;  %p5299_p9 = scmp.lt.s32.totalorder %s5293_s22, %s5293_s22 }
0x1830   :  { %5143 = vtanh.f32 %v3997_v36 }
0x1831   :  { %p5300_p10 = por %p5299_p9, %p5298_p8 }
0x1833   :  { %p5301_p11 = pnand %p5300_p10, %p5294_p7 }
0x183b   :  { %v5142_v37 = vpop.eup %5141 }
0x183c   :  { %v4002_v39 = vadd.f32 1.0, %v5142_v37 }
0x183d   :  { %v5144_v38 = vpop.eup %5143 }
0x183e   :  { %v4001_v41 = vadd.f32 1.0, %v5144_v38  ;;  %v4004_v43 = vmul.f32 %v4002_v39, %v3988_v42 }
0x1840   :  { %v4003_v21 = vmul.f32 %v4001_v41, %v3987_v40 }
0x1842   :  { %4996 = vmatprep.mubr.msk.f32.mxu1 %vm2161_vm14, %v4003_v21 }
0x1843   :  { %4997 = vmatmul.mubr.msk.f32.vlgmr.msra.gmra.mxu1 %vm2161_vm14, %v4004_v43 }
0x1903   :  { %v4998_v57 = vpop.f32.mrf.mxu1 }
0x1904   :  { %v4100_v45 = vadd.f32 %v4998_v57, %v4525_v44 }
0x1905   :  { %v4094_v46 = vpop.f32.mrf.mxu1 }
0x1906   :  { %v4104_v47 = vadd.f32 %v4100_v45, %v3892_v16  ;;  %v4095_v48 = vadd.f32 %v4525_v44, %v4094_v46 }
0x1908   :  { %v4103_v49 = vadd.f32 %v4095_v48, %v6045_v12  ;;  %v4112_v50 = vsel %vm377_vm5, %v4104_v47, 0.0  ;;  %v4153_v12 = vmul.u32 8, %v5584_v18  ;;  %v4232_v18 = vld [vmem:[#allocation12 + $0x10] sm:$0xff] }
0x1909   :  { %4113 = vadd.xlane.f32.xlu1 %v4112_v50 }
0x190a   :  { %v4109_v53 = vsel %vm377_vm5, %v4103_v49, 0.0  ;;  %vm4154_vm15 = vcmp.eq.s32.totalorder %v5527_v9, %v4153_v12  ;;  %v4231_v9 = vld [vmem:[#allocation12 + $0x8] sm:$0xff] }
0x190b   :  { %4110 = vadd.xlane.f32.xlu0 %v4109_v53  ;;  %v4532_v8 = vsel %vm4154_vm15, 1.0, %v5333_v11 }
0x1992   :  { %v4114_v52 = vpop.xlane.xlu1 %4113 }
0x1993   :  { %v4116_v51 = vmul.f32 0.03125, %v4114_v52 }
0x1994   :  { %v4111_v54 = vpop.xlane.xlu0 %4110 }
0x1995   :  { %v4118_v55 = vsub.f32 %v4104_v47, %v4116_v51  ;;  %v4115_v58 = vmul.f32 0.03125, %v4111_v54 }
0x1997   :  { %v4117_v59 = vsub.f32 %v4103_v49, %v4115_v58  ;;  %v4120_v60 = vmul.f32 %v4118_v55, %v4118_v55 }
0x1999   :  { %v4124_v61 = vsel %vm377_vm5, %v4120_v60, 0.0  ;;  %v4119_v62 = vmul.f32 %v4117_v59, %v4117_v59 }
0x199a   :  { %4125 = vadd.xlane.f32.xlu1 %v4124_v61 }
0x199b   :  { %v4121_v63 = vsel %vm377_vm5, %v4119_v62, 0.0 }
0x199c   :  { %4122 = vadd.xlane.f32.xlu0 %v4121_v63 }
0x1a23   :  { %v4126_v17 = vpop.xlane.xlu1 %4125 }
0x1a24   :  { %v4128_v1 = vmul.f32 0.03125, %v4126_v17 }
0x1a25   :  { %v4123_v2 = vpop.xlane.xlu0 %4122 }
0x1a26   :  { %v4130_v3 = vadd.f32 1e-12, %v4128_v1  ;;  %v4127_v4 = vmul.f32 0.03125, %v4123_v2 }
0x1a28   :  { %5145 = vrsqrt.f32 %v4130_v3  ;;  %v4129_v6 = vadd.f32 1e-12, %v4127_v4 }
0x1a2a   :  { %5147 = vrsqrt.f32 %v4129_v6 }
0x1a35   :  { %v5146_v10 = vpop.eup %5145 }
0x1a36   :  { %v4134_v15 = vmul.f32 %v5146_v10, %v4118_v55 }
0x1a37   :  { %v5148_v16 = vpop.eup %5147 }
0x1a38   :  { %v4142_v22 = vmul.f32 %v4530_v56, %v4134_v15  ;;  %v4133_v23 = vmul.f32 %v5148_v16, %v4117_v59 }
0x1a3a   :  { %v4150_v14 = vadd.f32 %v4531_v19, %v4142_v22  ;;  %v4141_v24 = vmul.f32 %v4530_v56, %v4133_v23 }
0x1a3c   :  { %5000 = vmatpush3.msra.mxu0 %v4150_v14  ;;  %v4149_v25 = vadd.f32 %v4531_v19, %v4141_v24 }
0x1a3d   :  { %5001 = vmatprep.subr.mxu0 %v5333_v11 }
0x1a3e   :  { %5002 = vmatpush3.msra.mxu0 %v4149_v25 }
0x1a3f   :  { %5004 = vmatmul.mubr.msk.f32.vlgmr.msra.gmra.mxu0 %vm218_vm0, %v4532_v8  ;;  %5006 = vmatprep.subr.mxu0 %v5333_v11  ;;  %vm4399_vm0 = vcmask 25600  }
0x1a40   :  { %5007 = vmatpush3.msra.mxu0 %v4233_v7  ;;  %5014 = vmatprep.mubr.msk.f32.mxu0 %vm5335_vm6, %v5333_v11 }
0x1a41   :  { %5008 = vmatprep.subr.mxu0 %v5333_v11 }
0x1a42   :  { %5009 = vmatpush3.msra.mxu0 %v4232_v18 }
0x1a43   :  { %5010 = vmatprep.subr.mxu0 %v5333_v11 }
0x1a44   :  { %5011 = vmatpush3.msra.mxu0 %v4231_v9 }
0x1a45   :  { %5012 = vmatprep.subr.mxu0 %v5333_v11 }
0x1a46   :  { %5013 = vmatpush3.msra.mxu0 %v4230_v5 }
0x1a47   :  { %5017 = vmatprep.subr.mxu0 %v5333_v11 }
0x1aff   :  { %v4226_v13 = vpop.f32.mrf.mxu0 }
0x1b00   :  { %5015 = vmatmul.mubr.msk.f32.vlgmr.msra.gmra.mxu0 %vm377_vm5, %v4226_v13 }
0x1b01   :  { %v5005_v27 = vpop.f32.mrf.mxu0  ;;  %5018 = vmatpush3.msra.mxu0 %v4318_v26  ;;  %5025 = vmatprep.mubr.msk.f32.mxu0 %vm5335_vm6, %v5333_v11 }
0x1b02   :  { %5019 = vmatprep.subr.mxu0 %v5333_v11 }
0x1b03   :  { %5020 = vmatpush3.msra.mxu0 %v4317_v28 }
0x1b04   :  { %5021 = vmatprep.subr.mxu0 %v5333_v11 }
0x1b05   :  { %5022 = vmatpush3.msra.mxu0 %v4316_v0 }
0x1b06   :  { %5023 = vmatprep.subr.mxu0 %v5333_v11 }
0x1b07   :  { %5024 = vmatpush3.msra.mxu0 %v4315_v29 }
0x1bc0   :  { %v4310_v20 = vpop.f32.mrf.mxu0 }
0x1bc1   :  { %v4311_v31 = vadd.f32 %v4534_v30, %v4310_v20 }
0x1bc2   :  { %v5016_v32 = vpop.f32.mrf.mxu0 }
0x1bc3   :  { %v4314_v33 = vmax.f32 %v4311_v31, 0.0 }
0x1bc5   :  { %5026 = vmatmul.mubr.msk.f32.vlgmr.msra.gmra.mxu0 %vm377_vm5, %v4314_v33 }
0x1c85   :  { %v4395_v35 = vpop.f32.mrf.mxu0 }
0x1c86   :  { %v4396_v36 = vadd.f32 %v4536_v34, %v4395_v35 }
0x1c87   :  { %v5027_v37 = vpop.f32.mrf.mxu0 }
0x1c88   :  { %v4400_v11 = vsel %vm4399_vm0, %v4396_v36, -inf }
0x1c89   :  { %4401 = vmax.xlane.f32.xlu1 %v4400_v11 }
0x1d12   :  { %v4402_v38 = vpop.xlane.xlu1 %4401 }
0x1d13   :  { %v4403_v39 = vsub.f32 %v4396_v36, %v4402_v38 }
0x1d15   :  { %v4404_v40 = vmul.f32 1.442695, %v4403_v39 }
0x1d17   :  { %5149 = vpow2.f32 %v4404_v40 }
0x1d24   :  { %v5150_v41 = vpop.eup %5149 }
0x1d25   :  { %v4406_v42 = vsel %vm4399_vm0, %v5150_v41, 0.0 }
0x1d26   :  { %4407 = vadd.xlane.f32.xlu0 %v4406_v42 }
0x1daf   :  { %v4408_v21 = vpop.xlane.xlu0 %4407 }
0x1db0   :  { %5151 = vrcp.f32 %v4408_v21 }
0x1dbd   :  { %v5152_v43 = vpop.eup %5151 }
0x1dbe   :  { %v4410_v44 = vmul.f32 %v5152_v43, %v5150_v41 }
0x1dc0   :  { %4411 = vst.msk [vmem:[#allocation15] sm:$0x3] %vm4399_vm0, %v4410_v44 }
0x1dc1   :  { %5304 = shalt.err (!%p5301_p11)
}
0x1dc2   :  { %4421 = dma.vmem_to_hbm [thread:$0]  %s4419_s15, 32, %s6125_s23, [#allocation5]  }
0x1dc3   :  { %5321 = dma.done.wait [#allocation5], 32  }
0x1dc4   :  { %5322 = vsyncadd [#allocation5], 4294967264 }
0x1dc5   :  { %4425 = vsyncpa [#allocation4], 1 }
0x1dc6   :  { %4426 = vsyncpa [#allocation7], 1 }
0x1dc7   :  { %4427 = vsyncpa [#allocation10], 1 }
0x1dc8   :  { %4428 = vsyncpa [#allocation13], 1 }
0x1dc9   :  { %4429 = vsyncpa [#allocation5], 1 }

</bundles_post_ra>
